<compile_context>
chip_gen: v7x
topology: tpu7x:2x2x1
jax: 0.10.0
libtpu: 0.0.40
codegen_flags: <defaults>
</compile_context>

<pallas_src>
import functools
import math

import jax
import jax.numpy as jnp
import numpy as np
from jax.experimental import pallas as pl
from jax.experimental.pallas import tpu as pltpu


def _round_up(v, m):
    return ((v + m - 1) // m) * m


# ----------------------------------------------------------------------------
# Pallas kernel: one grid step = TB windows.
# q/k/v projections, per-head scaled attention + relative-position bias,
# f32 softmax, lane-dense fused (attn @ (v @ Wproj_h)) accumulation.
# ----------------------------------------------------------------------------
def _window_attn_kernel(x_ref, wq_ref, wk_ref, wv_ref, bq_ref, bk_ref, bv_ref,
                        bias_ref, wproj_ref, bproj_ref, o_ref, *,
                        num_heads, head_dim, seq_len):
    n = seq_len
    tb = x_ref.shape[0] // n                      # windows in this block
    c = wproj_ref.shape[1]

    x2d = x_ref[...]                              # (TB*N, C) bf16

    # Projections on the whole slab: bf16 MXU operands, f32 accumulation.
    # The softmax scale is pre-folded into wq / bq wrapper-side.
    q = jnp.dot(x2d, wq_ref[...], preferred_element_type=jnp.float32) + bq_ref[...]
    k = jnp.dot(x2d, wk_ref[...], preferred_element_type=jnp.float32) + bk_ref[...]
    v = jnp.dot(x2d, wv_ref[...], preferred_element_type=jnp.float32) + bv_ref[...]
    q = q.astype(jnp.bfloat16)
    k = k.astype(jnp.bfloat16)
    v = v.astype(jnp.bfloat16)

    y = None
    for h in range(num_heads):                    # static, small H
        lo = h * head_dim
        # Head split is a compile-time lane slice; the reshape only splits the
        # leading (TB*N) axis (lane dim unchanged) so it is layout-free.
        q_h = q[:, lo:lo + head_dim].reshape(tb, n, head_dim)   # (TB, N, hd)
        k_h = k[:, lo:lo + head_dim].reshape(tb, n, head_dim)

        # Fused V_h @ Wproj_h: (TB*N, hd) @ (hd, C) -> lane-dense (TB*N, C).
        # Summed over heads this equals the original output projection, but it
        # makes the batched PV matmul below C lanes wide (instead of hd=8) and
        # removes the lane-axis concat of per-head outputs entirely.
        vp_h = jnp.dot(v[:, lo:lo + head_dim], wproj_ref[lo:lo + head_dim, :],
                       preferred_element_type=jnp.float32)
        vp_h = vp_h.astype(jnp.bfloat16).reshape(tb, n, c)      # (TB, N, C)

        # Window-batched attention scores + shared relative-position bias.
        s = jnp.einsum('bnd,bmd->bnm', q_h, k_h,
                       preferred_element_type=jnp.float32)      # (TB, N, N)
        s = s + bias_ref[h][None]

        # Numerically stable softmax in f32; denominator reciprocal -> EUP.
        s = s - jnp.max(s, axis=-1, keepdims=True)
        p = jnp.exp(s)
        p = p * pl.reciprocal(jnp.sum(p, axis=-1, keepdims=True), approx=True)

        y_h = jnp.einsum('bnm,bmc->bnc', p.astype(jnp.bfloat16), vp_h,
                         preferred_element_type=jnp.float32)     # (TB, N, C)
        y_h = y_h.reshape(tb * n, c)
        y = y_h if y is None else y + y_h

    o_ref[...] = (y + bproj_ref[...]).astype(o_ref.dtype)


# ----------------------------------------------------------------------------
# Wrapper
# ----------------------------------------------------------------------------
def _num_tensorcores():
    """v7x exposes 2 TensorCores per chip (parallel grid axis shards across
    them); v5e/v6e have 1, where a forced grid split only adds overhead."""
    try:
        kind = jax.devices()[0].device_kind.lower()
    except Exception:
        return 1
    return 2 if ('v7' in kind or '7x' in kind) else 1


def _rel_pos_index(window_size):
    Wh, Ww = window_size
    coords = np.stack(np.meshgrid(np.arange(Wh), np.arange(Ww), indexing='ij'))
    coords_flat = coords.reshape(2, -1)                               # (2, N)
    rel = coords_flat[:, :, None] - coords_flat[:, None, :]           # (2, N, N)
    rel = rel.transpose(1, 2, 0).copy()                               # (N, N, 2)
    rel[:, :, 0] += Wh - 1
    rel[:, :, 1] += Ww - 1
    rel[:, :, 0] *= 2 * Ww - 1
    return rel.sum(-1)                                                # (N, N)


def window_attention(x, params, window_size, num_heads, *,
                     block_windows=256, num_tensorcores=None):
    """x: (B_, N, C) float32.  Returns (B_, N, C) float32 (mask=None path)."""
    B_, N, C = x.shape
    assert C % num_heads == 0
    head_dim = C // num_heads
    scale = head_dim ** (-0.5)

    if num_tensorcores is None:
        num_tensorcores = _num_tensorcores()

    wqkv = jnp.asarray(params['wqkv'], jnp.float32)      # (C, 3C)
    bqkv = jnp.asarray(params['bqkv'], jnp.float32)      # (1, 3C)
    wproj = jnp.asarray(params['wproj'], jnp.float32)    # (C, C)
    bproj = jnp.asarray(params['bproj'], jnp.float32)    # (1, C)
    table = jnp.asarray(params['rel_pos_bias_table'], jnp.float32)

    # One-time parameter prep: split fused qkv (columns inside each third are
    # already head-major, matching PyTorch's reshape (N, 3, H, hd)), fold the
    # softmax scale into the q projection, cast MXU operands to bf16.
    wq = (wqkv[:, :C] * scale).astype(jnp.bfloat16)
    wk = wqkv[:, C:2 * C].astype(jnp.bfloat16)
    wv = wqkv[:, 2 * C:].astype(jnp.bfloat16)
    bq = bqkv[:, :C] * scale                             # f32 (added post-MXU)
    bk = bqkv[:, C:2 * C]
    bv = bqkv[:, 2 * C:]
    wp = wproj.astype(jnp.bfloat16)

    # Relative-position bias gather -> (H, N, N) f32, resident in VMEM.
    idx = _rel_pos_index(window_size)
    bias = table[jnp.asarray(idx.reshape(-1))].reshape(N, N, num_heads)
    bias = bias.transpose(2, 0, 1)

    # TODO(synk): the optional attention `mask` (shifted-window case) and the
    # attn/proj dropout (identity at p=0.0) are not implemented.

    # ---- Tiling -------------------------------------------------------------
    # Rough per-window VMEM footprint (bytes), lane-padded to 128, including
    # the double-buffered x / out blocks; used to cap windows-per-step.
    cpad = _round_up(C, 128)
    npad = _round_up(N, 128)
    per_window = N * (2 * cpad * 2        # x block (bf16), double-buffered
                      + 2 * cpad * 4      # out block (f32), double-buffered
                      + 3 * cpad * 6      # q/k/v (f32 accum + bf16 copies)
                      + 2 * npad * 4      # scores + probs (f32, lane-padded)
                      + cpad * 6          # vp_h (f32 + bf16)
                      + 2 * cpad * 4)     # y accumulator + y_h
    weight_bytes = 2 * (4 * C * C * 2 + num_heads * N * N * 4 + 4 * C * 4)

    vmem_limit = (48 if num_tensorcores >= 2 else 96) * 1024 * 1024
    budget = int(0.45 * vmem_limit) - weight_bytes
    tb_cap = max(1, budget // per_window)

    tb = max(1, min(block_windows, B_, tb_cap))
    # Only force >= 2 grid steps on 2-TensorCore parts (v7x megacore split).
    if num_tensorcores >= 2 and B_ >= 2 and pl.cdiv(B_, tb) < 2:
        tb = pl.cdiv(B_, 2)
    # Sublane rule: with more than one grid step the block's second-to-last
    # dim (tb*N) must be a multiple of 8 (e.g. Swin N=49 needs tb % 8 == 0).
    if pl.cdiv(B_, tb) > 1:
        g = 8 // math.gcd(N, 8)
        tb = _round_up(tb, g)
    grid = pl.cdiv(B_, tb)
    Bp = grid * tb

    # Flatten to 2-D so each block is one large contiguous HBM chunk; bf16
    # halves the streamed input bytes.
    # TODO(synk): for C < 128 (this test config) the streamed blocks are
    # lane-sparse; deployment shapes should keep C a multiple of 128.
    x2d = x.astype(jnp.bfloat16).reshape(B_ * N, C)
    if Bp != B_:
        x2d = jnp.pad(x2d, ((0, (Bp - B_) * N), (0, 0)))

    kernel = functools.partial(_window_attn_kernel, num_heads=num_heads,
                               head_dim=head_dim, seq_len=N)

    flops = Bp * (2 * N * C * 3 * C                     # q/k/v projections
                  + 2 * num_heads * N * N * head_dim    # q @ k^T
                  + 2 * N * C * C                       # v @ wproj (all heads)
                  + 2 * num_heads * N * N * C)          # p @ (v wproj)
    transcendentals = Bp * num_heads * N * N
    bytes_accessed = (Bp * N * C * (2 + 4) + 4 * C * C * 2
                      + 4 * C * 4 + num_heads * N * N * 4)
    cost = pl.CostEstimate(flops=int(flops),
                           transcendentals=int(transcendentals),
                           bytes_accessed=int(bytes_accessed))

    def build(single_buffer_consts):
        def const_spec(shape):
            idx_map = (lambda b: (0, 0)) if len(shape) == 2 else (lambda b: (0, 0, 0))
            if single_buffer_consts:
                # Constant index_map -> fetched once; single-buffer so the
                # second pipeline buffer does not waste VMEM.
                return pl.BlockSpec(shape, idx_map, pipeline_mode=pl.Buffered(1))
            return pl.BlockSpec(shape, idx_map)

        return pl.pallas_call(
            kernel,
            out_shape=jax.ShapeDtypeStruct((Bp * N, C), jnp.float32),
            grid_spec=pltpu.PrefetchScalarGridSpec(
                num_scalar_prefetch=0,
                grid=(grid,),
                in_specs=[
                    pl.BlockSpec((tb * N, C), lambda b: (b, 0)),      # x
                    const_spec((C, C)),                               # wq
                    const_spec((C, C)),                               # wk
                    const_spec((C, C)),                               # wv
                    const_spec((1, C)),                               # bq
                    const_spec((1, C)),                               # bk
                    const_spec((1, C)),                               # bv
                    const_spec((num_heads, N, N)),                    # bias
                    const_spec((C, C)),                               # wproj
                    const_spec((1, C)),                               # bproj
                ],
                out_specs=pl.BlockSpec((tb * N, C), lambda b: (b, 0)),
            ),
            compiler_params=pltpu.CompilerParams(
                dimension_semantics=("parallel",),
                vmem_limit_bytes=vmem_limit),
            cost_estimate=cost,
        )

    args = (x2d, wq, wk, wv, bq, bk, bv, bias, wp, bproj)
    try:
        out2d = jax.block_until_ready(build(True)(*args))
    except Exception:
        # pipeline_mode=pl.Buffered(1) unavailable on this jax version:
        # fall back to default double-buffering of the constant inputs.
        out2d = jax.block_until_ready(build(False)(*args))

    return out2d[:B_ * N].reshape(B_, N, C)


# ----------------------------------------------------------------------------
# Pure-JAX reference (mirrors the PyTorch forward, mask=None, dropout=0)
# ----------------------------------------------------------------------------
def window_attention_ref(x, params, window_size, num_heads):
    B_, N, C = x.shape
    head_dim = C // num_heads
    scale = head_dim ** (-0.5)

    rel_pos_index = _rel_pos_index(window_size)

    qkv = x @ params['wqkv'] + params['bqkv']                 # (B_, N, 3C)
    qkv = qkv.reshape(B_, N, 3, num_heads, head_dim).transpose(2, 0, 3, 1, 4)
    q, k, v = qkv[0], qkv[1], qkv[2]                          # (B_, H, N, hd)
    q = q * scale
    attn = jnp.einsum('bhnd,bhmd->bhnm', q, k)
    bias = params['rel_pos_bias_table'][jnp.asarray(rel_pos_index.reshape(-1))]
    bias = bias.reshape(N, N, num_heads).transpose(2, 0, 1)
    attn = attn + bias[None]
    attn = jax.nn.softmax(attn, axis=-1)
    out = jnp.einsum('bhnm,bhmd->bhnd', attn, v)
    out = out.transpose(0, 2, 1, 3).reshape(B_, N, C)
    return out @ params['wproj'] + params['bproj']


# ----------------------------------------------------------------------------
if __name__ == "__main__":
    dim = 32
    window_size = (4, 4)
    num_heads = 4
    N = window_size[0] * window_size[1]        # 16 tokens per window
    B_ = 2                                     # num_windows * batch

    key = jax.random.PRNGKey(0)
    k_x, k_wqkv, k_bqkv, k_wproj, k_bproj, k_tab = jax.random.split(key, 6)

    x = jax.random.normal(k_x, (B_, N, dim), dtype=jnp.float32)

    params = {
        'wqkv':  0.05 * jax.random.normal(k_wqkv, (dim, 3 * dim), jnp.float32),
        'bqkv':  0.01 * jax.random.normal(k_bqkv, (1, 3 * dim), jnp.float32),
        'wproj': 0.05 * jax.random.normal(k_wproj, (dim, dim), jnp.float32),
        'bproj': 0.01 * jax.random.normal(k_bproj, (1, dim), jnp.float32),
        # trunc_normal_(std=0.02) approximated with a plain normal (synthetic)
        'rel_pos_bias_table': 0.02 * jax.random.normal(
            k_tab,
            ((2 * window_size[0] - 1) * (2 * window_size[1] - 1), num_heads),
            jnp.float32),
    }

    out = window_attention(x, params, window_size, num_heads)
    out = jax.block_until_ready(out)

    ref = window_attention_ref(x, params, window_size, num_heads)
    # Tolerance accounts for bf16 MXU operands and the approximate softmax
    # denominator reciprocal (EUP).
    np.testing.assert_allclose(np.asarray(out), np.asarray(ref),
                               rtol=2e-2, atol=2e-2)
    print("KERNEL_OK")
</pallas_src>

<mosaic_0001>
module attributes {stable_mosaic.version = 11 : i64} {
  func.func @_window_attn_kernel(%arg0: i32, %arg1: memref<32x32xbf16, #tpu.memory_space<vmem>>, %arg2: memref<32x32xbf16, #tpu.memory_space<vmem>>, %arg3: memref<32x32xbf16, #tpu.memory_space<vmem>>, %arg4: memref<32x32xbf16, #tpu.memory_space<vmem>>, %arg5: memref<1x32xf32, #tpu.memory_space<vmem>>, %arg6: memref<1x32xf32, #tpu.memory_space<vmem>>, %arg7: memref<1x32xf32, #tpu.memory_space<vmem>>, %arg8: memref<4x16x16xf32, #tpu.memory_space<vmem>>, %arg9: memref<32x32xbf16, #tpu.memory_space<vmem>>, %arg10: memref<1x32xf32, #tpu.memory_space<vmem>>, %arg11: memref<32x32xf32, #tpu.memory_space<vmem>>) attributes {dimension_semantics = [#tpu.dimension_semantics<parallel>], iteration_bounds = array<i64: 1>, scalar_prefetch = 0 : i64, scratch_operands = 0 : i64, tpu.core_type = #tpu.core_type<tc>, window_params = [{transform_indices = @transform_0, window_bounds = array<i64: 32, 32>}, {pipeline_mode = #tpu.pipeline_mode<synchronous>, transform_indices = @transform_1, window_bounds = array<i64: 32, 32>}, {pipeline_mode = #tpu.pipeline_mode<synchronous>, transform_indices = @transform_2, window_bounds = array<i64: 32, 32>}, {pipeline_mode = #tpu.pipeline_mode<synchronous>, transform_indices = @transform_3, window_bounds = array<i64: 32, 32>}, {pipeline_mode = #tpu.pipeline_mode<synchronous>, transform_indices = @transform_4, window_bounds = array<i64: 1, 32>}, {pipeline_mode = #tpu.pipeline_mode<synchronous>, transform_indices = @transform_5, window_bounds = array<i64: 1, 32>}, {pipeline_mode = #tpu.pipeline_mode<synchronous>, transform_indices = @transform_6, window_bounds = array<i64: 1, 32>}, {pipeline_mode = #tpu.pipeline_mode<synchronous>, transform_indices = @transform_7, window_bounds = array<i64: 4, 16, 16>}, {pipeline_mode = #tpu.pipeline_mode<synchronous>, transform_indices = @transform_8, window_bounds = array<i64: 32, 32>}, {pipeline_mode = #tpu.pipeline_mode<synchronous>, transform_indices = @transform_9, window_bounds = array<i64: 1, 32>}, {transform_indices = @transform_10, window_bounds = array<i64: 32, 32>}]} {
    %c0 = arith.constant 0 : index
    %c0_0 = arith.constant 0 : index
    %0 = vector.load %arg1[%c0, %c0_0] : memref<32x32xbf16, #tpu.memory_space<vmem>>, vector<32x32xbf16>
    %c0_1 = arith.constant 0 : index
    %c0_2 = arith.constant 0 : index
    %1 = vector.load %arg2[%c0_1, %c0_2] : memref<32x32xbf16, #tpu.memory_space<vmem>>, vector<32x32xbf16>
    %cst = arith.constant dense<0.000000e+00> : vector<32x32xf32>
    %2 = tpu.matmul %0, %1, %cst {dimension_numbers = #tpu.dot_dimension_numbers<[1], [0], [0], [1], [0, 0, 1, 1], [], []>} : vector<32x32xbf16>, vector<32x32xbf16>, vector<32x32xf32> -> vector<32x32xf32>
    %c0_3 = arith.constant 0 : index
    %c0_4 = arith.constant 0 : index
    %3 = vector.load %arg5[%c0_3, %c0_4] : memref<1x32xf32, #tpu.memory_space<vmem>>, vector<1x32xf32>
    %4 = vector.broadcast %3 : vector<1x32xf32> to vector<32x32xf32>
    %5 = arith.addf %2, %4 : vector<32x32xf32>
    %c0_5 = arith.constant 0 : index
    %c0_6 = arith.constant 0 : index
    %6 = vector.load %arg3[%c0_5, %c0_6] : memref<32x32xbf16, #tpu.memory_space<vmem>>, vector<32x32xbf16>
    %cst_7 = arith.constant dense<0.000000e+00> : vector<32x32xf32>
    %7 = tpu.matmul %0, %6, %cst_7 {dimension_numbers = #tpu.dot_dimension_numbers<[1], [0], [0], [1], [0, 0, 1, 1], [], []>} : vector<32x32xbf16>, vector<32x32xbf16>, vector<32x32xf32> -> vector<32x32xf32>
    %c0_8 = arith.constant 0 : index
    %c0_9 = arith.constant 0 : index
    %8 = vector.load %arg6[%c0_8, %c0_9] : memref<1x32xf32, #tpu.memory_space<vmem>>, vector<1x32xf32>
    %9 = vector.broadcast %8 : vector<1x32xf32> to vector<32x32xf32>
    %10 = arith.addf %7, %9 : vector<32x32xf32>
    %c0_10 = arith.constant 0 : index
    %c0_11 = arith.constant 0 : index
    %11 = vector.load %arg4[%c0_10, %c0_11] : memref<32x32xbf16, #tpu.memory_space<vmem>>, vector<32x32xbf16>
    %cst_12 = arith.constant dense<0.000000e+00> : vector<32x32xf32>
    %12 = tpu.matmul %0, %11, %cst_12 {dimension_numbers = #tpu.dot_dimension_numbers<[1], [0], [0], [1], [0, 0, 1, 1], [], []>} : vector<32x32xbf16>, vector<32x32xbf16>, vector<32x32xf32> -> vector<32x32xf32>
    %c0_13 = arith.constant 0 : index
    %c0_14 = arith.constant 0 : index
    %13 = vector.load %arg7[%c0_13, %c0_14] : memref<1x32xf32, #tpu.memory_space<vmem>>, vector<1x32xf32>
    %14 = vector.broadcast %13 : vector<1x32xf32> to vector<32x32xf32>
    %15 = arith.addf %12, %14 : vector<32x32xf32>
    %16 = arith.truncf %5 : vector<32x32xf32> to vector<32x32xbf16>
    %17 = arith.truncf %10 : vector<32x32xf32> to vector<32x32xbf16>
    %18 = arith.truncf %15 : vector<32x32xf32> to vector<32x32xbf16>
    %19 = vector.extract_strided_slice %16 {offsets = [0, 0], sizes = [32, 8], strides = [1, 1]} : vector<32x32xbf16> to vector<32x8xbf16>
    %20 = vector.shape_cast %19 : vector<32x8xbf16> to vector<2x16x8xbf16>
    %21 = vector.extract_strided_slice %17 {offsets = [0, 0], sizes = [32, 8], strides = [1, 1]} : vector<32x32xbf16> to vector<32x8xbf16>
    %22 = vector.shape_cast %21 : vector<32x8xbf16> to vector<2x16x8xbf16>
    %23 = vector.extract_strided_slice %18 {offsets = [0, 0], sizes = [32, 8], strides = [1, 1]} : vector<32x32xbf16> to vector<32x8xbf16>
    %c0_15 = arith.constant 0 : index
    %c0_16 = arith.constant 0 : index
    %24 = vector.load %arg9[%c0_15, %c0_16] : memref<32x32xbf16, #tpu.memory_space<vmem>>, vector<8x32xbf16>
    %cst_17 = arith.constant dense<0.000000e+00> : vector<32x32xf32>
    %25 = tpu.matmul %23, %24, %cst_17 {dimension_numbers = #tpu.dot_dimension_numbers<[1], [0], [0], [1], [0, 0, 1, 1], [], []>} : vector<32x8xbf16>, vector<8x32xbf16>, vector<32x32xf32> -> vector<32x32xf32>
    %26 = arith.truncf %25 : vector<32x32xf32> to vector<32x32xbf16>
    %27 = vector.shape_cast %26 : vector<32x32xbf16> to vector<2x16x32xbf16>
    "tpu.trace_start"() <{level = 10 : i32, message = "bnd,bmd->bnm"}> : () -> ()
    %cst_18 = arith.constant dense<0.000000e+00> : vector<2x16x16xf32>
    %28 = tpu.matmul %20, %22, %cst_18 {dimension_numbers = #tpu.dot_dimension_numbers<[2], [2], [1], [1], [0, 0, 0, 1, 1, 1], [0], [0]>} : vector<2x16x8xbf16>, vector<2x16x8xbf16>, vector<2x16x16xf32> -> vector<2x16x16xf32>
    "tpu.trace_stop"() : () -> ()
    %c0_19 = arith.constant 0 : index
    %c0_20 = arith.constant 0 : index
    %c0_21 = arith.constant 0 : index
    %29 = vector.load %arg8[%c0_19, %c0_20, %c0_21] : memref<4x16x16xf32, #tpu.memory_space<vmem>>, vector<1x16x16xf32>
    %30 = vector.shape_cast %29 : vector<1x16x16xf32> to vector<16x16xf32>
    %31 = vector.shape_cast %30 : vector<16x16xf32> to vector<1x16x16xf32>
    %32 = vector.broadcast %31 : vector<1x16x16xf32> to vector<2x16x16xf32>
    %33 = arith.addf %28, %32 : vector<2x16x16xf32>
    %cst_22 = arith.constant dense<0xFF800000> : vector<2x16xf32>
    %34 = vector.multi_reduction <maximumf>, %33, %cst_22 [2] : vector<2x16x16xf32> to vector<2x16xf32>
    %35 = vector.shape_cast %34 : vector<2x16xf32> to vector<2x16x1xf32>
    %36 = vector.broadcast %35 : vector<2x16x1xf32> to vector<2x16x16xf32>
    %37 = arith.subf %33, %36 : vector<2x16x16xf32>
    %38 = math.exp %37 : vector<2x16x16xf32>
    %cst_23 = arith.constant dense<0.000000e+00> : vector<2x16xf32>
    %39 = vector.multi_reduction <add>, %38, %cst_23 [2] : vector<2x16x16xf32> to vector<2x16xf32>
    %40 = vector.shape_cast %39 : vector<2x16xf32> to vector<2x16x1xf32>
    %41 = tpu.reciprocal %40 {approx = true} : vector<2x16x1xf32> -> vector<2x16x1xf32>
    %42 = vector.broadcast %41 : vector<2x16x1xf32> to vector<2x16x16xf32>
    %43 = arith.mulf %38, %42 : vector<2x16x16xf32>
    %44 = arith.truncf %43 : vector<2x16x16xf32> to vector<2x16x16xbf16>
    "tpu.trace_start"() <{level = 10 : i32, message = "bnm,bmc->bnc"}> : () -> ()
    %cst_24 = arith.constant dense<0.000000e+00> : vector<2x16x32xf32>
    %45 = tpu.matmul %44, %27, %cst_24 {dimension_numbers = #tpu.dot_dimension_numbers<[2], [1], [1], [2], [0, 0, 0, 1, 1, 2], [0], [0]>} : vector<2x16x16xbf16>, vector<2x16x32xbf16>, vector<2x16x32xf32> -> vector<2x16x32xf32>
    "tpu.trace_stop"() : () -> ()
    %46 = vector.shape_cast %45 : vector<2x16x32xf32> to vector<32x32xf32>
    %47 = vector.extract_strided_slice %16 {offsets = [0, 8], sizes = [32, 8], strides = [1, 1]} : vector<32x32xbf16> to vector<32x8xbf16>
    %48 = vector.shape_cast %47 : vector<32x8xbf16> to vector<2x16x8xbf16>
    %49 = vector.extract_strided_slice %17 {offsets = [0, 8], sizes = [32, 8], strides = [1, 1]} : vector<32x32xbf16> to vector<32x8xbf16>
    %50 = vector.shape_cast %49 : vector<32x8xbf16> to vector<2x16x8xbf16>
    %51 = vector.extract_strided_slice %18 {offsets = [0, 8], sizes = [32, 8], strides = [1, 1]} : vector<32x32xbf16> to vector<32x8xbf16>
    %c8 = arith.constant 8 : index
    %c0_25 = arith.constant 0 : index
    %52 = vector.load %arg9[%c8, %c0_25] : memref<32x32xbf16, #tpu.memory_space<vmem>>, vector<8x32xbf16>
    %cst_26 = arith.constant dense<0.000000e+00> : vector<32x32xf32>
    %53 = tpu.matmul %51, %52, %cst_26 {dimension_numbers = #tpu.dot_dimension_numbers<[1], [0], [0], [1], [0, 0, 1, 1], [], []>} : vector<32x8xbf16>, vector<8x32xbf16>, vector<32x32xf32> -> vector<32x32xf32>
    %54 = arith.truncf %53 : vector<32x32xf32> to vector<32x32xbf16>
    %55 = vector.shape_cast %54 : vector<32x32xbf16> to vector<2x16x32xbf16>
    "tpu.trace_start"() <{level = 10 : i32, message = "bnd,bmd->bnm"}> : () -> ()
    %cst_27 = arith.constant dense<0.000000e+00> : vector<2x16x16xf32>
    %56 = tpu.matmul %48, %50, %cst_27 {dimension_numbers = #tpu.dot_dimension_numbers<[2], [2], [1], [1], [0, 0, 0, 1, 1, 1], [0], [0]>} : vector<2x16x8xbf16>, vector<2x16x8xbf16>, vector<2x16x16xf32> -> vector<2x16x16xf32>
    "tpu.trace_stop"() : () -> ()
    %c1 = arith.constant 1 : index
    %c0_28 = arith.constant 0 : index
    %c0_29 = arith.constant 0 : index
    %57 = vector.load %arg8[%c1, %c0_28, %c0_29] : memref<4x16x16xf32, #tpu.memory_space<vmem>>, vector<1x16x16xf32>
    %58 = vector.shape_cast %57 : vector<1x16x16xf32> to vector<16x16xf32>
    %59 = vector.shape_cast %58 : vector<16x16xf32> to vector<1x16x16xf32>
    %60 = vector.broadcast %59 : vector<1x16x16xf32> to vector<2x16x16xf32>
    %61 = arith.addf %56, %60 : vector<2x16x16xf32>
    %cst_30 = arith.constant dense<0xFF800000> : vector<2x16xf32>
    %62 = vector.multi_reduction <maximumf>, %61, %cst_30 [2] : vector<2x16x16xf32> to vector<2x16xf32>
    %63 = vector.shape_cast %62 : vector<2x16xf32> to vector<2x16x1xf32>
    %64 = vector.broadcast %63 : vector<2x16x1xf32> to vector<2x16x16xf32>
    %65 = arith.subf %61, %64 : vector<2x16x16xf32>
    %66 = math.exp %65 : vector<2x16x16xf32>
    %cst_31 = arith.constant dense<0.000000e+00> : vector<2x16xf32>
    %67 = vector.multi_reduction <add>, %66, %cst_31 [2] : vector<2x16x16xf32> to vector<2x16xf32>
    %68 = vector.shape_cast %67 : vector<2x16xf32> to vector<2x16x1xf32>
    %69 = tpu.reciprocal %68 {approx = true} : vector<2x16x1xf32> -> vector<2x16x1xf32>
    %70 = vector.broadcast %69 : vector<2x16x1xf32> to vector<2x16x16xf32>
    %71 = arith.mulf %66, %70 : vector<2x16x16xf32>
    %72 = arith.truncf %71 : vector<2x16x16xf32> to vector<2x16x16xbf16>
    "tpu.trace_start"() <{level = 10 : i32, message = "bnm,bmc->bnc"}> : () -> ()
    %cst_32 = arith.constant dense<0.000000e+00> : vector<2x16x32xf32>
    %73 = tpu.matmul %72, %55, %cst_32 {dimension_numbers = #tpu.dot_dimension_numbers<[2], [1], [1], [2], [0, 0, 0, 1, 1, 2], [0], [0]>} : vector<2x16x16xbf16>, vector<2x16x32xbf16>, vector<2x16x32xf32> -> vector<2x16x32xf32>
    "tpu.trace_stop"() : () -> ()
    %74 = vector.shape_cast %73 : vector<2x16x32xf32> to vector<32x32xf32>
    %75 = arith.addf %46, %74 : vector<32x32xf32>
    %76 = vector.extract_strided_slice %16 {offsets = [0, 16], sizes = [32, 8], strides = [1, 1]} : vector<32x32xbf16> to vector<32x8xbf16>
    %77 = vector.shape_cast %76 : vector<32x8xbf16> to vector<2x16x8xbf16>
    %78 = vector.extract_strided_slice %17 {offsets = [0, 16], sizes = [32, 8], strides = [1, 1]} : vector<32x32xbf16> to vector<32x8xbf16>
    %79 = vector.shape_cast %78 : vector<32x8xbf16> to vector<2x16x8xbf16>
    %80 = vector.extract_strided_slice %18 {offsets = [0, 16], sizes = [32, 8], strides = [1, 1]} : vector<32x32xbf16> to vector<32x8xbf16>
    %c16 = arith.constant 16 : index
    %c0_33 = arith.constant 0 : index
    %81 = vector.load %arg9[%c16, %c0_33] : memref<32x32xbf16, #tpu.memory_space<vmem>>, vector<8x32xbf16>
    %cst_34 = arith.constant dense<0.000000e+00> : vector<32x32xf32>
    %82 = tpu.matmul %80, %81, %cst_34 {dimension_numbers = #tpu.dot_dimension_numbers<[1], [0], [0], [1], [0, 0, 1, 1], [], []>} : vector<32x8xbf16>, vector<8x32xbf16>, vector<32x32xf32> -> vector<32x32xf32>
    %83 = arith.truncf %82 : vector<32x32xf32> to vector<32x32xbf16>
    %84 = vector.shape_cast %83 : vector<32x32xbf16> to vector<2x16x32xbf16>
    "tpu.trace_start"() <{level = 10 : i32, message = "bnd,bmd->bnm"}> : () -> ()
    %cst_35 = arith.constant dense<0.000000e+00> : vector<2x16x16xf32>
    %85 = tpu.matmul %77, %79, %cst_35 {dimension_numbers = #tpu.dot_dimension_numbers<[2], [2], [1], [1], [0, 0, 0, 1, 1, 1], [0], [0]>} : vector<2x16x8xbf16>, vector<2x16x8xbf16>, vector<2x16x16xf32> -> vector<2x16x16xf32>
    "tpu.trace_stop"() : () -> ()
    %c2 = arith.constant 2 : index
    %c0_36 = arith.constant 0 : index
    %c0_37 = arith.constant 0 : index
    %86 = vector.load %arg8[%c2, %c0_36, %c0_37] : memref<4x16x16xf32, #tpu.memory_space<vmem>>, vector<1x16x16xf32>
    %87 = vector.shape_cast %86 : vector<1x16x16xf32> to vector<16x16xf32>
    %88 = vector.shape_cast %87 : vector<16x16xf32> to vector<1x16x16xf32>
    %89 = vector.broadcast %88 : vector<1x16x16xf32> to vector<2x16x16xf32>
    %90 = arith.addf %85, %89 : vector<2x16x16xf32>
    %cst_38 = arith.constant dense<0xFF800000> : vector<2x16xf32>
    %91 = vector.multi_reduction <maximumf>, %90, %cst_38 [2] : vector<2x16x16xf32> to vector<2x16xf32>
    %92 = vector.shape_cast %91 : vector<2x16xf32> to vector<2x16x1xf32>
    %93 = vector.broadcast %92 : vector<2x16x1xf32> to vector<2x16x16xf32>
    %94 = arith.subf %90, %93 : vector<2x16x16xf32>
    %95 = math.exp %94 : vector<2x16x16xf32>
    %cst_39 = arith.constant dense<0.000000e+00> : vector<2x16xf32>
    %96 = vector.multi_reduction <add>, %95, %cst_39 [2] : vector<2x16x16xf32> to vector<2x16xf32>
    %97 = vector.shape_cast %96 : vector<2x16xf32> to vector<2x16x1xf32>
    %98 = tpu.reciprocal %97 {approx = true} : vector<2x16x1xf32> -> vector<2x16x1xf32>
    %99 = vector.broadcast %98 : vector<2x16x1xf32> to vector<2x16x16xf32>
    %100 = arith.mulf %95, %99 : vector<2x16x16xf32>
    %101 = arith.truncf %100 : vector<2x16x16xf32> to vector<2x16x16xbf16>
    "tpu.trace_start"() <{level = 10 : i32, message = "bnm,bmc->bnc"}> : () -> ()
    %cst_40 = arith.constant dense<0.000000e+00> : vector<2x16x32xf32>
    %102 = tpu.matmul %101, %84, %cst_40 {dimension_numbers = #tpu.dot_dimension_numbers<[2], [1], [1], [2], [0, 0, 0, 1, 1, 2], [0], [0]>} : vector<2x16x16xbf16>, vector<2x16x32xbf16>, vector<2x16x32xf32> -> vector<2x16x32xf32>
    "tpu.trace_stop"() : () -> ()
    %103 = vector.shape_cast %102 : vector<2x16x32xf32> to vector<32x32xf32>
    %104 = arith.addf %75, %103 : vector<32x32xf32>
    %105 = vector.extract_strided_slice %16 {offsets = [0, 24], sizes = [32, 8], strides = [1, 1]} : vector<32x32xbf16> to vector<32x8xbf16>
    %106 = vector.shape_cast %105 : vector<32x8xbf16> to vector<2x16x8xbf16>
    %107 = vector.extract_strided_slice %17 {offsets = [0, 24], sizes = [32, 8], strides = [1, 1]} : vector<32x32xbf16> to vector<32x8xbf16>
    %108 = vector.shape_cast %107 : vector<32x8xbf16> to vector<2x16x8xbf16>
    %109 = vector.extract_strided_slice %18 {offsets = [0, 24], sizes = [32, 8], strides = [1, 1]} : vector<32x32xbf16> to vector<32x8xbf16>
    %c24 = arith.constant 24 : index
    %c0_41 = arith.constant 0 : index
    %110 = vector.load %arg9[%c24, %c0_41] : memref<32x32xbf16, #tpu.memory_space<vmem>>, vector<8x32xbf16>
    %cst_42 = arith.constant dense<0.000000e+00> : vector<32x32xf32>
    %111 = tpu.matmul %109, %110, %cst_42 {dimension_numbers = #tpu.dot_dimension_numbers<[1], [0], [0], [1], [0, 0, 1, 1], [], []>} : vector<32x8xbf16>, vector<8x32xbf16>, vector<32x32xf32> -> vector<32x32xf32>
    %112 = arith.truncf %111 : vector<32x32xf32> to vector<32x32xbf16>
    %113 = vector.shape_cast %112 : vector<32x32xbf16> to vector<2x16x32xbf16>
    "tpu.trace_start"() <{level = 10 : i32, message = "bnd,bmd->bnm"}> : () -> ()
    %cst_43 = arith.constant dense<0.000000e+00> : vector<2x16x16xf32>
    %114 = tpu.matmul %106, %108, %cst_43 {dimension_numbers = #tpu.dot_dimension_numbers<[2], [2], [1], [1], [0, 0, 0, 1, 1, 1], [0], [0]>} : vector<2x16x8xbf16>, vector<2x16x8xbf16>, vector<2x16x16xf32> -> vector<2x16x16xf32>
    "tpu.trace_stop"() : () -> ()
    %c3 = arith.constant 3 : index
    %c0_44 = arith.constant 0 : index
    %c0_45 = arith.constant 0 : index
    %115 = vector.load %arg8[%c3, %c0_44, %c0_45] : memref<4x16x16xf32, #tpu.memory_space<vmem>>, vector<1x16x16xf32>
    %116 = vector.shape_cast %115 : vector<1x16x16xf32> to vector<16x16xf32>
    %117 = vector.shape_cast %116 : vector<16x16xf32> to vector<1x16x16xf32>
    %118 = vector.broadcast %117 : vector<1x16x16xf32> to vector<2x16x16xf32>
    %119 = arith.addf %114, %118 : vector<2x16x16xf32>
    %cst_46 = arith.constant dense<0xFF800000> : vector<2x16xf32>
    %120 = vector.multi_reduction <maximumf>, %119, %cst_46 [2] : vector<2x16x16xf32> to vector<2x16xf32>
    %121 = vector.shape_cast %120 : vector<2x16xf32> to vector<2x16x1xf32>
    %122 = vector.broadcast %121 : vector<2x16x1xf32> to vector<2x16x16xf32>
    %123 = arith.subf %119, %122 : vector<2x16x16xf32>
    %124 = math.exp %123 : vector<2x16x16xf32>
    %cst_47 = arith.constant dense<0.000000e+00> : vector<2x16xf32>
    %125 = vector.multi_reduction <add>, %124, %cst_47 [2] : vector<2x16x16xf32> to vector<2x16xf32>
    %126 = vector.shape_cast %125 : vector<2x16xf32> to vector<2x16x1xf32>
    %127 = tpu.reciprocal %126 {approx = true} : vector<2x16x1xf32> -> vector<2x16x1xf32>
    %128 = vector.broadcast %127 : vector<2x16x1xf32> to vector<2x16x16xf32>
    %129 = arith.mulf %124, %128 : vector<2x16x16xf32>
    %130 = arith.truncf %129 : vector<2x16x16xf32> to vector<2x16x16xbf16>
    "tpu.trace_start"() <{level = 10 : i32, message = "bnm,bmc->bnc"}> : () -> ()
    %cst_48 = arith.constant dense<0.000000e+00> : vector<2x16x32xf32>
    %131 = tpu.matmul %130, %113, %cst_48 {dimension_numbers = #tpu.dot_dimension_numbers<[2], [1], [1], [2], [0, 0, 0, 1, 1, 2], [0], [0]>} : vector<2x16x16xbf16>, vector<2x16x32xbf16>, vector<2x16x32xf32> -> vector<2x16x32xf32>
    "tpu.trace_stop"() : () -> ()
    %132 = vector.shape_cast %131 : vector<2x16x32xf32> to vector<32x32xf32>
    %133 = arith.addf %104, %132 : vector<32x32xf32>
    %c0_49 = arith.constant 0 : index
    %c0_50 = arith.constant 0 : index
    %134 = vector.load %arg10[%c0_49, %c0_50] : memref<1x32xf32, #tpu.memory_space<vmem>>, vector<1x32xf32>
    %135 = vector.broadcast %134 : vector<1x32xf32> to vector<32x32xf32>
    %136 = arith.addf %133, %135 : vector<32x32xf32>
    %c0_51 = arith.constant 0 : index
    %c0_52 = arith.constant 0 : index
    %137 = vector.load %arg11[%c0_51, %c0_52] : memref<32x32xf32, #tpu.memory_space<vmem>>, vector<32x32xf32>
    tpu.vector_store %arg11[%c0_51, %c0_52], %136 {strides = array<i32>} : memref<32x32xf32, #tpu.memory_space<vmem>>, vector<32x32xf32>,
    return
  }
  func.func @transform_0(%arg0: i32) -> (i32, i32) {
    %c0_i32 = arith.constant 0 : i32
    %c0_i32_0 = arith.constant 0 : i32
    return %arg0, %c0_i32 : i32, i32
  }
  func.func @transform_1(%arg0: i32) -> (i32, i32) {
    %c0_i32 = arith.constant 0 : i32
    %c0_i32_0 = arith.constant 0 : i32
    %c0_i32_1 = arith.constant 0 : i32
    return %c0_i32, %c0_i32_0 : i32, i32
  }
  func.func @transform_2(%arg0: i32) -> (i32, i32) {
    %c0_i32 = arith.constant 0 : i32
    %c0_i32_0 = arith.constant 0 : i32
    %c0_i32_1 = arith.constant 0 : i32
    return %c0_i32, %c0_i32_0 : i32, i32
  }
  func.func @transform_3(%arg0: i32) -> (i32, i32) {
    %c0_i32 = arith.constant 0 : i32
    %c0_i32_0 = arith.constant 0 : i32
    %c0_i32_1 = arith.constant 0 : i32
    return %c0_i32, %c0_i32_0 : i32, i32
  }
  func.func @transform_4(%arg0: i32) -> (i32, i32) {
    %c0_i32 = arith.constant 0 : i32
    %c0_i32_0 = arith.constant 0 : i32
    %c0_i32_1 = arith.constant 0 : i32
    return %c0_i32, %c0_i32_0 : i32, i32
  }
  func.func @transform_5(%arg0: i32) -> (i32, i32) {
    %c0_i32 = arith.constant 0 : i32
    %c0_i32_0 = arith.constant 0 : i32
    %c0_i32_1 = arith.constant 0 : i32
    return %c0_i32, %c0_i32_0 : i32, i32
  }
  func.func @transform_6(%arg0: i32) -> (i32, i32) {
    %c0_i32 = arith.constant 0 : i32
    %c0_i32_0 = arith.constant 0 : i32
    %c0_i32_1 = arith.constant 0 : i32
    return %c0_i32, %c0_i32_0 : i32, i32
  }
  func.func @transform_7(%arg0: i32) -> (i32, i32, i32) {
    %c0_i32 = arith.constant 0 : i32
    %c0_i32_0 = arith.constant 0 : i32
    %c0_i32_1 = arith.constant 0 : i32
    %c0_i32_2 = arith.constant 0 : i32
    return %c0_i32, %c0_i32_0, %c0_i32_1 : i32, i32, i32
  }
  func.func @transform_8(%arg0: i32) -> (i32, i32) {
    %c0_i32 = arith.constant 0 : i32
    %c0_i32_0 = arith.constant 0 : i32
    %c0_i32_1 = arith.constant 0 : i32
    return %c0_i32, %c0_i32_0 : i32, i32
  }
  func.func @transform_9(%arg0: i32) -> (i32, i32) {
    %c0_i32 = arith.constant 0 : i32
    %c0_i32_0 = arith.constant 0 : i32
    %c0_i32_1 = arith.constant 0 : i32
    return %c0_i32, %c0_i32_0 : i32, i32
  }
  func.func @transform_10(%arg0: i32) -> (i32, i32) {
    %c0_i32 = arith.constant 0 : i32
    %c0_i32_0 = arith.constant 0 : i32
    return %arg0, %c0_i32 : i32, i32
  }
}

module attributes {stable_mosaic.version = 11 : i64} {
  func.func @_window_attn_kernel(%arg0: i32, %arg1: memref<32x32xbf16, #tpu.memory_space<vmem>>, %arg2: memref<32x32xbf16, #tpu.memory_space<vmem>>, %arg3: memref<32x32xbf16, #tpu.memory_space<vmem>>, %arg4: memref<32x32xbf16, #tpu.memory_space<vmem>>, %arg5: memref<1x32xf32, #tpu.memory_space<vmem>>, %arg6: memref<1x32xf32, #tpu.memory_space<vmem>>, %arg7: memref<1x32xf32, #tpu.memory_space<vmem>>, %arg8: memref<4x16x16xf32, #tpu.memory_space<vmem>>, %arg9: memref<32x32xbf16, #tpu.memory_space<vmem>>, %arg10: memref<1x32xf32, #tpu.memory_space<vmem>>, %arg11: memref<32x32xf32, #tpu.memory_space<vmem>>) attributes {dimension_semantics = [#tpu.dimension_semantics<parallel>], iteration_bounds = array<i64: 1>, scalar_prefetch = 0 : i64, scratch_operands = 0 : i64, tpu.core_type = #tpu.core_type<tc>, window_params = [{transform_indices = @transform_0, window_bounds = array<i64: 32, 32>}, {pipeline_mode = #tpu.pipeline_mode<synchronous>, transform_indices = @transform_1, window_bounds = array<i64: 32, 32>}, {pipeline_mode = #tpu.pipeline_mode<synchronous>, transform_indices = @transform_2, window_bounds = array<i64: 32, 32>}, {pipeline_mode = #tpu.pipeline_mode<synchronous>, transform_indices = @transform_3, window_bounds = array<i64: 32, 32>}, {pipeline_mode = #tpu.pipeline_mode<synchronous>, transform_indices = @transform_4, window_bounds = array<i64: 1, 32>}, {pipeline_mode = #tpu.pipeline_mode<synchronous>, transform_indices = @transform_5, window_bounds = array<i64: 1, 32>}, {pipeline_mode = #tpu.pipeline_mode<synchronous>, transform_indices = @transform_6, window_bounds = array<i64: 1, 32>}, {pipeline_mode = #tpu.pipeline_mode<synchronous>, transform_indices = @transform_7, window_bounds = array<i64: 4, 16, 16>}, {pipeline_mode = #tpu.pipeline_mode<synchronous>, transform_indices = @transform_8, window_bounds = array<i64: 32, 32>}, {pipeline_mode = #tpu.pipeline_mode<synchronous>, transform_indices = @transform_9, window_bounds = array<i64: 1, 32>}, {transform_indices = @transform_10, window_bounds = array<i64: 32, 32>}]} {
    %c0 = arith.constant 0 : index
    %c0_0 = arith.constant 0 : index
    %0 = vector.load %arg1[%c0, %c0_0] : memref<32x32xbf16, #tpu.memory_space<vmem>>, vector<32x32xbf16>
    %c0_1 = arith.constant 0 : index
    %c0_2 = arith.constant 0 : index
    %1 = vector.load %arg2[%c0_1, %c0_2] : memref<32x32xbf16, #tpu.memory_space<vmem>>, vector<32x32xbf16>
    %cst = arith.constant dense<0.000000e+00> : vector<32x32xf32>
    %2 = tpu.matmul %0, %1, %cst {dimension_numbers = #tpu.dot_dimension_numbers<[1], [0], [0], [1], [0, 0, 1, 1], [], []>} : vector<32x32xbf16>, vector<32x32xbf16>, vector<32x32xf32> -> vector<32x32xf32>
    %c0_3 = arith.constant 0 : index
    %c0_4 = arith.constant 0 : index
    %3 = vector.load %arg5[%c0_3, %c0_4] : memref<1x32xf32, #tpu.memory_space<vmem>>, vector<1x32xf32>
    %4 = vector.broadcast %3 : vector<1x32xf32> to vector<32x32xf32>
    %5 = arith.addf %2, %4 : vector<32x32xf32>
    %c0_5 = arith.constant 0 : index
    %c0_6 = arith.constant 0 : index
    %6 = vector.load %arg3[%c0_5, %c0_6] : memref<32x32xbf16, #tpu.memory_space<vmem>>, vector<32x32xbf16>
    %cst_7 = arith.constant dense<0.000000e+00> : vector<32x32xf32>
    %7 = tpu.matmul %0, %6, %cst_7 {dimension_numbers = #tpu.dot_dimension_numbers<[1], [0], [0], [1], [0, 0, 1, 1], [], []>} : vector<32x32xbf16>, vector<32x32xbf16>, vector<32x32xf32> -> vector<32x32xf32>
    %c0_8 = arith.constant 0 : index
    %c0_9 = arith.constant 0 : index
    %8 = vector.load %arg6[%c0_8, %c0_9] : memref<1x32xf32, #tpu.memory_space<vmem>>, vector<1x32xf32>
    %9 = vector.broadcast %8 : vector<1x32xf32> to vector<32x32xf32>
    %10 = arith.addf %7, %9 : vector<32x32xf32>
    %c0_10 = arith.constant 0 : index
    %c0_11 = arith.constant 0 : index
    %11 = vector.load %arg4[%c0_10, %c0_11] : memref<32x32xbf16, #tpu.memory_space<vmem>>, vector<32x32xbf16>
    %cst_12 = arith.constant dense<0.000000e+00> : vector<32x32xf32>
    %12 = tpu.matmul %0, %11, %cst_12 {dimension_numbers = #tpu.dot_dimension_numbers<[1], [0], [0], [1], [0, 0, 1, 1], [], []>} : vector<32x32xbf16>, vector<32x32xbf16>, vector<32x32xf32> -> vector<32x32xf32>
    %c0_13 = arith.constant 0 : index
    %c0_14 = arith.constant 0 : index
    %13 = vector.load %arg7[%c0_13, %c0_14] : memref<1x32xf32, #tpu.memory_space<vmem>>, vector<1x32xf32>
    %14 = vector.broadcast %13 : vector<1x32xf32> to vector<32x32xf32>
    %15 = arith.addf %12, %14 : vector<32x32xf32>
    %16 = arith.truncf %5 : vector<32x32xf32> to vector<32x32xbf16>
    %17 = arith.truncf %10 : vector<32x32xf32> to vector<32x32xbf16>
    %18 = arith.truncf %15 : vector<32x32xf32> to vector<32x32xbf16>
    %19 = vector.extract_strided_slice %16 {offsets = [0, 0], sizes = [32, 8], strides = [1, 1]} : vector<32x32xbf16> to vector<32x8xbf16>
    %20 = vector.shape_cast %19 : vector<32x8xbf16> to vector<2x16x8xbf16>
    %21 = vector.extract_strided_slice %17 {offsets = [0, 0], sizes = [32, 8], strides = [1, 1]} : vector<32x32xbf16> to vector<32x8xbf16>
    %22 = vector.shape_cast %21 : vector<32x8xbf16> to vector<2x16x8xbf16>
    %23 = vector.extract_strided_slice %18 {offsets = [0, 0], sizes = [32, 8], strides = [1, 1]} : vector<32x32xbf16> to vector<32x8xbf16>
    %c0_15 = arith.constant 0 : index
    %c0_16 = arith.constant 0 : index
    %24 = vector.load %arg9[%c0_15, %c0_16] : memref<32x32xbf16, #tpu.memory_space<vmem>>, vector<8x32xbf16>
    %cst_17 = arith.constant dense<0.000000e+00> : vector<32x32xf32>
    %25 = tpu.matmul %23, %24, %cst_17 {dimension_numbers = #tpu.dot_dimension_numbers<[1], [0], [0], [1], [0, 0, 1, 1], [], []>} : vector<32x8xbf16>, vector<8x32xbf16>, vector<32x32xf32> -> vector<32x32xf32>
    %26 = arith.truncf %25 : vector<32x32xf32> to vector<32x32xbf16>
    %27 = vector.shape_cast %26 : vector<32x32xbf16> to vector<2x16x32xbf16>
    "tpu.trace_start"() <{level = 10 : i32, message = "bnd,bmd->bnm"}> : () -> ()
    %cst_18 = arith.constant dense<0.000000e+00> : vector<2x16x16xf32>
    %28 = tpu.matmul %20, %22, %cst_18 {dimension_numbers = #tpu.dot_dimension_numbers<[2], [2], [1], [1], [0, 0, 0, 1, 1, 1], [0], [0]>} : vector<2x16x8xbf16>, vector<2x16x8xbf16>, vector<2x16x16xf32> -> vector<2x16x16xf32>
    "tpu.trace_stop"() : () -> ()
    %c0_19 = arith.constant 0 : index
    %c0_20 = arith.constant 0 : index
    %c0_21 = arith.constant 0 : index
    %29 = vector.load %arg8[%c0_19, %c0_20, %c0_21] : memref<4x16x16xf32, #tpu.memory_space<vmem>>, vector<1x16x16xf32>
    %30 = vector.shape_cast %29 : vector<1x16x16xf32> to vector<16x16xf32>
    %31 = vector.shape_cast %30 : vector<16x16xf32> to vector<1x16x16xf32>
    %32 = vector.broadcast %31 : vector<1x16x16xf32> to vector<2x16x16xf32>
    %33 = arith.addf %28, %32 : vector<2x16x16xf32>
    %cst_22 = arith.constant dense<0xFF800000> : vector<2x16xf32>
    %34 = vector.multi_reduction <maximumf>, %33, %cst_22 [2] : vector<2x16x16xf32> to vector<2x16xf32>
    %35 = vector.shape_cast %34 : vector<2x16xf32> to vector<2x16x1xf32>
    %36 = vector.broadcast %35 : vector<2x16x1xf32> to vector<2x16x16xf32>
    %37 = arith.subf %33, %36 : vector<2x16x16xf32>
    %38 = math.exp %37 : vector<2x16x16xf32>
    %cst_23 = arith.constant dense<0.000000e+00> : vector<2x16xf32>
    %39 = vector.multi_reduction <add>, %38, %cst_23 [2] : vector<2x16x16xf32> to vector<2x16xf32>
    %40 = vector.shape_cast %39 : vector<2x16xf32> to vector<2x16x1xf32>
    %41 = tpu.reciprocal %40 {approx = true} : vector<2x16x1xf32> -> vector<2x16x1xf32>
    %42 = vector.broadcast %41 : vector<2x16x1xf32> to vector<2x16x16xf32>
    %43 = arith.mulf %38, %42 : vector<2x16x16xf32>
    %44 = arith.truncf %43 : vector<2x16x16xf32> to vector<2x16x16xbf16>
    "tpu.trace_start"() <{level = 10 : i32, message = "bnm,bmc->bnc"}> : () -> ()
    %cst_24 = arith.constant dense<0.000000e+00> : vector<2x16x32xf32>
    %45 = tpu.matmul %44, %27, %cst_24 {dimension_numbers = #tpu.dot_dimension_numbers<[2], [1], [1], [2], [0, 0, 0, 1, 1, 2], [0], [0]>} : vector<2x16x16xbf16>, vector<2x16x32xbf16>, vector<2x16x32xf32> -> vector<2x16x32xf32>
    "tpu.trace_stop"() : () -> ()
    %46 = vector.shape_cast %45 : vector<2x16x32xf32> to vector<32x32xf32>
    %47 = vector.extract_strided_slice %16 {offsets = [0, 8], sizes = [32, 8], strides = [1, 1]} : vector<32x32xbf16> to vector<32x8xbf16>
    %48 = vector.shape_cast %47 : vector<32x8xbf16> to vector<2x16x8xbf16>
    %49 = vector.extract_strided_slice %17 {offsets = [0, 8], sizes = [32, 8], strides = [1, 1]} : vector<32x32xbf16> to vector<32x8xbf16>
    %50 = vector.shape_cast %49 : vector<32x8xbf16> to vector<2x16x8xbf16>
    %51 = vector.extract_strided_slice %18 {offsets = [0, 8], sizes = [32, 8], strides = [1, 1]} : vector<32x32xbf16> to vector<32x8xbf16>
    %c8 = arith.constant 8 : index
    %c0_25 = arith.constant 0 : index
    %52 = vector.load %arg9[%c8, %c0_25] : memref<32x32xbf16, #tpu.memory_space<vmem>>, vector<8x32xbf16>
    %cst_26 = arith.constant dense<0.000000e+00> : vector<32x32xf32>
    %53 = tpu.matmul %51, %52, %cst_26 {dimension_numbers = #tpu.dot_dimension_numbers<[1], [0], [0], [1], [0, 0, 1, 1], [], []>} : vector<32x8xbf16>, vector<8x32xbf16>, vector<32x32xf32> -> vector<32x32xf32>
    %54 = arith.truncf %53 : vector<32x32xf32> to vector<32x32xbf16>
    %55 = vector.shape_cast %54 : vector<32x32xbf16> to vector<2x16x32xbf16>
    "tpu.trace_start"() <{level = 10 : i32, message = "bnd,bmd->bnm"}> : () -> ()
    %cst_27 = arith.constant dense<0.000000e+00> : vector<2x16x16xf32>
    %56 = tpu.matmul %48, %50, %cst_27 {dimension_numbers = #tpu.dot_dimension_numbers<[2], [2], [1], [1], [0, 0, 0, 1, 1, 1], [0], [0]>} : vector<2x16x8xbf16>, vector<2x16x8xbf16>, vector<2x16x16xf32> -> vector<2x16x16xf32>
    "tpu.trace_stop"() : () -> ()
    %c1 = arith.constant 1 : index
    %c0_28 = arith.constant 0 : index
    %c0_29 = arith.constant 0 : index
    %57 = vector.load %arg8[%c1, %c0_28, %c0_29] : memref<4x16x16xf32, #tpu.memory_space<vmem>>, vector<1x16x16xf32>
    %58 = vector.shape_cast %57 : vector<1x16x16xf32> to vector<16x16xf32>
    %59 = vector.shape_cast %58 : vector<16x16xf32> to vector<1x16x16xf32>
    %60 = vector.broadcast %59 : vector<1x16x16xf32> to vector<2x16x16xf32>
    %61 = arith.addf %56, %60 : vector<2x16x16xf32>
    %cst_30 = arith.constant dense<0xFF800000> : vector<2x16xf32>
    %62 = vector.multi_reduction <maximumf>, %61, %cst_30 [2] : vector<2x16x16xf32> to vector<2x16xf32>
    %63 = vector.shape_cast %62 : vector<2x16xf32> to vector<2x16x1xf32>
    %64 = vector.broadcast %63 : vector<2x16x1xf32> to vector<2x16x16xf32>
    %65 = arith.subf %61, %64 : vector<2x16x16xf32>
    %66 = math.exp %65 : vector<2x16x16xf32>
    %cst_31 = arith.constant dense<0.000000e+00> : vector<2x16xf32>
    %67 = vector.multi_reduction <add>, %66, %cst_31 [2] : vector<2x16x16xf32> to vector<2x16xf32>
    %68 = vector.shape_cast %67 : vector<2x16xf32> to vector<2x16x1xf32>
    %69 = tpu.reciprocal %68 {approx = true} : vector<2x16x1xf32> -> vector<2x16x1xf32>
    %70 = vector.broadcast %69 : vector<2x16x1xf32> to vector<2x16x16xf32>
    %71 = arith.mulf %66, %70 : vector<2x16x16xf32>
    %72 = arith.truncf %71 : vector<2x16x16xf32> to vector<2x16x16xbf16>
    "tpu.trace_start"() <{level = 10 : i32, message = "bnm,bmc->bnc"}> : () -> ()
    %cst_32 = arith.constant dense<0.000000e+00> : vector<2x16x32xf32>
    %73 = tpu.matmul %72, %55, %cst_32 {dimension_numbers = #tpu.dot_dimension_numbers<[2], [1], [1], [2], [0, 0, 0, 1, 1, 2], [0], [0]>} : vector<2x16x16xbf16>, vector<2x16x32xbf16>, vector<2x16x32xf32> -> vector<2x16x32xf32>
    "tpu.trace_stop"() : () -> ()
    %74 = vector.shape_cast %73 : vector<2x16x32xf32> to vector<32x32xf32>
    %75 = arith.addf %46, %74 : vector<32x32xf32>
    %76 = vector.extract_strided_slice %16 {offsets = [0, 16], sizes = [32, 8], strides = [1, 1]} : vector<32x32xbf16> to vector<32x8xbf16>
    %77 = vector.shape_cast %76 : vector<32x8xbf16> to vector<2x16x8xbf16>
    %78 = vector.extract_strided_slice %17 {offsets = [0, 16], sizes = [32, 8], strides = [1, 1]} : vector<32x32xbf16> to vector<32x8xbf16>
    %79 = vector.shape_cast %78 : vector<32x8xbf16> to vector<2x16x8xbf16>
    %80 = vector.extract_strided_slice %18 {offsets = [0, 16], sizes = [32, 8], strides = [1, 1]} : vector<32x32xbf16> to vector<32x8xbf16>
    %c16 = arith.constant 16 : index
    %c0_33 = arith.constant 0 : index
    %81 = vector.load %arg9[%c16, %c0_33] : memref<32x32xbf16, #tpu.memory_space<vmem>>, vector<8x32xbf16>
    %cst_34 = arith.constant dense<0.000000e+00> : vector<32x32xf32>
    %82 = tpu.matmul %80, %81, %cst_34 {dimension_numbers = #tpu.dot_dimension_numbers<[1], [0], [0], [1], [0, 0, 1, 1], [], []>} : vector<32x8xbf16>, vector<8x32xbf16>, vector<32x32xf32> -> vector<32x32xf32>
    %83 = arith.truncf %82 : vector<32x32xf32> to vector<32x32xbf16>
    %84 = vector.shape_cast %83 : vector<32x32xbf16> to vector<2x16x32xbf16>
    "tpu.trace_start"() <{level = 10 : i32, message = "bnd,bmd->bnm"}> : () -> ()
    %cst_35 = arith.constant dense<0.000000e+00> : vector<2x16x16xf32>
    %85 = tpu.matmul %77, %79, %cst_35 {dimension_numbers = #tpu.dot_dimension_numbers<[2], [2], [1], [1], [0, 0, 0, 1, 1, 1], [0], [0]>} : vector<2x16x8xbf16>, vector<2x16x8xbf16>, vector<2x16x16xf32> -> vector<2x16x16xf32>
    "tpu.trace_stop"() : () -> ()
    %c2 = arith.constant 2 : index
    %c0_36 = arith.constant 0 : index
    %c0_37 = arith.constant 0 : index
    %86 = vector.load %arg8[%c2, %c0_36, %c0_37] : memref<4x16x16xf32, #tpu.memory_space<vmem>>, vector<1x16x16xf32>
    %87 = vector.shape_cast %86 : vector<1x16x16xf32> to vector<16x16xf32>
    %88 = vector.shape_cast %87 : vector<16x16xf32> to vector<1x16x16xf32>
    %89 = vector.broadcast %88 : vector<1x16x16xf32> to vector<2x16x16xf32>
    %90 = arith.addf %85, %89 : vector<2x16x16xf32>
    %cst_38 = arith.constant dense<0xFF800000> : vector<2x16xf32>
    %91 = vector.multi_reduction <maximumf>, %90, %cst_38 [2] : vector<2x16x16xf32> to vector<2x16xf32>
    %92 = vector.shape_cast %91 : vector<2x16xf32> to vector<2x16x1xf32>
    %93 = vector.broadcast %92 : vector<2x16x1xf32> to vector<2x16x16xf32>
    %94 = arith.subf %90, %93 : vector<2x16x16xf32>
    %95 = math.exp %94 : vector<2x16x16xf32>
    %cst_39 = arith.constant dense<0.000000e+00> : vector<2x16xf32>
    %96 = vector.multi_reduction <add>, %95, %cst_39 [2] : vector<2x16x16xf32> to vector<2x16xf32>
    %97 = vector.shape_cast %96 : vector<2x16xf32> to vector<2x16x1xf32>
    %98 = tpu.reciprocal %97 {approx = true} : vector<2x16x1xf32> -> vector<2x16x1xf32>
    %99 = vector.broadcast %98 : vector<2x16x1xf32> to vector<2x16x16xf32>
    %100 = arith.mulf %95, %99 : vector<2x16x16xf32>
    %101 = arith.truncf %100 : vector<2x16x16xf32> to vector<2x16x16xbf16>
    "tpu.trace_start"() <{level = 10 : i32, message = "bnm,bmc->bnc"}> : () -> ()
    %cst_40 = arith.constant dense<0.000000e+00> : vector<2x16x32xf32>
    %102 = tpu.matmul %101, %84, %cst_40 {dimension_numbers = #tpu.dot_dimension_numbers<[2], [1], [1], [2], [0, 0, 0, 1, 1, 2], [0], [0]>} : vector<2x16x16xbf16>, vector<2x16x32xbf16>, vector<2x16x32xf32> -> vector<2x16x32xf32>
    "tpu.trace_stop"() : () -> ()
    %103 = vector.shape_cast %102 : vector<2x16x32xf32> to vector<32x32xf32>
    %104 = arith.addf %75, %103 : vector<32x32xf32>
    %105 = vector.extract_strided_slice %16 {offsets = [0, 24], sizes = [32, 8], strides = [1, 1]} : vector<32x32xbf16> to vector<32x8xbf16>
    %106 = vector.shape_cast %105 : vector<32x8xbf16> to vector<2x16x8xbf16>
    %107 = vector.extract_strided_slice %17 {offsets = [0, 24], sizes = [32, 8], strides = [1, 1]} : vector<32x32xbf16> to vector<32x8xbf16>
    %108 = vector.shape_cast %107 : vector<32x8xbf16> to vector<2x16x8xbf16>
    %109 = vector.extract_strided_slice %18 {offsets = [0, 24], sizes = [32, 8], strides = [1, 1]} : vector<32x32xbf16> to vector<32x8xbf16>
    %c24 = arith.constant 24 : index
    %c0_41 = arith.constant 0 : index
    %110 = vector.load %arg9[%c24, %c0_41] : memref<32x32xbf16, #tpu.memory_space<vmem>>, vector<8x32xbf16>
    %cst_42 = arith.constant dense<0.000000e+00> : vector<32x32xf32>
    %111 = tpu.matmul %109, %110, %cst_42 {dimension_numbers = #tpu.dot_dimension_numbers<[1], [0], [0], [1], [0, 0, 1, 1], [], []>} : vector<32x8xbf16>, vector<8x32xbf16>, vector<32x32xf32> -> vector<32x32xf32>
    %112 = arith.truncf %111 : vector<32x32xf32> to vector<32x32xbf16>
    %113 = vector.shape_cast %112 : vector<32x32xbf16> to vector<2x16x32xbf16>
    "tpu.trace_start"() <{level = 10 : i32, message = "bnd,bmd->bnm"}> : () -> ()
    %cst_43 = arith.constant dense<0.000000e+00> : vector<2x16x16xf32>
    %114 = tpu.matmul %106, %108, %cst_43 {dimension_numbers = #tpu.dot_dimension_numbers<[2], [2], [1], [1], [0, 0, 0, 1, 1, 1], [0], [0]>} : vector<2x16x8xbf16>, vector<2x16x8xbf16>, vector<2x16x16xf32> -> vector<2x16x16xf32>
    "tpu.trace_stop"() : () -> ()
    %c3 = arith.constant 3 : index
    %c0_44 = arith.constant 0 : index
    %c0_45 = arith.constant 0 : index
    %115 = vector.load %arg8[%c3, %c0_44, %c0_45] : memref<4x16x16xf32, #tpu.memory_space<vmem>>, vector<1x16x16xf32>
    %116 = vector.shape_cast %115 : vector<1x16x16xf32> to vector<16x16xf32>
    %117 = vector.shape_cast %116 : vector<16x16xf32> to vector<1x16x16xf32>
    %118 = vector.broadcast %117 : vector<1x16x16xf32> to vector<2x16x16xf32>
    %119 = arith.addf %114, %118 : vector<2x16x16xf32>
    %cst_46 = arith.constant dense<0xFF800000> : vector<2x16xf32>
    %120 = vector.multi_reduction <maximumf>, %119, %cst_46 [2] : vector<2x16x16xf32> to vector<2x16xf32>
    %121 = vector.shape_cast %120 : vector<2x16xf32> to vector<2x16x1xf32>
    %122 = vector.broadcast %121 : vector<2x16x1xf32> to vector<2x16x16xf32>
    %123 = arith.subf %119, %122 : vector<2x16x16xf32>
    %124 = math.exp %123 : vector<2x16x16xf32>
    %cst_47 = arith.constant dense<0.000000e+00> : vector<2x16xf32>
    %125 = vector.multi_reduction <add>, %124, %cst_47 [2] : vector<2x16x16xf32> to vector<2x16xf32>
    %126 = vector.shape_cast %125 : vector<2x16xf32> to vector<2x16x1xf32>
    %127 = tpu.reciprocal %126 {approx = true} : vector<2x16x1xf32> -> vector<2x16x1xf32>
    %128 = vector.broadcast %127 : vector<2x16x1xf32> to vector<2x16x16xf32>
    %129 = arith.mulf %124, %128 : vector<2x16x16xf32>
    %130 = arith.truncf %129 : vector<2x16x16xf32> to vector<2x16x16xbf16>
    "tpu.trace_start"() <{level = 10 : i32, message = "bnm,bmc->bnc"}> : () -> ()
    %cst_48 = arith.constant dense<0.000000e+00> : vector<2x16x32xf32>
    %131 = tpu.matmul %130, %113, %cst_48 {dimension_numbers = #tpu.dot_dimension_numbers<[2], [1], [1], [2], [0, 0, 0, 1, 1, 2], [0], [0]>} : vector<2x16x16xbf16>, vector<2x16x32xbf16>, vector<2x16x32xf32> -> vector<2x16x32xf32>
    "tpu.trace_stop"() : () -> ()
    %132 = vector.shape_cast %131 : vector<2x16x32xf32> to vector<32x32xf32>
    %133 = arith.addf %104, %132 : vector<32x32xf32>
    %c0_49 = arith.constant 0 : index
    %c0_50 = arith.constant 0 : index
    %134 = vector.load %arg10[%c0_49, %c0_50] : memref<1x32xf32, #tpu.memory_space<vmem>>, vector<1x32xf32>
    %135 = vector.broadcast %134 : vector<1x32xf32> to vector<32x32xf32>
    %136 = arith.addf %133, %135 : vector<32x32xf32>
    %c0_51 = arith.constant 0 : index
    %c0_52 = arith.constant 0 : index
    %137 = vector.load %arg11[%c0_51, %c0_52] : memref<32x32xf32, #tpu.memory_space<vmem>>, vector<32x32xf32>
    tpu.vector_store %arg11[%c0_51, %c0_52], %136 {strides = array<i32>} : memref<32x32xf32, #tpu.memory_space<vmem>>, vector<32x32xf32>,
    return
  }
  func.func @transform_0(%arg0: i32) -> (i32, i32) {
    %c0_i32 = arith.constant 0 : i32
    %c0_i32_0 = arith.constant 0 : i32
    return %arg0, %c0_i32 : i32, i32
  }
  func.func @transform_1(%arg0: i32) -> (i32, i32) {
    %c0_i32 = arith.constant 0 : i32
    %c0_i32_0 = arith.constant 0 : i32
    %c0_i32_1 = arith.constant 0 : i32
    return %c0_i32, %c0_i32_0 : i32, i32
  }
  func.func @transform_2(%arg0: i32) -> (i32, i32) {
    %c0_i32 = arith.constant 0 : i32
    %c0_i32_0 = arith.constant 0 : i32
    %c0_i32_1 = arith.constant 0 : i32
    return %c0_i32, %c0_i32_0 : i32, i32
  }
  func.func @transform_3(%arg0: i32) -> (i32, i32) {
    %c0_i32 = arith.constant 0 : i32
    %c0_i32_0 = arith.constant 0 : i32
    %c0_i32_1 = arith.constant 0 : i32
    return %c0_i32, %c0_i32_0 : i32, i32
  }
  func.func @transform_4(%arg0: i32) -> (i32, i32) {
    %c0_i32 = arith.constant 0 : i32
    %c0_i32_0 = arith.constant 0 : i32
    %c0_i32_1 = arith.constant 0 : i32
    return %c0_i32, %c0_i32_0 : i32, i32
  }
  func.func @transform_5(%arg0: i32) -> (i32, i32) {
    %c0_i32 = arith.constant 0 : i32
    %c0_i32_0 = arith.constant 0 : i32
    %c0_i32_1 = arith.constant 0 : i32
    return %c0_i32, %c0_i32_0 : i32, i32
  }
  func.func @transform_6(%arg0: i32) -> (i32, i32) {
    %c0_i32 = arith.constant 0 : i32
    %c0_i32_0 = arith.constant 0 : i32
    %c0_i32_1 = arith.constant 0 : i32
    return %c0_i32, %c0_i32_0 : i32, i32
  }
  func.func @transform_7(%arg0: i32) -> (i32, i32, i32) {
    %c0_i32 = arith.constant 0 : i32
    %c0_i32_0 = arith.constant 0 : i32
    %c0_i32_1 = arith.constant 0 : i32
    %c0_i32_2 = arith.constant 0 : i32
    return %c0_i32, %c0_i32_0, %c0_i32_1 : i32, i32, i32
  }
  func.func @transform_8(%arg0: i32) -> (i32, i32) {
    %c0_i32 = arith.constant 0 : i32
    %c0_i32_0 = arith.constant 0 : i32
    %c0_i32_1 = arith.constant 0 : i32
    return %c0_i32, %c0_i32_0 : i32, i32
  }
  func.func @transform_9(%arg0: i32) -> (i32, i32) {
    %c0_i32 = arith.constant 0 : i32
    %c0_i32_0 = arith.constant 0 : i32
    %c0_i32_1 = arith.constant 0 : i32
    return %c0_i32, %c0_i32_0 : i32, i32
  }
  func.func @transform_10(%arg0: i32) -> (i32, i32) {
    %c0_i32 = arith.constant 0 : i32
    %c0_i32_0 = arith.constant 0 : i32
    return %arg0, %c0_i32 : i32, i32
  }
}

</mosaic_0001>

<bundles_post_ra>
// kernel: tpu_custom_call.1
= control target key start
LH: loop header
LB: loop body
LE: loop exit
PB: predicated region body
PF: predicated region fallthrough
CT: control target
= control target key end

     0   :  { %15 = vsyncpa [#allocation3], 0  ;;  %s2720_s0 = inlined_call_operand.hbm [shape: bf16[32,32], index: 0, kind: input, shape index: {}]   ;;  %s2721_s1 = inlined_call_operand.hbm [shape: bf16[32,32], index: 1, kind: input, shape index: {}]   ;;  %s2722_s2 = inlined_call_operand.hbm [shape: bf16[32,32], index: 2, kind: input, shape index: {}]   ;;  %s2723_s3 = inlined_call_operand.hbm [shape: bf16[32,32], index: 3, kind: input, shape index: {}]   ;;  %s2724_s4 = inlined_call_operand.hbm [shape: f32[1,32], index: 4, kind: input, shape index: {}]   ;;  %s2725_s5 = inlined_call_operand.hbm [shape: f32[1,32], index: 5, kind: input, shape index: {}]   ;;  %s2726_s6 = inlined_call_operand.hbm [shape: f32[1,32], index: 6, kind: input, shape index: {}]   ;;  %s2727_s7 = inlined_call_operand.hbm [shape: f32[4,16,16], index: 7, kind: input, shape index: {}]   ;;  %s2728_s8 = inlined_call_operand.hbm [shape: bf16[32,32], index: 8, kind: input, shape index: {}]   ;;  %s2729_s9 = inlined_call_operand.hbm [shape: f32[1,32], index: 9, kind: input, shape index: {}]   ;;  %s2730_s10 = inlined_call_operand.hbm [shape: f32[32,32], index: 10, kind: output, shape index: {}]  }
   0x1   :  { %16 = vsyncpa [#allocation6], 0 }
   0x2   :  { %17 = vsyncpa [#allocation9], 0 }
   0x3   :  { %18 = vsyncpa [#allocation12], 0 }
   0x4   :  { %19 = vsyncpa [#allocation15], 0 }
   0x5   :  { %20 = vsyncpa [#allocation18], 0 }
   0x6   :  { %21 = vsyncpa [#allocation4], 0  ;;  %s2263_s13 = smov [#allocation5]   ;;  %s2264_s15 = smov [#allocation8]  }
   0x7   :  { %s39_s14 = sshll.u32 %s2263_s13, 4  ;;  %s63_s16 = sshll.u32 %s2264_s15, 4  ;;  %s40_s14 = int_to_ptr.vmem [resolvable:$true] %s39_s14  ;;  %s2338_s16 = int_to_ptr.vmem [resolvable:$true] %s63_s16 }
   0x8   :  { %s2007_s19 = scalar_lea.hbm %s2721_s1, 256 }
   0x9   :  { %p2008_p0 = scmp.ne.s32.totalorder %s2721_s1, %s2007_s19  ;;  %p2011_p1 = scmp.lt.u32.totalorder %s2007_s19, %s2721_s1 }
   0xb   :  { %p2013_p2 = pnand %p2011_p1, %p2008_p0 }
   0xd   :  { %2016 = shalt.err (!%p2013_p2)
}
   0xe   :  { %s2017_s24 = scalar_lea.vmem %s40_s14, 256  ;;  %p2022_p4 = scmp.lt.s32.totalorder %s40_s14, %s40_s14 }
   0xf   :  { %p2018_p3 = scmp.ne.s32.totalorder %s40_s14, %s2017_s24  ;;  %p2023_p5 = scmp.lt.s32.totalorder %s2017_s24, %s2017_s24 }
  0x11   :  { %p2024_p6 = por %p2023_p5, %p2022_p4 }
  0x13   :  { %p2025_p7 = pnand %p2024_p6, %p2018_p3 }
  0x15   :  { %2028 = shalt.err (!%p2025_p7)
}
  0x16   :  { %s2265_s25 = smov 64   ;;  %s2266_s26 = smov 4  }
  0x17   :  { %45 = dma.hbm_to_vmem [thread:$0]  %s2721_s1, 256, %s40_s14, [#allocation6], %s2265_s25, %s2265_s25, %s2266_s26  }
  0x18   :  { %s2029_s11 = scalar_lea.hbm %s2723_s3, 256 }
  0x19   :  { %p2030_p8 = scmp.ne.s32.totalorder %s2723_s3, %s2029_s11  ;;  %p2033_p9 = scmp.lt.u32.totalorder %s2029_s11, %s2723_s3 }
  0x1b   :  { %p2035_p10 = pnand %p2033_p9, %p2030_p8 }
  0x1d   :  { %2038 = shalt.err (!%p2035_p10)
}
  0x1e   :  { %s2039_s18 = scalar_lea.vmem %s2338_s16, 256  ;;  %p2044_p12 = scmp.lt.s32.totalorder %s2338_s16, %s2338_s16 }
  0x1f   :  { %p2040_p11 = scmp.ne.s32.totalorder %s2338_s16, %s2039_s18  ;;  %p2045_p13 = scmp.lt.s32.totalorder %s2039_s18, %s2039_s18 }
  0x21   :  { %p2046_p0 = por %p2045_p13, %p2044_p12 }
  0x23   :  { %p2047_p1 = pnand %p2046_p0, %p2040_p11 }
  0x25   :  { %2050 = shalt.err (!%p2047_p1)
}
  0x26   :  { %69 = dma.hbm_to_vmem [thread:$0]  %s2723_s3, 256, %s2338_s16, [#allocation9], %s2265_s25, %s2265_s25, %s2266_s26  }
  0x27   :  { %s2267_s19 = smov [#allocation11]   ;;  %s2268_s21 = smov [#allocation14]  }
  0x28   :  { %s86_s20 = sshll.u32 %s2267_s19, 4  ;;  %s105_s22 = sshll.u32 %s2268_s21, 4  ;;  %s87_s20 = int_to_ptr.vmem [resolvable:$true] %s86_s20  ;;  %s2375_s22 = int_to_ptr.vmem [resolvable:$true] %s105_s22 }
  0x29   :  { %s2051_s27 = scalar_lea.hbm %s2725_s5, 16 }
  0x2a   :  { %p2052_p2 = scmp.ne.s32.totalorder %s2725_s5, %s2051_s27  ;;  %p2055_p3 = scmp.lt.u32.totalorder %s2051_s27, %s2725_s5 }
  0x2c   :  { %p2057_p4 = pnand %p2055_p3, %p2052_p2 }
  0x2e   :  { %2060 = shalt.err (!%p2057_p4)
}
  0x2f   :  { %s2061_s3 = scalar_lea.vmem %s87_s20, 16  ;;  %s2065_s16 = scalar_lea.vmem %s87_s20, 32 }
  0x30   :  { %p2062_p5 = scmp.ne.s32.totalorder %s87_s20, %s2061_s3  ;;  %p2066_p6 = scmp.lt.s32.totalorder %s87_s20, %s87_s20 }
  0x31   :  { %p2067_p7 = scmp.lt.s32.totalorder %s2065_s16, %s2061_s3 }
  0x33   :  { %p2068_p8 = por %p2067_p7, %p2066_p6 }
  0x35   :  { %p2069_p9 = pnand %p2068_p8, %p2062_p5 }
  0x37   :  { %2072 = shalt.err (!%p2069_p9)
}
  0x38   :  { %89 = dma.hbm_to_vmem [thread:$0]  %s2725_s5, 16, %s87_s20, [#allocation12]  }
  0x39   :  { %s2073_s18 = scalar_lea.hbm %s2727_s7, 1024 }
  0x3a   :  { %p2074_p10 = scmp.ne.s32.totalorder %s2727_s7, %s2073_s18  ;;  %p2077_p11 = scmp.lt.u32.totalorder %s2073_s18, %s2727_s7 }
  0x3c   :  { %p2079_p12 = pnand %p2077_p11, %p2074_p10 }
  0x3e   :  { %2082 = shalt.err (!%p2079_p12)
}
  0x3f   :  { %s2083_s23 = scalar_lea.vmem %s2375_s22, 1024  ;;  %p2088_p0 = scmp.lt.s32.totalorder %s2375_s22, %s2375_s22 }
  0x40   :  { %p2084_p13 = scmp.ne.s32.totalorder %s2375_s22, %s2083_s23  ;;  %p2089_p1 = scmp.lt.s32.totalorder %s2083_s23, %s2083_s23 }
  0x42   :  { %p2090_p2 = por %p2089_p1, %p2088_p0 }
  0x44   :  { %p2091_p3 = pnand %p2090_p2, %p2084_p13 }
  0x46   :  { %2094 = shalt.err (!%p2091_p3)
}
  0x47   :  { %s2269_s5 = smov 128   ;;  %s2270_s20 = smov 8  }
  0x48   :  { %111 = dma.hbm_to_vmem [thread:$0]  %s2727_s7, 1024, %s2375_s22, [#allocation15], %s2269_s5, %s2269_s5, %s2270_s20  }
  0x49   :  { %s2271_s28 = smov [#allocation2]   ;;  %s2272_s30 = smov [#allocation7]  }
  0x4a   :  { %s27_s29 = sshll.u32 %s2271_s28, 4  ;;  %s51_s11 = sshll.u32 %s2272_s30, 4  ;;  %s28_s29 = int_to_ptr.vmem [resolvable:$true] %s27_s29  ;;  %s2409_s11 = int_to_ptr.vmem [resolvable:$true] %s51_s11 }
  0x4b   :  { %s2095_s12 = scalar_lea.hbm %s2720_s0, 256 }
  0x4c   :  { %p2096_p4 = scmp.ne.s32.totalorder %s2720_s0, %s2095_s12  ;;  %p2099_p5 = scmp.lt.u32.totalorder %s2095_s12, %s2720_s0 }
  0x4e   :  { %p2101_p6 = pnand %p2099_p5, %p2096_p4 }
  0x50   :  { %2104 = shalt.err (!%p2101_p6)
}
  0x51   :  { %s2105_s7 = scalar_lea.vmem %s28_s29, 256  ;;  %p2110_p8 = scmp.lt.s32.totalorder %s28_s29, %s28_s29 }
  0x52   :  { %p2106_p7 = scmp.ne.s32.totalorder %s28_s29, %s2105_s7  ;;  %p2111_p9 = scmp.lt.s32.totalorder %s2105_s7, %s2105_s7 }
  0x54   :  { %p2112_p10 = por %p2111_p9, %p2110_p8 }
  0x56   :  { %p2113_p11 = pnand %p2112_p10, %p2106_p7 }
  0x58   :  { %2116 = shalt.err (!%p2113_p11)
}
  0x59   :  { %33 = dma.hbm_to_vmem [thread:$0]  %s2720_s0, 256, %s28_s29, [#allocation3], %s2265_s25, %s2265_s25, %s2266_s26  }
  0x5a   :  { %s2117_s21 = scalar_lea.hbm %s2722_s2, 256 }
  0x5b   :  { %p2118_p12 = scmp.ne.s32.totalorder %s2722_s2, %s2117_s21  ;;  %p2121_p13 = scmp.lt.u32.totalorder %s2117_s21, %s2722_s2 }
  0x5d   :  { %p2123_p0 = pnand %p2121_p13, %p2118_p12 }
  0x5f   :  { %2126 = shalt.err (!%p2123_p0)
}
  0x60   :  { %s2127_s30 = scalar_lea.vmem %s2409_s11, 256  ;;  %p2132_p2 = scmp.lt.s32.totalorder %s2409_s11, %s2409_s11 }
  0x61   :  { %p2128_p1 = scmp.ne.s32.totalorder %s2409_s11, %s2127_s30  ;;  %p2133_p3 = scmp.lt.s32.totalorder %s2127_s30, %s2127_s30 }
  0x63   :  { %p2134_p4 = por %p2133_p3, %p2132_p2 }
  0x65   :  { %p2135_p5 = pnand %p2134_p4, %p2128_p1 }
  0x67   :  { %2138 = shalt.err (!%p2135_p5)
}
  0x68   :  { %57 = dma.hbm_to_vmem [thread:$0]  %s2722_s2, 256, %s2409_s11, [#allocation6], %s2265_s25, %s2265_s25, %s2266_s26  }
  0x69   :  { %s2273_s3 = smov [#allocation10]   ;;  %s2274_s12 = smov [#allocation13]  }
  0x6a   :  { %s76_s16 = sshll.u32 %s2273_s3, 4  ;;  %s96_s13 = sshll.u32 %s2274_s12, 4  ;;  %s77_s16 = int_to_ptr.vmem [resolvable:$true] %s76_s16  ;;  %s97_s13 = int_to_ptr.vmem [resolvable:$true] %s96_s13 }
  0x6b   :  { %s2139_s18 = scalar_lea.hbm %s2724_s4, 16 }
  0x6c   :  { %p2140_p6 = scmp.ne.s32.totalorder %s2724_s4, %s2139_s18  ;;  %p2143_p7 = scmp.lt.u32.totalorder %s2139_s18, %s2724_s4 }
  0x6e   :  { %p2145_p8 = pnand %p2143_p7, %p2140_p6 }
  0x70   :  { %2148 = shalt.err (!%p2145_p8)
}
  0x71   :  { %s2149_s2 = scalar_lea.vmem %s77_s16, 16  ;;  %s2153_s11 = scalar_lea.vmem %s77_s16, 32 }
  0x72   :  { %p2150_p9 = scmp.ne.s32.totalorder %s77_s16, %s2149_s2  ;;  %p2154_p10 = scmp.lt.s32.totalorder %s77_s16, %s77_s16 }
  0x73   :  { %p2155_p11 = scmp.lt.s32.totalorder %s2153_s11, %s2149_s2 }
  0x75   :  { %p2156_p12 = por %p2155_p11, %p2154_p10 }
  0x77   :  { %p2157_p13 = pnand %p2156_p12, %p2150_p9 }
  0x79   :  { %2160 = shalt.err (!%p2157_p13)
}
  0x7a   :  { %79 = dma.hbm_to_vmem [thread:$0]  %s2724_s4, 16, %s77_s16, [#allocation9]  }
  0x7b   :  { %s2161_s27 = scalar_lea.hbm %s2726_s6, 16 }
  0x7c   :  { %p2162_p0 = scmp.ne.s32.totalorder %s2726_s6, %s2161_s27  ;;  %p2165_p1 = scmp.lt.u32.totalorder %s2161_s27, %s2726_s6 }
  0x7e   :  { %p2167_p2 = pnand %p2165_p1, %p2162_p0 }
  0x80   :  { %2170 = shalt.err (!%p2167_p2)
}
  0x81   :  { %s2171_s3 = scalar_lea.vmem %s97_s13, 16  ;;  %s2175_s12 = scalar_lea.vmem %s97_s13, 32 }
  0x82   :  { %p2172_p3 = scmp.ne.s32.totalorder %s97_s13, %s2171_s3  ;;  %p2176_p4 = scmp.lt.s32.totalorder %s97_s13, %s97_s13 }
  0x83   :  { %p2177_p5 = scmp.lt.s32.totalorder %s2175_s12, %s2171_s3 }
  0x85   :  { %p2178_p6 = por %p2177_p5, %p2176_p4 }
  0x87   :  { %p2179_p7 = pnand %p2178_p6, %p2172_p3 }
  0x89   :  { %2182 = shalt.err (!%p2179_p7)
}
  0x8a   :  { %99 = dma.hbm_to_vmem [thread:$0]  %s2726_s6, 16, %s97_s13, [#allocation12]  }
  0x8b   :  { %s2275_s15 = smov [#allocation16]   ;;  %s2276_s18 = smov [#allocation17]  }
  0x8c   :  { %s117_s17 = sshll.u32 %s2275_s15, 4  ;;  %s130_s7 = sshll.u32 %s2276_s18, 4  ;;  %s118_s17 = int_to_ptr.vmem [resolvable:$true] %s117_s17  ;;  %s131_s7 = int_to_ptr.vmem [resolvable:$true] %s130_s7 }
  0x8d   :  { %s2183_s14 = scalar_lea.hbm %s2728_s8, 256 }
  0x8e   :  { %p2184_p8 = scmp.ne.s32.totalorder %s2728_s8, %s2183_s14  ;;  %p2187_p9 = scmp.lt.u32.totalorder %s2183_s14, %s2728_s8 }
  0x90   :  { %p2189_p10 = pnand %p2187_p9, %p2184_p8 }
  0x92   :  { %2192 = shalt.err (!%p2189_p10)
}
  0x93   :  { %s2193_s6 = scalar_lea.vmem %s118_s17, 256  ;;  %p2198_p12 = scmp.lt.s32.totalorder %s118_s17, %s118_s17 }
  0x94   :  { %p2194_p11 = scmp.ne.s32.totalorder %s118_s17, %s2193_s6  ;;  %p2199_p13 = scmp.lt.s32.totalorder %s2193_s6, %s2193_s6 }
  0x96   :  { %p2200_p0 = por %p2199_p13, %p2198_p12 }
  0x98   :  { %p2201_p1 = pnand %p2200_p0, %p2194_p11 }
  0x9a   :  { %2204 = shalt.err (!%p2201_p1)
}
  0x9b   :  { %123 = dma.hbm_to_vmem [thread:$0]  %s2728_s8, 256, %s118_s17, [#allocation15], %s2265_s25, %s2265_s25, %s2266_s26  }
  0x9c   :  { %s2205_s28 = scalar_lea.hbm %s2729_s9, 16 }
  0x9d   :  { %p2206_p2 = scmp.ne.s32.totalorder %s2729_s9, %s2205_s28  ;;  %p2209_p3 = scmp.lt.u32.totalorder %s2205_s28, %s2729_s9 }
  0x9f   :  { %p2211_p4 = pnand %p2209_p3, %p2206_p2 }
  0xa1   :  { %2214 = shalt.err (!%p2211_p4)
}
  0xa2   :  { %s2215_s12 = scalar_lea.vmem %s131_s7, 16  ;;  %s2219_s4 = scalar_lea.vmem %s131_s7, 32 }
  0xa3   :  { %p2216_p5 = scmp.ne.s32.totalorder %s131_s7, %s2215_s12  ;;  %p2220_p6 = scmp.lt.s32.totalorder %s131_s7, %s131_s7 }
  0xa4   :  { %p2221_p7 = scmp.lt.s32.totalorder %s2219_s4, %s2215_s12 }
  0xa6   :  { %p2222_p8 = por %p2221_p7, %p2220_p6 }
  0xa8   :  { %p2223_p9 = pnand %p2222_p8, %p2216_p5 }
  0xaa   :  { %2226 = shalt.err (!%p2223_p9)
}
  0xab   :  { %133 = dma.hbm_to_vmem [thread:$0]  %s2729_s9, 16, %s131_s7, [#allocation18]  }
  0xac   :  { %2249 = dma.done.wait [#allocation3], 256  }
  0xad   :  { %2250 = vsyncadd [#allocation3], 4294967040 }
  0xae   :  { %2251 = dma.done.wait [#allocation6], 512  }
  0xaf   :  { %2252 = vsyncadd [#allocation6], 4294966784 }
  0xb0   :  { %2253 = dma.done.wait [#allocation9], 272  }
  0xb1   :  { %2254 = vsyncadd [#allocation9], 4294967024 }
  0xb2   :  { %2255 = dma.done.wait [#allocation12], 32  }
  0xb3   :  { %2256 = vsyncadd [#allocation12], 4294967264 }
  0xb4   :  { %2257 = dma.done.wait [#allocation15], 1280  }
  0xb5   :  { %2258 = vsyncadd [#allocation15], 4294966016 }
  0xb6   :  { %2259 = dma.done.wait [#allocation18], 16  }
  0xb7   :  { %2260 = vsyncadd [#allocation18], 4294967280  ;;  %v1935_v0 = vld [vmem:[#allocation5] sm:$0xff]   ;;  %v1936_v1 = vld [vmem:[#allocation7] sm:$0xff]   ;;  %vm202_vm0 = vcmask 261120   ;;  %vm416_vm1 = vcmask 1043456  }
  0xb8   :  { %1767 = vmatprep.subr.bf16.mxu0 %v1935_v0  ;;  %v1937_v2 = vld [vmem:[#allocation5 + $0x8] sm:$0xff]   ;;  %1775 = vmatprep.subr.bf16.mxu1 %v1936_v1  ;;  %v1938_v3 = vld [vmem:[#allocation7 + $0x8] sm:$0xff]   ;;  %v1939_v4 = vld [vmem:[#allocation2] sm:$0xff]   ;;  %v2277_v10 = vmov 0.0   ;;  %vm2278_vm2 = vmmov 0   ;;  %vm409_vm3 = vcmask 64512  }
  0xb9   :  { %1768 = vmatpush3.bf16.msra.mxu0 %v1935_v0  ;;  %1776 = vmatpush3.bf16.msra.mxu1 %v1936_v1  ;;  %v1940_v5 = vld [vmem:[#allocation2 + $0x8] sm:$0xff]   ;;  %v1941_v6 = vld [vmem:[#allocation8] sm:$0xff]   ;;  %v1942_v7 = vld [vmem:[#allocation8 + $0x8] sm:$0xff]   ;;  %vm567_vm4 = vcmask 130048   ;;  %s2279_s9 = smov 120   ;;  %s2280_s26 = smov 112  }
  0xba   :  { %1769 = vmatprep.subr.bf16.mxu0 %v1937_v2  ;;  %1777 = vmatprep.subr.bf16.mxu1 %v1938_v3  ;;  %v408_v8 = vld [vmem:[#allocation16] sm:$0xf]  ;;  %v1669_v11 = vld [vmem:[#allocation10] ss:$0 sm:$0xff]  ;;  %v1676_v14 = vld [vmem:[#allocation11] ss:$0 sm:$0xff] }
  0xbb   :  { %1771 = vmatprep.mubr.msk.bf16.mxu0 %vm202_vm0, %v1939_v4  ;;  %1779 = vmatprep.mubr.msk.bf16.mxu1 %vm202_vm0, %v1939_v4  ;;  %v418_v9 = vsel %vm416_vm1, %v408_v8, 0  ;;  %v1681_v32 = vld [vmem:[#allocation13] ss:$0 sm:$0xff]  ;;  %v471_v46 = vld [vmem:[#allocation14] sm:$0xff]  ;;  %v472_v48 = vld [vmem:[#allocation14 + $0x8] sm:$0xff]  ;;  %s2281_s16 = smov 104  }
  0xbc   :  { %s2282_s15 = smov [#allocation19]  }
  0xbd   :  { %1770 = vmatpush3.bf16.msra.mxu0 %v1937_v2  ;;  %1778 = vmatpush3.bf16.msra.mxu1 %v1938_v3  ;;  %s1652_s17 = sshll.u32 %s2282_s15, 4  ;;  %s1653_s17 = int_to_ptr.vmem [resolvable:$true] %s1652_s17 }
  0xbe   :  { %1783 = vmatprep.subr.bf16.mxu0 %v1941_v6  ;;  %1911 = vmatprep.subr.msk.bf16.mxu1 %vm416_vm1, %v408_v8  ;;  %s2227_s18 = scalar_lea.vmem %s1653_s17, 512  ;;  %p2232_p11 = scmp.lt.s32.totalorder %s1653_s17, %s1653_s17 }
  0xbf   :  { %p2228_p10 = scmp.ne.s32.totalorder %s1653_s17, %s2227_s18  ;;  %p2233_p12 = scmp.lt.s32.totalorder %s2227_s18, %s2227_s18 }
  0xc0   :  { %1772 = vmatmul.mubr.msk.bf16.vlgmr.msra.gmra.mrb[0].mxu0 %vm202_vm0, %v1940_v5  ;;  %1780 = vmatmul.mubr.msk.bf16.vlgmr.msra.gmra.mrb[0].mxu1 %vm202_vm0, %v1940_v5 }
  0xc1   :  { %1784 = vmatpush3.bf16.msra.mxu0 %v1941_v6  ;;  %1787 = vmatprep.mubr.msk.bf16.mxu0 %vm202_vm0, %v1939_v4  ;;  %p2234_p13 = por %p2233_p12, %p2232_p11 }
  0xc2   :  { %1785 = vmatprep.subr.bf16.mxu0 %v1942_v7  ;;  %1792 = vmatpush3.bf16.msra.mxu1 %v418_v9 }
  0xc3   :  { %1803 = vmatprep.subr.bf16.mxu1 %v2277_v10  ;;  %p2235_p0 = pnand %p2234_p13, %p2228_p10 }
  0xc5   :  { %1786 = vmatpush3.bf16.msra.mxu0 %v1942_v7 }
  0xc6   :  { %1797 = vmatprep.subr.bf16.mxu0 %v2277_v10 }
  0xc8   :  { %1788 = vmatmul.mubr.msk.bf16.vlgmr.msra.gmra.mrb[4].mxu0 %vm202_vm0, %v1940_v5 }
  0xc9   :  { %1799 = vmatprep.mubr.msk.bf16.mxu0 %vm2278_vm2, %v2277_v10 }
 0x193   :  { %v1773_v12 = vpop.f32.mrb[0].mxu0  ;;  %v1781_v13 = vpop.f32.mrb[0].mxu1 }
 0x194   :  { %v252_v15 = vadd.f32 %v1773_v12, %v1669_v11  ;;  %v243_v16 = vpop.f32.mrb[1].mxu0  ;;  %v315_v17 = vpop.f32.mrb[1].mxu1  ;;  %v324_v23 = vadd.f32 %v1781_v13, %v1676_v14 }
 0x195   :  { %v244_v18 = vadd.f32 %v1669_v11, %v243_v16  ;;  %v1774_v19 = vpop.f32.mrb[2].mxu0  ;;  %v1782_v20 = vpop.f32.mrb[2].mxu1  ;;  %v316_v27 = vadd.f32 %v1676_v14, %v315_v17 }
 0x196   :  { %v255_v21 = vadd.f32 %v1774_v19, %v1669_v11  ;;  %v246_v22 = vpop.f32.mrb[3].mxu0  ;;  %v327_v24 = vadd.f32 %v1782_v20, %v1676_v14  ;;  %v318_v25 = vpop.f32.mrb[3].mxu1 }
 0x197   :  { %v247_v26 = vadd.f32 %v1669_v11, %v246_v22  ;;  %v319_v28 = vadd.f32 %v1676_v14, %v318_v25  ;;  %v702_v22 = vld [vmem:[#allocation16 + $0x4] sm:$0xf] }
 0x198   :  { %v2509_v29 = vpack.c.bf16 %v255_v21, %v252_v15  ;;  %v2511_v30 = vpack.c.bf16 %v327_v24, %v324_v23 }
 0x199   :  { %v2513_v31 = vpack.c.bf16 %v247_v26, %v244_v18  ;;  %v2515_v33 = vpack.c.bf16 %v319_v28, %v316_v27 }
 0x19a   :  { %v524_v45 = vsel %vm409_vm3, %v2511_v30, 0 }
 0x19b   :  { %v1789_v34 = vpop.f32.mrb[4].mxu0  ;;  %v477_v37 = vsel %vm409_vm3, %v2515_v33, 0 }
 0x19c   :  { %v396_v35 = vadd.f32 %v1789_v34, %v1681_v32  ;;  %v387_v36 = vpop.f32.mrb[5].mxu0  ;;  %1798 = vmatpush3.bf16.xpose.msra.mxu0 %v477_v37 }
 0x19d   :  { %v388_v38 = vadd.f32 %v1681_v32, %v387_v36  ;;  %v1790_v39 = vpop.f32.mrb[6].mxu0  ;;  %1809 = vmatprep.subr.bf16.mxu0 %v2277_v10 }
 0x19e   :  { %v399_v40 = vadd.f32 %v1790_v39, %v1681_v32  ;;  %v390_v41 = vpop.f32.mrb[7].mxu0 }
 0x19f   :  { %v391_v42 = vadd.f32 %v1681_v32, %v390_v41 }
 0x1a0   :  { %v2520_v43 = vpack.c.bf16 %v399_v40, %v396_v35  ;;  %v716_v40 = vsel %vm416_vm1, %v702_v22, 0 }
 0x1a1   :  { %v2522_v44 = vpack.c.bf16 %v391_v42, %v388_v38 }
 0x1a3   :  { %1793 = vmatprep.mubr.msk.bf16.mxu1 %vm409_vm3, %v2522_v44  ;;  %1800 = vmatmul.mubr.msk.bf16.vlgmr.msra.gmra.mrb[8].mxu0 %vm409_vm3, %v2513_v31 }
 0x1a4   :  { %1794 = vmatmul.mubr.msk.bf16.vlgmr.msra.gmra.mrb[4].mxu1 %vm409_vm3, %v2520_v43  ;;  %1811 = vmatprep.mubr.msk.bf16.mxu0 %vm2278_vm2, %v2277_v10 }
 0x1a5   :  { %1804 = vmatpush3.bf16.xpose.msra.mxu1 %v524_v45  ;;  %1805 = vmatprep.mubr.msk.bf16.mxu1 %vm2278_vm2, %v2277_v10 }
 0x1a6   :  { %1815 = vmatprep.subr.bf16.mxu1 %v2277_v10 }
 0x1ac   :  { %1806 = vmatmul.mubr.msk.bf16.vlgmr.msra.gmra.mrb[8].mxu1 %vm409_vm3, %v2509_v29 }
 0x1ad   :  { %1817 = vmatprep.mubr.msk.bf16.mxu1 %vm2278_vm2, %v2277_v10 }
 0x276   :  { %v513_v47 = vpop.f32.mrb[8].mxu0 }
 0x277   :  { %v1795_v49 = vpop.f32.mrb[4].mxu1  ;;  %v514_v50 = vadd.f32 %v513_v47, %v471_v46  ;;  %v1801_v51 = vpop.f32.mrb[9].mxu0 }
 0x278   :  { %v454_v52 = vpop.f32.mrb[5].mxu1  ;;  %v516_v53 = vpop.f32.mrb[10].mxu0 }
 0x279   :  { %v1796_v54 = vpop.f32.mrb[6].mxu1  ;;  %v517_v55 = vadd.f32 %v516_v53, %v472_v48  ;;  %v1802_v56 = vpop.f32.mrb[11].mxu0  ;;  %v568_v57 = vsel %vm567_vm4, %v514_v50, -inf }
 0x27a   :  { %v470_v58 = vpack.c.bf16 %v1796_v54, %v1795_v49  ;;  %v457_v59 = vpop.f32.mrb[7].mxu1  ;;  %569 = vmax.xlane.f32.xlu0 %v568_v57 }
 0x27b   :  { %v469_v60 = vpack.c.bf16 %v457_v59, %v454_v52  ;;  %v571_v61 = vsel %vm567_vm4, %v517_v55, -inf }
 0x27c   :  { %1816 = vmatpush3.bf16.msra.mxu1 %v470_v58 }
 0x27d   :  { %1810 = vmatpush3.bf16.msra.mxu0 %v469_v60  ;;  %1827 = vmatprep.subr.bf16.mxu1 %v2277_v10 }
 0x27e   :  { %572 = vmax.xlane.f32.xlu0 %v571_v61  ;;  %1912 = vmatprep.subr.msk.bf16.mxu0 %vm416_vm1, %v702_v22 }
 0x27f   :  { %v560_v62 = vpop.f32.mrb[8].mxu1 }
 0x280   :  { %v561_v63 = vadd.f32 %v560_v62, %v471_v46  ;;  %v1807_v0 = vpop.f32.mrb[9].mxu1 }
 0x281   :  { %v563_v1 = vpop.f32.mrb[10].mxu1 }
 0x282   :  { %v564_v2 = vadd.f32 %v563_v1, %v472_v48  ;;  %v1808_v3 = vpop.f32.mrb[11].mxu1  ;;  %v574_v4 = vsel %vm567_vm4, %v561_v63, -inf }
 0x283   :  { %575 = vmax.xlane.f32.xlu1 %v574_v4 }
 0x284   :  { %v577_v5 = vsel %vm567_vm4, %v564_v2, -inf }
 0x287   :  { %578 = vmax.xlane.f32.xlu1 %v577_v5 }
 0x307   :  { %v570_v6 = vpop.xlane.xlu0 %569 }
 0x308   :  { %v580_v7 = vsub.f32 %v514_v50, %v570_v6 }
 0x30a   :  { %v584_v8 = vmul.f32 1.442695, %v580_v7 }
 0x30b   :  { %v573_v9 = vpop.xlane.xlu0 %572 }
 0x30c   :  { %1943 = vpow2.f32 %v584_v8  ;;  %v581_v11 = vsub.f32 %v517_v55, %v573_v9 }
 0x30e   :  { %v586_v12 = vmul.f32 1.442695, %v581_v11 }
 0x310   :  { %v576_v13 = vpop.xlane.xlu1 %575  ;;  %1945 = vpow2.f32 %v586_v12  ;;  %v770_v12 = vld [vmem:[#allocation14 + $0x10] sm:$0xff] }
 0x311   :  { %v582_v14 = vsub.f32 %v561_v63, %v576_v13 }
 0x313   :  { %v588_v15 = vmul.f32 1.442695, %v582_v14 }
 0x314   :  { %v579_v23 = vpop.xlane.xlu1 %578 }
 0x315   :  { %1947 = vpow2.f32 %v588_v15  ;;  %v583_v24 = vsub.f32 %v564_v2, %v579_v23 }
 0x316   :  { %v1944_v16 = vpop.eup %1943 }
 0x317   :  { %v592_v17 = vsel %vm567_vm4, %v1944_v16, 0.0  ;;  %v590_v25 = vmul.f32 1.442695, %v583_v24 }
 0x318   :  { %593 = vadd.xlane.f32.xlu0 %v592_v17 }
 0x319   :  { %1949 = vpow2.f32 %v590_v25 }
 0x31a   :  { %v1946_v18 = vpop.eup %1945 }
 0x31b   :  { %v595_v19 = vsel %vm567_vm4, %v1946_v18, 0.0 }
 0x31c   :  { %596 = vadd.xlane.f32.xlu1 %v595_v19 }
 0x31f   :  { %v1948_v20 = vpop.eup %1947 }
 0x320   :  { %v598_v21 = vsel %vm567_vm4, %v1948_v20, 0.0 }
 0x321   :  { %599 = vadd.xlane.f32.xlu0 %v598_v21 }
 0x323   :  { %v1950_v26 = vpop.eup %1949 }
 0x324   :  { %v601_v27 = vsel %vm567_vm4, %v1950_v26, 0.0 }
 0x32d   :  { %707 = vrot.lane.b32.xlu1 %v2520_v43, %s2279_s9 }
 0x331   :  { %776 = vrot.lane.b32.xlu1 %v2515_v33, %s2279_s9 }
 0x337   :  { %705 = vrot.lane.b32.xlu0 %v2522_v44, %s2279_s9 }
 0x33b   :  { %773 = vrot.lane.b32.xlu0 %v2513_v31, %s2279_s9 }
 0x355   :  { %602 = vadd.xlane.f32.xlu1 %v601_v27 }
 0x366   :  { %829 = vrot.lane.b32.xlu1 %v2511_v30, %s2279_s9 }
 0x36a   :  { %826 = vrot.lane.b32.xlu1 %v2509_v29, %s2279_s9 }
 0x3a5   :  { %v594_v28 = vpop.xlane.xlu0 %593 }
 0x3a6   :  { %1951 = vrcp.f32 %v594_v28 }
 0x3a9   :  { %v597_v32 = vpop.xlane.xlu1 %596 }
 0x3aa   :  { %1953 = vrcp.f32 %v597_v32 }
 0x3ad   :  { %v708_v42 = vpop.permute.xlu1 %707 }
 0x3ae   :  { %v600_v35 = vpop.xlane.xlu0 %599 }
 0x3af   :  { %1955 = vrcp.f32 %v600_v35 }
 0x3b0   :  { %v1952_v34 = vpop.eup %1951 }
 0x3b1   :  { %v608_v37 = vmul.f32 %v1952_v34, %v1944_v16  ;;  %v777_v45 = vpop.permute.xlu1 %776  ;;  %v771_v16 = vld [vmem:[#allocation14 + $0x18] sm:$0xff] }
 0x3b2   :  { %v706_v41 = vpop.permute.xlu0 %705  ;;  %v782_v55 = vsel %vm409_vm3, %v777_v45, 0 }
 0x3b4   :  { %v1954_v36 = vpop.eup %1953 }
 0x3b5   :  { %v609_v38 = vmul.f32 %v1954_v36, %v1946_v18 }
 0x3b6   :  { %v774_v56 = vpop.permute.xlu0 %773 }
 0x3b7   :  { %v612_v39 = vpack.c.bf16 %v609_v38, %v608_v37 }
 0x3b9   :  { %1812 = vmatmul.mubr.msk.bf16.vlgmr.msra.gmra.mrb[12].mxu0 %vm567_vm4, %v612_v39  ;;  %v1956_v49 = vpop.eup %1955 }
 0x3ba   :  { %1823 = vmatprep.mubr.msk.bf16.mxu0 %vm409_vm3, %v706_v41  ;;  %1822 = vmatpush3.bf16.msra.mxu0 %v716_v40  ;;  %v610_v51 = vmul.f32 %v1956_v49, %v1948_v20 }
 0x3bb   :  { %1833 = vmatprep.subr.bf16.mxu0 %v2277_v10 }
 0x3c1   :  { %1824 = vmatmul.mubr.msk.bf16.vlgmr.msra.gmra.mrb[16].mxu0 %vm409_vm3, %v708_v42 }
 0x3c2   :  { %1835 = vmatprep.mubr.msk.bf16.mxu0 %vm2278_vm2, %v2277_v10 }
 0x3e2   :  { %v603_v46 = vpop.xlane.xlu1 %602 }
 0x3e3   :  { %1957 = vrcp.f32 %v603_v46 }
 0x3e6   :  { %v830_v47 = vpop.permute.xlu1 %829 }
 0x3e7   :  { %v835_v48 = vsel %vm409_vm3, %v830_v47, 0 }
 0x3e8   :  { %1834 = vmatpush3.bf16.xpose.msra.mxu0 %v835_v48 }
 0x3e9   :  { %1845 = vmatprep.subr.bf16.mxu0 %v2277_v10 }
 0x3ea   :  { %v827_v53 = vpop.permute.xlu1 %826 }
 0x3ed   :  { %v1958_v50 = vpop.eup %1957 }
 0x3ee   :  { %v611_v52 = vmul.f32 %v1958_v50, %v1950_v26 }
 0x3ef   :  { %1836 = vmatmul.mubr.msk.bf16.vlgmr.msra.gmra.mrb[20].mxu0 %vm409_vm3, %v827_v53 }
 0x3f0   :  { %v613_v54 = vpack.c.bf16 %v611_v52, %v610_v51  ;;  %1847 = vmatprep.mubr.msk.bf16.mxu0 %vm2278_vm2, %v2277_v10  ;;  %v1016_v52 = vld [vmem:[#allocation16 + $0x8] sm:$0xf] }
 0x3f2   :  { %1818 = vmatmul.mubr.msk.bf16.vlgmr.msra.gmra.mrb[12].mxu1 %vm567_vm4, %v613_v54 }
 0x3f3   :  { %1828 = vmatpush3.bf16.xpose.msra.mxu1 %v782_v55  ;;  %1829 = vmatprep.mubr.msk.bf16.mxu1 %vm2278_vm2, %v2277_v10 }
 0x3f4   :  { %1839 = vmatprep.subr.bf16.mxu1 %v2277_v10 }
 0x3fa   :  { %1830 = vmatmul.mubr.msk.bf16.vlgmr.msra.gmra.mrb[16].mxu1 %vm409_vm3, %v774_v56 }
 0x3fb   :  { %1841 = vmatprep.mubr.msk.bf16.mxu1 %vm2278_vm2, %v2277_v10 }
 0x48c   :  { %v2577_v57 = vpop.f32.mrb[12].mxu0 }
 0x48d   :  { %v1813_v58 = vpop.f32.mrb[13].mxu0 }
 0x48e   :  { %v2579_v59 = vpop.f32.mrb[14].mxu0 }
 0x48f   :  { %v1814_v60 = vpop.f32.mrb[15].mxu0 }
 0x494   :  { %v1825_v61 = vpop.f32.mrb[16].mxu0 }
 0x495   :  { %v752_v62 = vpop.f32.mrb[17].mxu0 }
 0x496   :  { %v1826_v63 = vpop.f32.mrb[18].mxu0 }
 0x497   :  { %v768_v0 = vpack.c.bf16 %v1826_v63, %v1825_v61  ;;  %v755_v1 = vpop.f32.mrb[19].mxu0 }
 0x498   :  { %v767_v2 = vpack.c.bf16 %v755_v1, %v752_v62 }
 0x499   :  { %1846 = vmatpush3.bf16.msra.mxu0 %v768_v0 }
 0x49a   :  { %1840 = vmatpush3.bf16.msra.mxu1 %v767_v2  ;;  %1857 = vmatprep.subr.bf16.mxu0 %v2277_v10 }
 0x49b   :  { %1913 = vmatprep.subr.msk.bf16.mxu1 %vm416_vm1, %v1016_v52 }
 0x4c2   :  { %v871_v3 = vpop.f32.mrb[20].mxu0 }
 0x4c3   :  { %v1837_v4 = vpop.f32.mrb[21].mxu0  ;;  %v872_v18 = vadd.f32 %v871_v3, %v770_v12 }
 0x4c4   :  { %v874_v5 = vpop.f32.mrb[22].mxu0 }
 0x4c5   :  { %v2582_v6 = vpop.f32.mrb[12].mxu1  ;;  %v1838_v7 = vpop.f32.mrb[23].mxu0  ;;  %v875_v23 = vadd.f32 %v874_v5, %v771_v16  ;;  %v884_v24 = vsel %vm567_vm4, %v872_v18, -inf }
 0x4c6   :  { %v1819_v8 = vpop.f32.mrb[13].mxu1 }
 0x4c7   :  { %v2584_v9 = vpop.f32.mrb[14].mxu1  ;;  %v887_v25 = vsel %vm567_vm4, %v875_v23, -inf }
 0x4c8   :  { %v1820_v11 = vpop.f32.mrb[15].mxu1 }
 0x4cd   :  { %v818_v13 = vpop.f32.mrb[16].mxu1 }
 0x4ce   :  { %v819_v14 = vadd.f32 %v818_v13, %v770_v12  ;;  %v1831_v15 = vpop.f32.mrb[17].mxu1  ;;  %v1028_v12 = vsel %vm416_vm1, %v1016_v52, 0 }
 0x4cf   :  { %v821_v17 = vpop.f32.mrb[18].mxu1 }
 0x4d0   :  { %v822_v19 = vadd.f32 %v821_v17, %v771_v16  ;;  %v1832_v20 = vpop.f32.mrb[19].mxu1  ;;  %v878_v21 = vsel %vm567_vm4, %v819_v14, -inf }
 0x4d1   :  { %879 = vmax.xlane.f32.xlu0 %v878_v21 }
 0x4d2   :  { %v881_v22 = vsel %vm567_vm4, %v822_v19, -inf }
 0x4d3   :  { %882 = vmax.xlane.f32.xlu1 %v881_v22 }
 0x4d5   :  { %885 = vmax.xlane.f32.xlu0 %v884_v24 }
 0x4d9   :  { %888 = vmax.xlane.f32.xlu0 %v887_v25 }
 0x4e4   :  { %1017 = vrot.lane.b32.xlu1 %v2522_v44, %s2280_s26 }
 0x55e   :  { %v880_v26 = vpop.xlane.xlu0 %879 }
 0x55f   :  { %v890_v27 = vsub.f32 %v819_v14, %v880_v26 }
 0x560   :  { %v883_v28 = vpop.xlane.xlu1 %882 }
 0x561   :  { %v894_v35 = vmul.f32 1.442695, %v890_v27  ;;  %v891_v36 = vsub.f32 %v822_v19, %v883_v28  ;;  %v1082_v27 = vld [vmem:[#allocation14 + $0x20] sm:$0xff] }
 0x562   :  { %v886_v32 = vpop.xlane.xlu0 %885 }
 0x563   :  { %v892_v34 = vsub.f32 %v872_v18, %v886_v32  ;;  %v896_v40 = vmul.f32 1.442695, %v891_v36 }
 0x564   :  { %v1018_v53 = vpop.permute.xlu1 %1017 }
 0x565   :  { %v898_v37 = vmul.f32 1.442695, %v892_v34 }
 0x566   :  { %v889_v38 = vpop.xlane.xlu0 %888 }
 0x567   :  { %1959 = vpow2.f32 %v898_v37  ;;  %v893_v39 = vsub.f32 %v875_v23, %v889_v38 }
 0x568   :  { %1961 = vpow2.f32 %v894_v35 }
 0x569   :  { %v900_v41 = vmul.f32 1.442695, %v893_v39 }
 0x56b   :  { %1963 = vpow2.f32 %v900_v41 }
 0x56c   :  { %1965 = vpow2.f32 %v896_v40 }
 0x571   :  { %v1960_v42 = vpop.eup %1959 }
 0x572   :  { %v908_v45 = vsel %vm567_vm4, %v1960_v42, 0.0  ;;  %v1962_v46 = vpop.eup %1961 }
 0x573   :  { %909 = vadd.xlane.f32.xlu0 %v908_v45  ;;  %v902_v48 = vsel %vm567_vm4, %v1962_v46, 0.0 }
 0x575   :  { %v1964_v47 = vpop.eup %1963 }
 0x576   :  { %v911_v49 = vsel %vm567_vm4, %v1964_v47, 0.0  ;;  %v1966_v50 = vpop.eup %1965 }
 0x577   :  { %903 = vadd.xlane.f32.xlu0 %v902_v48  ;;  %912 = vadd.xlane.f32.xlu1 %v911_v49  ;;  %v905_v51 = vsel %vm567_vm4, %v1966_v50, 0.0 }
 0x57b   :  { %906 = vadd.xlane.f32.xlu1 %v905_v51 }
 0x58c   :  { %1019 = vrot.lane.b32.xlu1 %v2520_v43, %s2280_s26 }
 0x58d   :  { %1086 = vrot.lane.b32.xlu0 %v2515_v33, %s2280_s26 }
 0x590   :  { %1084 = vrot.lane.b32.xlu1 %v2513_v31, %s2280_s26 }
 0x591   :  { %1137 = vrot.lane.b32.xlu0 %v2511_v30, %s2280_s26 }
 0x594   :  { %1135 = vrot.lane.b32.xlu1 %v2509_v29, %s2280_s26 }
 0x600   :  { %v910_v54 = vpop.xlane.xlu0 %909 }
 0x601   :  { %1967 = vrcp.f32 %v910_v54 }
 0x604   :  { %v913_v55 = vpop.xlane.xlu1 %912  ;;  %v904_v56 = vpop.xlane.xlu0 %903 }
 0x605   :  { %1969 = vrcp.f32 %v913_v55 }
 0x606   :  { %1971 = vrcp.f32 %v904_v56 }
 0x608   :  { %v907_v58 = vpop.xlane.xlu1 %906  ;;  %v1087_v1 = vpop.permute.xlu0 %1086 }
 0x609   :  { %1973 = vrcp.f32 %v907_v58  ;;  %v1092_v7 = vsel %vm409_vm3, %v1087_v1, 0 }
 0x60b   :  { %v1968_v60 = vpop.eup %1967 }
 0x60c   :  { %v920_v62 = vmul.f32 %v1968_v60, %v1960_v42  ;;  %v1020_v8 = vpop.permute.xlu1 %1019  ;;  %v1138_v14 = vpop.permute.xlu0 %1137 }
 0x60d   :  { %v1143_v15 = vsel %vm409_vm3, %v1138_v14, 0 }
 0x60f   :  { %v1970_v61 = vpop.eup %1969 }
 0x610   :  { %v921_v63 = vmul.f32 %v1970_v61, %v1964_v47  ;;  %v1972_v0 = vpop.eup %1971  ;;  %v1085_v13 = vpop.permute.xlu1 %1084 }
 0x611   :  { %v918_v4 = vmul.f32 %v1972_v0, %v1962_v46 }
 0x612   :  { %v923_v2 = vpack.c.bf16 %v921_v63, %v920_v62 }
 0x613   :  { %v1974_v3 = vpop.eup %1973 }
 0x614   :  { %v919_v5 = vmul.f32 %v1974_v3, %v1966_v50  ;;  %1848 = vmatmul.mubr.msk.bf16.vlgmr.msra.gmra.mrb[24].mxu0 %vm567_vm4, %v923_v2  ;;  %v1136_v16 = vpop.permute.xlu1 %1135 }
 0x615   :  { %1858 = vmatpush3.bf16.xpose.msra.mxu0 %v1092_v7  ;;  %1859 = vmatprep.mubr.msk.bf16.mxu0 %vm2278_vm2, %v2277_v10 }
 0x616   :  { %v922_v11 = vpack.c.bf16 %v919_v5, %v918_v4  ;;  %1869 = vmatprep.subr.bf16.mxu0 %v2277_v10 }
 0x618   :  { %1842 = vmatmul.mubr.msk.bf16.vlgmr.msra.gmra.mrb[20].mxu1 %vm567_vm4, %v922_v11 }
 0x619   :  { %1852 = vmatpush3.bf16.msra.mxu1 %v1028_v12  ;;  %1853 = vmatprep.mubr.msk.bf16.mxu1 %vm409_vm3, %v1018_v53  ;;  %v1324_v12 = vld [vmem:[#allocation16 + $0xc] sm:$0xf] }
 0x61a   :  { %1863 = vmatprep.subr.bf16.mxu1 %v2277_v10 }
 0x61c   :  { %1860 = vmatmul.mubr.msk.bf16.vlgmr.msra.gmra.mrb[28].mxu0 %vm409_vm3, %v1085_v13 }
 0x61d   :  { %1871 = vmatprep.mubr.msk.bf16.mxu0 %vm2278_vm2, %v2277_v10 }
 0x620   :  { %1854 = vmatmul.mubr.msk.bf16.vlgmr.msra.gmra.mrb[24].mxu1 %vm409_vm3, %v1020_v8 }
 0x621   :  { %1865 = vmatprep.mubr.msk.bf16.mxu1 %vm2278_vm2, %v2277_v10 }
 0x622   :  { %1864 = vmatpush3.bf16.xpose.msra.mxu1 %v1143_v15 }
 0x623   :  { %1875 = vmatprep.subr.bf16.mxu1 %v2277_v10 }
 0x629   :  { %1866 = vmatmul.mubr.msk.bf16.vlgmr.msra.gmra.mrb[28].mxu1 %vm409_vm3, %v1136_v16 }
 0x62a   :  { %1877 = vmatprep.mubr.msk.bf16.mxu1 %vm2278_vm2, %v2277_v10 }
 0x6e7   :  { %v1005_v17 = vpop.f32.mrb[24].mxu0 }
 0x6e8   :  { %v2628_v18 = vadd.f32 %v1005_v17, %v2582_v6  ;;  %v1849_v19 = vpop.f32.mrb[25].mxu0  ;;  %v1083_v6 = vld [vmem:[#allocation14 + $0x28] sm:$0xff] }
 0x6e9   :  { %v1008_v20 = vpop.f32.mrb[26].mxu0 }
 0x6ea   :  { %v2631_v21 = vadd.f32 %v1008_v20, %v2584_v9  ;;  %v1850_v22 = vpop.f32.mrb[27].mxu0 }
 0x6eb   :  { %v961_v23 = vpop.f32.mrb[20].mxu1 }
 0x6ec   :  { %v2634_v24 = vadd.f32 %v961_v23, %v2577_v57  ;;  %v1843_v25 = vpop.f32.mrb[21].mxu1  ;;  %v1336_v23 = vsel %vm416_vm1, %v1324_v12, 0 }
 0x6ed   :  { %v964_v26 = vpop.f32.mrb[22].mxu1 }
 0x6ee   :  { %v2637_v28 = vadd.f32 %v964_v26, %v2579_v59  ;;  %v1844_v32 = vpop.f32.mrb[23].mxu1 }
 0x6ef   :  { %v1128_v34 = vpop.f32.mrb[28].mxu0 }
 0x6f0   :  { %v1129_v35 = vadd.f32 %v1128_v34, %v1082_v27  ;;  %v1861_v36 = vpop.f32.mrb[29].mxu0 }
 0x6f1   :  { %v1131_v37 = vpop.f32.mrb[30].mxu0 }
 0x6f2   :  { %v1132_v38 = vadd.f32 %v1131_v37, %v1083_v6  ;;  %v1862_v9 = vpop.f32.mrb[31].mxu0  ;;  %v1186_v39 = vsel %vm567_vm4, %v1129_v35, -inf }
 0x6f3   :  { %1187 = vmax.xlane.f32.xlu0 %v1186_v39  ;;  %v1855_v40 = vpop.f32.mrb[24].mxu1 }
 0x6f4   :  { %v1064_v57 = vpop.f32.mrb[25].mxu1  ;;  %v1189_v41 = vsel %vm567_vm4, %v1132_v38, -inf }
 0x6f5   :  { %1190 = vmax.xlane.f32.xlu1 %v1189_v41  ;;  %v1856_v42 = vpop.f32.mrb[26].mxu1 }
 0x6f6   :  { %v1080_v45 = vpack.c.bf16 %v1856_v42, %v1855_v40  ;;  %v1067_v59 = vpop.f32.mrb[27].mxu1 }
 0x6f7   :  { %v1079_v46 = vpack.c.bf16 %v1067_v59, %v1064_v57 }
 0x6f8   :  { %1876 = vmatpush3.bf16.msra.mxu1 %v1080_v45 }
 0x6f9   :  { %1870 = vmatpush3.bf16.msra.mxu0 %v1079_v46  ;;  %1887 = vmatprep.subr.bf16.mxu1 %v2277_v10 }
 0x6fa   :  { %1914 = vmatprep.subr.msk.bf16.mxu0 %vm416_vm1, %v1324_v12 }
 0x6fc   :  { %v1179_v47 = vpop.f32.mrb[28].mxu1 }
 0x6fd   :  { %v1180_v48 = vadd.f32 %v1179_v47, %v1082_v27  ;;  %v1867_v49 = vpop.f32.mrb[29].mxu1 }
 0x6fe   :  { %v1182_v50 = vpop.f32.mrb[30].mxu1 }
 0x6ff   :  { %v1183_v51 = vadd.f32 %v1182_v50, %v1083_v6  ;;  %v1868_v52 = vpop.f32.mrb[31].mxu1  ;;  %v1192_v53 = vsel %vm567_vm4, %v1180_v48, -inf }
 0x700   :  { %1193 = vmax.xlane.f32.xlu0 %v1192_v53 }
 0x701   :  { %v1195_v54 = vsel %vm567_vm4, %v1183_v51, -inf }
 0x704   :  { %1196 = vmax.xlane.f32.xlu0 %v1195_v54 }
 0x780   :  { %v1188_v55 = vpop.xlane.xlu0 %1187 }
 0x781   :  { %v1198_v56 = vsub.f32 %v1129_v35, %v1188_v55 }
 0x782   :  { %v1191_v58 = vpop.xlane.xlu1 %1190 }
 0x783   :  { %v1202_v60 = vmul.f32 1.442695, %v1198_v56  ;;  %v1199_v61 = vsub.f32 %v1132_v38, %v1191_v58 }
 0x785   :  { %1975 = vpow2.f32 %v1202_v60  ;;  %v1204_v62 = vmul.f32 1.442695, %v1199_v61  ;;  %v1390_v61 = vld [vmem:[#allocation14 + $0x30] sm:$0xff] }
 0x787   :  { %1977 = vpow2.f32 %v1204_v62 }
 0x78d   :  { %v1194_v63 = vpop.xlane.xlu0 %1193 }
 0x78e   :  { %v1200_v0 = vsub.f32 %v1180_v48, %v1194_v63 }
 0x78f   :  { %v1976_v1 = vpop.eup %1975 }
 0x790   :  { %v1206_v2 = vmul.f32 1.442695, %v1200_v0  ;;  %v1210_v3 = vsel %vm567_vm4, %v1976_v1, 0.0 }
 0x791   :  { %v1978_v4 = vpop.eup %1977  ;;  %1211 = vadd.xlane.f32.xlu0 %v1210_v3  ;;  %v1197_v11 = vpop.xlane.xlu0 %1196 }
 0x792   :  { %1979 = vpow2.f32 %v1206_v2  ;;  %v1213_v5 = vsel %vm567_vm4, %v1978_v4, 0.0  ;;  %v1201_v13 = vsub.f32 %v1183_v51, %v1197_v11 }
 0x793   :  { %1214 = vadd.xlane.f32.xlu1 %v1213_v5 }
 0x794   :  { %v1208_v14 = vmul.f32 1.442695, %v1201_v13 }
 0x796   :  { %1981 = vpow2.f32 %v1208_v14 }
 0x79c   :  { %v1980_v7 = vpop.eup %1979 }
 0x79d   :  { %v1216_v8 = vsel %vm567_vm4, %v1980_v7, 0.0 }
 0x79e   :  { %1217 = vadd.xlane.f32.xlu0 %v1216_v8 }
 0x7a0   :  { %v1982_v15 = vpop.eup %1981 }
 0x7a1   :  { %v1219_v16 = vsel %vm567_vm4, %v1982_v15, 0.0 }
 0x7a4   :  { %1327 = vrot.lane.b32.xlu1 %v2520_v43, %s2281_s16 }
 0x7a8   :  { %1394 = vrot.lane.b32.xlu1 %v2515_v33, %s2281_s16 }
 0x7b4   :  { %1325 = vrot.lane.b32.xlu0 %v2522_v44, %s2281_s16 }
 0x7b8   :  { %1392 = vrot.lane.b32.xlu0 %v2513_v31, %s2281_s16 }
 0x7cc   :  { %1220 = vadd.xlane.f32.xlu1 %v1219_v16 }
 0x7dd   :  { %1445 = vrot.lane.b32.xlu1 %v2511_v30, %s2281_s16 }
 0x7e1   :  { %1443 = vrot.lane.b32.xlu1 %v2509_v29, %s2281_s16 }
 0x81e   :  { %v1212_v33 = vpop.xlane.xlu0 %1211 }
 0x81f   :  { %1983 = vrcp.f32 %v1212_v33 }
 0x820   :  { %v1215_v43 = vpop.xlane.xlu1 %1214 }
 0x821   :  { %1985 = vrcp.f32 %v1215_v43 }
 0x824   :  { %v1328_v29 = vpop.permute.xlu1 %1327 }
 0x828   :  { %v1395_v30 = vpop.permute.xlu1 %1394 }
 0x829   :  { %v1984_v44 = vpop.eup %1983  ;;  %v1400_v9 = vsel %vm409_vm3, %v1395_v30, 0 }
 0x82a   :  { %v1226_v20 = vmul.f32 %v1984_v44, %v1976_v1  ;;  %v1391_v1 = vld [vmem:[#allocation14 + $0x38] sm:$0xff] }
 0x82b   :  { %v1986_v17 = vpop.eup %1985  ;;  %v1218_v19 = vpop.xlane.xlu0 %1217 }
 0x82c   :  { %v1227_v22 = vmul.f32 %v1986_v17, %v1978_v4  ;;  %1987 = vrcp.f32 %v1218_v19 }
 0x82e   :  { %v1230_v31 = vpack.c.bf16 %v1227_v22, %v1226_v20 }
 0x82f   :  { %v1326_v25 = vpop.permute.xlu0 %1325 }
 0x830   :  { %1872 = vmatmul.mubr.msk.bf16.vlgmr.msra.gmra.mrb[32].mxu0 %vm567_vm4, %v1230_v31 }
 0x831   :  { %1883 = vmatprep.mubr.msk.bf16.mxu0 %vm409_vm3, %v1326_v25  ;;  %1882 = vmatpush3.bf16.msra.mxu0 %v1336_v23 }
 0x832   :  { %1893 = vmatprep.subr.bf16.mxu0 %v2277_v10 }
 0x833   :  { %v1393_v39 = vpop.permute.xlu0 %1392 }
 0x836   :  { %v1988_v34 = vpop.eup %1987 }
 0x837   :  { %v1228_v35 = vmul.f32 %v1988_v34, %v1980_v7 }
 0x838   :  { %1884 = vmatmul.mubr.msk.bf16.vlgmr.msra.gmra.mrb[36].mxu0 %vm409_vm3, %v1328_v29 }
 0x839   :  { %1895 = vmatprep.mubr.msk.bf16.mxu0 %vm2278_vm2, %v2277_v10 }
 0x859   :  { %v1221_v26 = vpop.xlane.xlu1 %1220 }
 0x85a   :  { %1989 = vrcp.f32 %v1221_v26 }
 0x85d   :  { %v1446_v27 = vpop.permute.xlu1 %1445 }
 0x85e   :  { %v1451_v32 = vsel %vm409_vm3, %v1446_v27, 0 }
 0x85f   :  { %1894 = vmatpush3.bf16.xpose.msra.mxu0 %v1451_v32 }
 0x860   :  { %1905 = vmatprep.subr.bf16.mxu0 %v2277_v10 }
 0x861   :  { %v1444_v37 = vpop.permute.xlu1 %1443 }
 0x864   :  { %v1990_v6 = vpop.eup %1989 }
 0x865   :  { %v1229_v36 = vmul.f32 %v1990_v6, %v1982_v15 }
 0x866   :  { %1896 = vmatmul.mubr.msk.bf16.vlgmr.msra.gmra.mrb[40].mxu0 %vm409_vm3, %v1444_v37 }
 0x867   :  { %v1231_v38 = vpack.c.bf16 %v1229_v36, %v1228_v35  ;;  %1907 = vmatprep.mubr.msk.bf16.mxu0 %vm2278_vm2, %v2277_v10 }
 0x869   :  { %1878 = vmatmul.mubr.msk.bf16.vlgmr.msra.gmra.mrb[32].mxu1 %vm567_vm4, %v1231_v38 }
 0x86a   :  { %1888 = vmatpush3.bf16.xpose.msra.mxu1 %v1400_v9  ;;  %1889 = vmatprep.mubr.msk.bf16.mxu1 %vm2278_vm2, %v2277_v10 }
 0x86b   :  { %1899 = vmatprep.subr.bf16.mxu1 %v2277_v10 }
 0x871   :  { %1890 = vmatmul.mubr.msk.bf16.vlgmr.msra.gmra.mrb[36].mxu1 %vm409_vm3, %v1393_v39 }
 0x872   :  { %1901 = vmatprep.mubr.msk.bf16.mxu1 %vm2278_vm2, %v2277_v10 }
 0x903   :  { %v1269_v40 = vpop.f32.mrb[32].mxu0 }
 0x904   :  { %v2676_v57 = vadd.f32 %v1269_v40, %v2634_v24  ;;  %v1873_v41 = vpop.f32.mrb[33].mxu0 }
 0x905   :  { %v1272_v42 = vpop.f32.mrb[34].mxu0 }
 0x906   :  { %v2679_v45 = vadd.f32 %v1272_v42, %v2637_v28  ;;  %v1874_v59 = vpop.f32.mrb[35].mxu0 }
 0x90b   :  { %v1885_v46 = vpop.f32.mrb[36].mxu0 }
 0x90c   :  { %v1372_v47 = vpop.f32.mrb[37].mxu0 }
 0x90d   :  { %v1886_v48 = vpop.f32.mrb[38].mxu0 }
 0x90e   :  { %v1388_v49 = vpack.c.bf16 %v1886_v48, %v1885_v46  ;;  %v1375_v50 = vpop.f32.mrb[39].mxu0 }
 0x90f   :  { %v1387_v51 = vpack.c.bf16 %v1375_v50, %v1372_v47 }
 0x910   :  { %1906 = vmatpush3.bf16.msra.mxu0 %v1388_v49  ;;  %v1710_v49 = vld [vmem:[#allocation17] ss:$0 sm:$0xff] }
 0x911   :  { %1900 = vmatpush3.bf16.msra.mxu1 %v1387_v51 }
 0x939   :  { %v1487_v52 = vpop.f32.mrb[40].mxu0 }
 0x93a   :  { %v1897_v10 = vpop.f32.mrb[41].mxu0  ;;  %v1488_v3 = vadd.f32 %v1487_v52, %v1390_v61 }
 0x93b   :  { %v1490_v53 = vpop.f32.mrb[42].mxu0 }
 0x93c   :  { %v1313_v54 = vpop.f32.mrb[32].mxu1  ;;  %v1898_v24 = vpop.f32.mrb[43].mxu0  ;;  %v1491_v8 = vadd.f32 %v1490_v53, %v1391_v1 }
 0x93d   :  { %v2682_v55 = vadd.f32 %v1313_v54, %v2628_v18  ;;  %v1879_v56 = vpop.f32.mrb[33].mxu1 }
 0x93e   :  { %v1316_v28 = vpop.f32.mrb[34].mxu1  ;;  %v1503_v11 = vsel %vm567_vm4, %v1491_v8, -inf }
 0x93f   :  { %v2685_v58 = vadd.f32 %v1316_v28, %v2631_v21  ;;  %v1880_v60 = vpop.f32.mrb[35].mxu1  ;;  %v1500_v21 = vsel %vm567_vm4, %v1488_v3, -inf }
 0x944   :  { %v1436_v62 = vpop.f32.mrb[36].mxu1 }
 0x945   :  { %v1437_v63 = vadd.f32 %v1436_v62, %v1390_v61  ;;  %v1891_v0 = vpop.f32.mrb[37].mxu1 }
 0x946   :  { %v1439_v2 = vpop.f32.mrb[38].mxu1 }
 0x947   :  { %v1440_v4 = vadd.f32 %v1439_v2, %v1391_v1  ;;  %v1892_v5 = vpop.f32.mrb[39].mxu1  ;;  %v1494_v7 = vsel %vm567_vm4, %v1437_v63, -inf }
 0x948   :  { %1495 = vmax.xlane.f32.xlu0 %v1494_v7 }
 0x949   :  { %v1497_v18 = vsel %vm567_vm4, %v1440_v4, -inf }
 0x94a   :  { %1498 = vmax.xlane.f32.xlu1 %v1497_v18 }
 0x94c   :  { %1501 = vmax.xlane.f32.xlu0 %v1500_v21 }
 0x950   :  { %1504 = vmax.xlane.f32.xlu0 %v1503_v11 }
 0x9d5   :  { %v1496_v12 = vpop.xlane.xlu0 %1495 }
 0x9d6   :  { %v1506_v13 = vsub.f32 %v1437_v63, %v1496_v12 }
 0x9d7   :  { %v1499_v14 = vpop.xlane.xlu1 %1498 }
 0x9d8   :  { %v1510_v15 = vmul.f32 1.442695, %v1506_v13  ;;  %v1507_v16 = vsub.f32 %v1440_v4, %v1499_v14 }
 0x9d9   :  { %v1502_v33 = vpop.xlane.xlu0 %1501 }
 0x9da   :  { %1991 = vpow2.f32 %v1510_v15  ;;  %v1512_v43 = vmul.f32 1.442695, %v1507_v16  ;;  %v1508_v44 = vsub.f32 %v1488_v3, %v1502_v33 }
 0x9dc   :  { %1993 = vpow2.f32 %v1512_v43  ;;  %v1514_v17 = vmul.f32 1.442695, %v1508_v44 }
 0x9dd   :  { %v1505_v19 = vpop.xlane.xlu0 %1504 }
 0x9de   :  { %1995 = vpow2.f32 %v1514_v17  ;;  %v1509_v20 = vsub.f32 %v1491_v8, %v1505_v19 }
 0x9e0   :  { %v1516_v22 = vmul.f32 1.442695, %v1509_v20 }
 0x9e2   :  { %1997 = vpow2.f32 %v1516_v22 }
 0x9e4   :  { %v1992_v31 = vpop.eup %1991 }
 0x9e5   :  { %v1518_v23 = vsel %vm567_vm4, %v1992_v31, 0.0 }
 0x9e6   :  { %v1994_v25 = vpop.eup %1993  ;;  %1519 = vadd.xlane.f32.xlu0 %v1518_v23 }
 0x9e7   :  { %v1521_v29 = vsel %vm567_vm4, %v1994_v25, 0.0 }
 0x9e8   :  { %v1996_v30 = vpop.eup %1995  ;;  %1522 = vadd.xlane.f32.xlu1 %v1521_v29 }
 0x9e9   :  { %v1524_v26 = vsel %vm567_vm4, %v1996_v30, 0.0 }
 0x9ea   :  { %1525 = vadd.xlane.f32.xlu0 %v1524_v26 }
 0x9ec   :  { %v1998_v27 = vpop.eup %1997 }
 0x9ed   :  { %v1527_v32 = vsel %vm567_vm4, %v1998_v27, 0.0 }
 0x9ee   :  { %1528 = vadd.xlane.f32.xlu1 %v1527_v32 }
 0xa73   :  { %v1520_v34 = vpop.xlane.xlu0 %1519 }
 0xa74   :  { %1999 = vrcp.f32 %v1520_v34 }
 0xa75   :  { %v1523_v6 = vpop.xlane.xlu1 %1522 }
 0xa76   :  { %2001 = vrcp.f32 %v1523_v6 }
 0xa77   :  { %v1526_v35 = vpop.xlane.xlu0 %1525 }
 0xa78   :  { %2003 = vrcp.f32 %v1526_v35 }
 0xa7b   :  { %v1529_v36 = vpop.xlane.xlu1 %1528 }
 0xa7c   :  { %2005 = vrcp.f32 %v1529_v36 }
 0xa7e   :  { %v2000_v37 = vpop.eup %1999 }
 0xa7f   :  { %v1534_v9 = vmul.f32 %v2000_v37, %v1992_v31 }
 0xa80   :  { %v2002_v38 = vpop.eup %2001 }
 0xa81   :  { %v1535_v39 = vmul.f32 %v2002_v38, %v1994_v25 }
 0xa82   :  { %v2004_v41 = vpop.eup %2003 }
 0xa83   :  { %v1538_v40 = vpack.c.bf16 %v1535_v39, %v1534_v9  ;;  %v1536_v59 = vmul.f32 %v2004_v41, %v1996_v30 }
 0xa85   :  { %1902 = vmatmul.mubr.msk.bf16.vlgmr.msra.gmra.mrb[40].mxu1 %vm567_vm4, %v1538_v40 }
 0xa86   :  { %v2006_v42 = vpop.eup %2005 }
 0xa87   :  { %v1537_v46 = vmul.f32 %v2006_v42, %v1998_v27 }
 0xa89   :  { %v1539_v47 = vpack.c.bf16 %v1537_v46, %v1536_v59 }
 0xa8b   :  { %1908 = vmatmul.mubr.msk.bf16.vlgmr.msra.gmra.mrb[44].mxu0 %vm567_vm4, %v1539_v47 }
 0xb58   :  { %v1577_v48 = vpop.f32.mrb[40].mxu1 }
 0xb59   :  { %v1628_v50 = vadd.f32 %v1577_v48, %v2676_v57  ;;  %v1903_v51 = vpop.f32.mrb[41].mxu1 }
 0xb5a   :  { %v1580_v52 = vpop.f32.mrb[42].mxu1 }
 0xb5b   :  { %v1639_v10 = vadd.f32 %v1710_v49, %v1628_v50  ;;  %v1629_v53 = vadd.f32 %v1580_v52, %v2679_v45  ;;  %v1904_v54 = vpop.f32.mrb[43].mxu1 }
 0xb5d   :  { %1643 = vst.msk [vmem:[#allocation19] sm:$0xff] %vm202_vm0, %v1639_v10  ;;  %v1640_v24 = vadd.f32 %v1710_v49, %v1629_v53 }
 0xb5e   :  { %v1621_v56 = vpop.f32.mrb[44].mxu0 }
 0xb5f   :  { %1644 = vst.msk [vmem:[#allocation19 + $0x8] sm:$0xff] %vm202_vm0, %v1640_v24  ;;  %v1630_v28 = vadd.f32 %v1621_v56, %v2682_v55  ;;  %v1909_v60 = vpop.f32.mrb[45].mxu0 }
 0xb60   :  { %v1624_v61 = vpop.f32.mrb[46].mxu0 }
 0xb61   :  { %v1641_v62 = vadd.f32 %v1710_v49, %v1630_v28  ;;  %v1631_v57 = vadd.f32 %v1624_v61, %v2685_v58  ;;  %v1910_v63 = vpop.f32.mrb[47].mxu0 }
 0xb63   :  { %1645 = vst.msk [vmem:[#allocation19 + $0x10] sm:$0xff] %vm202_vm0, %v1641_v62  ;;  %v1642_v45 = vadd.f32 %v1710_v49, %v1631_v57 }
 0xb65   :  { %1646 = vst.msk [vmem:[#allocation19 + $0x18] sm:$0xff] %vm202_vm0, %v1642_v45 }
 0xb66   :  { %2238 = shalt.err (!%p2235_p0)
}
 0xb67   :  { %s2239_s1 = scalar_lea.hbm %s2730_s10, 512 }
 0xb68   :  { %p2240_p1 = scmp.ne.s32.totalorder %s2730_s10, %s2239_s1  ;;  %p2243_p2 = scmp.lt.u32.totalorder %s2239_s1, %s2730_s10 }
 0xb6a   :  { %p2245_p3 = pnand %p2243_p2, %p2240_p1 }
 0xb6c   :  { %2248 = shalt.err (!%p2245_p3)
}
 0xb6d   :  { %1658 = dma.vmem_to_hbm [thread:$0]  %s1653_s17, 512, %s2730_s10, [#allocation4], %s2269_s5, %s2269_s5, %s2270_s20  }
 0xb6e   :  { %2261 = dma.done.wait [#allocation4], 512  }
 0xb6f   :  { %2262 = vsyncadd [#allocation4], 4294966784 }
 0xb70   :  { %1662 = vsyncpa [#allocation3], 1 }
 0xb71   :  { %1663 = vsyncpa [#allocation6], 1 }
 0xb72   :  { %1664 = vsyncpa [#allocation9], 1 }
 0xb73   :  { %1665 = vsyncpa [#allocation12], 1 }
 0xb74   :  { %1666 = vsyncpa [#allocation15], 1 }
 0xb75   :  { %1667 = vsyncpa [#allocation18], 1 }
 0xb76   :  { %1668 = vsyncpa [#allocation4], 1 }

// kernel: tpu_custom_call.1
= control target key start
LH: loop header
LB: loop body
LE: loop exit
PB: predicated region body
PF: predicated region fallthrough
CT: control target
= control target key end

     0   :  { %15 = vsyncpa [#allocation3], 0  ;;  %s2720_s0 = inlined_call_operand.hbm [shape: bf16[32,32], index: 0, kind: input, shape index: {}]   ;;  %s2721_s1 = inlined_call_operand.hbm [shape: bf16[32,32], index: 1, kind: input, shape index: {}]   ;;  %s2722_s2 = inlined_call_operand.hbm [shape: bf16[32,32], index: 2, kind: input, shape index: {}]   ;;  %s2723_s3 = inlined_call_operand.hbm [shape: bf16[32,32], index: 3, kind: input, shape index: {}]   ;;  %s2724_s4 = inlined_call_operand.hbm [shape: f32[1,32], index: 4, kind: input, shape index: {}]   ;;  %s2725_s5 = inlined_call_operand.hbm [shape: f32[1,32], index: 5, kind: input, shape index: {}]   ;;  %s2726_s6 = inlined_call_operand.hbm [shape: f32[1,32], index: 6, kind: input, shape index: {}]   ;;  %s2727_s7 = inlined_call_operand.hbm [shape: f32[4,16,16], index: 7, kind: input, shape index: {}]   ;;  %s2728_s8 = inlined_call_operand.hbm [shape: bf16[32,32], index: 8, kind: input, shape index: {}]   ;;  %s2729_s9 = inlined_call_operand.hbm [shape: f32[1,32], index: 9, kind: input, shape index: {}]   ;;  %s2730_s10 = inlined_call_operand.hbm [shape: f32[32,32], index: 10, kind: output, shape index: {}]  }
   0x1   :  { %16 = vsyncpa [#allocation6], 0 }
   0x2   :  { %17 = vsyncpa [#allocation9], 0 }
   0x3   :  { %18 = vsyncpa [#allocation12], 0 }
   0x4   :  { %19 = vsyncpa [#allocation15], 0 }
   0x5   :  { %20 = vsyncpa [#allocation18], 0 }
   0x6   :  { %21 = vsyncpa [#allocation4], 0  ;;  %s2263_s13 = smov [#allocation5]   ;;  %s2264_s15 = smov [#allocation8]  }
   0x7   :  { %s39_s14 = sshll.u32 %s2263_s13, 4  ;;  %s63_s16 = sshll.u32 %s2264_s15, 4  ;;  %s40_s14 = int_to_ptr.vmem [resolvable:$true] %s39_s14  ;;  %s2338_s16 = int_to_ptr.vmem [resolvable:$true] %s63_s16 }
   0x8   :  { %s2007_s19 = scalar_lea.hbm %s2721_s1, 256 }
   0x9   :  { %p2008_p0 = scmp.ne.s32.totalorder %s2721_s1, %s2007_s19  ;;  %p2011_p1 = scmp.lt.u32.totalorder %s2007_s19, %s2721_s1 }
   0xb   :  { %p2013_p2 = pnand %p2011_p1, %p2008_p0 }
   0xd   :  { %2016 = shalt.err (!%p2013_p2)
}
   0xe   :  { %s2017_s24 = scalar_lea.vmem %s40_s14, 256  ;;  %p2022_p4 = scmp.lt.s32.totalorder %s40_s14, %s40_s14 }
   0xf   :  { %p2018_p3 = scmp.ne.s32.totalorder %s40_s14, %s2017_s24  ;;  %p2023_p5 = scmp.lt.s32.totalorder %s2017_s24, %s2017_s24 }
  0x11   :  { %p2024_p6 = por %p2023_p5, %p2022_p4 }
  0x13   :  { %p2025_p7 = pnand %p2024_p6, %p2018_p3 }
  0x15   :  { %2028 = shalt.err (!%p2025_p7)
}
  0x16   :  { %s2265_s25 = smov 64   ;;  %s2266_s26 = smov 4  }
  0x17   :  { %45 = dma.hbm_to_vmem [thread:$0]  %s2721_s1, 256, %s40_s14, [#allocation6], %s2265_s25, %s2265_s25, %s2266_s26  }
  0x18   :  { %s2029_s11 = scalar_lea.hbm %s2723_s3, 256 }
  0x19   :  { %p2030_p8 = scmp.ne.s32.totalorder %s2723_s3, %s2029_s11  ;;  %p2033_p9 = scmp.lt.u32.totalorder %s2029_s11, %s2723_s3 }
  0x1b   :  { %p2035_p10 = pnand %p2033_p9, %p2030_p8 }
  0x1d   :  { %2038 = shalt.err (!%p2035_p10)
}
  0x1e   :  { %s2039_s18 = scalar_lea.vmem %s2338_s16, 256  ;;  %p2044_p12 = scmp.lt.s32.totalorder %s2338_s16, %s2338_s16 }
  0x1f   :  { %p2040_p11 = scmp.ne.s32.totalorder %s2338_s16, %s2039_s18  ;;  %p2045_p13 = scmp.lt.s32.totalorder %s2039_s18, %s2039_s18 }
  0x21   :  { %p2046_p0 = por %p2045_p13, %p2044_p12 }
  0x23   :  { %p2047_p1 = pnand %p2046_p0, %p2040_p11 }
  0x25   :  { %2050 = shalt.err (!%p2047_p1)
}
  0x26   :  { %69 = dma.hbm_to_vmem [thread:$0]  %s2723_s3, 256, %s2338_s16, [#allocation9], %s2265_s25, %s2265_s25, %s2266_s26  }
  0x27   :  { %s2267_s19 = smov [#allocation11]   ;;  %s2268_s21 = smov [#allocation14]  }
  0x28   :  { %s86_s20 = sshll.u32 %s2267_s19, 4  ;;  %s105_s22 = sshll.u32 %s2268_s21, 4  ;;  %s87_s20 = int_to_ptr.vmem [resolvable:$true] %s86_s20  ;;  %s2375_s22 = int_to_ptr.vmem [resolvable:$true] %s105_s22 }
  0x29   :  { %s2051_s27 = scalar_lea.hbm %s2725_s5, 16 }
  0x2a   :  { %p2052_p2 = scmp.ne.s32.totalorder %s2725_s5, %s2051_s27  ;;  %p2055_p3 = scmp.lt.u32.totalorder %s2051_s27, %s2725_s5 }
  0x2c   :  { %p2057_p4 = pnand %p2055_p3, %p2052_p2 }
  0x2e   :  { %2060 = shalt.err (!%p2057_p4)
}
  0x2f   :  { %s2061_s3 = scalar_lea.vmem %s87_s20, 16  ;;  %s2065_s16 = scalar_lea.vmem %s87_s20, 32 }
  0x30   :  { %p2062_p5 = scmp.ne.s32.totalorder %s87_s20, %s2061_s3  ;;  %p2066_p6 = scmp.lt.s32.totalorder %s87_s20, %s87_s20 }
  0x31   :  { %p2067_p7 = scmp.lt.s32.totalorder %s2065_s16, %s2061_s3 }
  0x33   :  { %p2068_p8 = por %p2067_p7, %p2066_p6 }
  0x35   :  { %p2069_p9 = pnand %p2068_p8, %p2062_p5 }
  0x37   :  { %2072 = shalt.err (!%p2069_p9)
}
  0x38   :  { %89 = dma.hbm_to_vmem [thread:$0]  %s2725_s5, 16, %s87_s20, [#allocation12]  }
  0x39   :  { %s2073_s18 = scalar_lea.hbm %s2727_s7, 1024 }
  0x3a   :  { %p2074_p10 = scmp.ne.s32.totalorder %s2727_s7, %s2073_s18  ;;  %p2077_p11 = scmp.lt.u32.totalorder %s2073_s18, %s2727_s7 }
  0x3c   :  { %p2079_p12 = pnand %p2077_p11, %p2074_p10 }
  0x3e   :  { %2082 = shalt.err (!%p2079_p12)
}
  0x3f   :  { %s2083_s23 = scalar_lea.vmem %s2375_s22, 1024  ;;  %p2088_p0 = scmp.lt.s32.totalorder %s2375_s22, %s2375_s22 }
  0x40   :  { %p2084_p13 = scmp.ne.s32.totalorder %s2375_s22, %s2083_s23  ;;  %p2089_p1 = scmp.lt.s32.totalorder %s2083_s23, %s2083_s23 }
  0x42   :  { %p2090_p2 = por %p2089_p1, %p2088_p0 }
  0x44   :  { %p2091_p3 = pnand %p2090_p2, %p2084_p13 }
  0x46   :  { %2094 = shalt.err (!%p2091_p3)
}
  0x47   :  { %s2269_s5 = smov 128   ;;  %s2270_s20 = smov 8  }
  0x48   :  { %111 = dma.hbm_to_vmem [thread:$0]  %s2727_s7, 1024, %s2375_s22, [#allocation15], %s2269_s5, %s2269_s5, %s2270_s20  }
  0x49   :  { %s2271_s28 = smov [#allocation2]   ;;  %s2272_s30 = smov [#allocation7]  }
  0x4a   :  { %s27_s29 = sshll.u32 %s2271_s28, 4  ;;  %s51_s11 = sshll.u32 %s2272_s30, 4  ;;  %s28_s29 = int_to_ptr.vmem [resolvable:$true] %s27_s29  ;;  %s2409_s11 = int_to_ptr.vmem [resolvable:$true] %s51_s11 }
  0x4b   :  { %s2095_s12 = scalar_lea.hbm %s2720_s0, 256 }
  0x4c   :  { %p2096_p4 = scmp.ne.s32.totalorder %s2720_s0, %s2095_s12  ;;  %p2099_p5 = scmp.lt.u32.totalorder %s2095_s12, %s2720_s0 }
  0x4e   :  { %p2101_p6 = pnand %p2099_p5, %p2096_p4 }
  0x50   :  { %2104 = shalt.err (!%p2101_p6)
}
  0x51   :  { %s2105_s7 = scalar_lea.vmem %s28_s29, 256  ;;  %p2110_p8 = scmp.lt.s32.totalorder %s28_s29, %s28_s29 }
  0x52   :  { %p2106_p7 = scmp.ne.s32.totalorder %s28_s29, %s2105_s7  ;;  %p2111_p9 = scmp.lt.s32.totalorder %s2105_s7, %s2105_s7 }
  0x54   :  { %p2112_p10 = por %p2111_p9, %p2110_p8 }
  0x56   :  { %p2113_p11 = pnand %p2112_p10, %p2106_p7 }
  0x58   :  { %2116 = shalt.err (!%p2113_p11)
}
  0x59   :  { %33 = dma.hbm_to_vmem [thread:$0]  %s2720_s0, 256, %s28_s29, [#allocation3], %s2265_s25, %s2265_s25, %s2266_s26  }
  0x5a   :  { %s2117_s21 = scalar_lea.hbm %s2722_s2, 256 }
  0x5b   :  { %p2118_p12 = scmp.ne.s32.totalorder %s2722_s2, %s2117_s21  ;;  %p2121_p13 = scmp.lt.u32.totalorder %s2117_s21, %s2722_s2 }
  0x5d   :  { %p2123_p0 = pnand %p2121_p13, %p2118_p12 }
  0x5f   :  { %2126 = shalt.err (!%p2123_p0)
}
  0x60   :  { %s2127_s30 = scalar_lea.vmem %s2409_s11, 256  ;;  %p2132_p2 = scmp.lt.s32.totalorder %s2409_s11, %s2409_s11 }
  0x61   :  { %p2128_p1 = scmp.ne.s32.totalorder %s2409_s11, %s2127_s30  ;;  %p2133_p3 = scmp.lt.s32.totalorder %s2127_s30, %s2127_s30 }
  0x63   :  { %p2134_p4 = por %p2133_p3, %p2132_p2 }
  0x65   :  { %p2135_p5 = pnand %p2134_p4, %p2128_p1 }
  0x67   :  { %2138 = shalt.err (!%p2135_p5)
}
  0x68   :  { %57 = dma.hbm_to_vmem [thread:$0]  %s2722_s2, 256, %s2409_s11, [#allocation6], %s2265_s25, %s2265_s25, %s2266_s26  }
  0x69   :  { %s2273_s3 = smov [#allocation10]   ;;  %s2274_s12 = smov [#allocation13]  }
  0x6a   :  { %s76_s16 = sshll.u32 %s2273_s3, 4  ;;  %s96_s13 = sshll.u32 %s2274_s12, 4  ;;  %s77_s16 = int_to_ptr.vmem [resolvable:$true] %s76_s16  ;;  %s97_s13 = int_to_ptr.vmem [resolvable:$true] %s96_s13 }
  0x6b   :  { %s2139_s18 = scalar_lea.hbm %s2724_s4, 16 }
  0x6c   :  { %p2140_p6 = scmp.ne.s32.totalorder %s2724_s4, %s2139_s18  ;;  %p2143_p7 = scmp.lt.u32.totalorder %s2139_s18, %s2724_s4 }
  0x6e   :  { %p2145_p8 = pnand %p2143_p7, %p2140_p6 }
  0x70   :  { %2148 = shalt.err (!%p2145_p8)
}
  0x71   :  { %s2149_s2 = scalar_lea.vmem %s77_s16, 16  ;;  %s2153_s11 = scalar_lea.vmem %s77_s16, 32 }
  0x72   :  { %p2150_p9 = scmp.ne.s32.totalorder %s77_s16, %s2149_s2  ;;  %p2154_p10 = scmp.lt.s32.totalorder %s77_s16, %s77_s16 }
  0x73   :  { %p2155_p11 = scmp.lt.s32.totalorder %s2153_s11, %s2149_s2 }
  0x75   :  { %p2156_p12 = por %p2155_p11, %p2154_p10 }
  0x77   :  { %p2157_p13 = pnand %p2156_p12, %p2150_p9 }
  0x79   :  { %2160 = shalt.err (!%p2157_p13)
}
  0x7a   :  { %79 = dma.hbm_to_vmem [thread:$0]  %s2724_s4, 16, %s77_s16, [#allocation9]  }
  0x7b   :  { %s2161_s27 = scalar_lea.hbm %s2726_s6, 16 }
  0x7c   :  { %p2162_p0 = scmp.ne.s32.totalorder %s2726_s6, %s2161_s27  ;;  %p2165_p1 = scmp.lt.u32.totalorder %s2161_s27, %s2726_s6 }
  0x7e   :  { %p2167_p2 = pnand %p2165_p1, %p2162_p0 }
  0x80   :  { %2170 = shalt.err (!%p2167_p2)
}
  0x81   :  { %s2171_s3 = scalar_lea.vmem %s97_s13, 16  ;;  %s2175_s12 = scalar_lea.vmem %s97_s13, 32 }
  0x82   :  { %p2172_p3 = scmp.ne.s32.totalorder %s97_s13, %s2171_s3  ;;  %p2176_p4 = scmp.lt.s32.totalorder %s97_s13, %s97_s13 }
  0x83   :  { %p2177_p5 = scmp.lt.s32.totalorder %s2175_s12, %s2171_s3 }
  0x85   :  { %p2178_p6 = por %p2177_p5, %p2176_p4 }
  0x87   :  { %p2179_p7 = pnand %p2178_p6, %p2172_p3 }
  0x89   :  { %2182 = shalt.err (!%p2179_p7)
}
  0x8a   :  { %99 = dma.hbm_to_vmem [thread:$0]  %s2726_s6, 16, %s97_s13, [#allocation12]  }
  0x8b   :  { %s2275_s15 = smov [#allocation16]   ;;  %s2276_s18 = smov [#allocation17]  }
  0x8c   :  { %s117_s17 = sshll.u32 %s2275_s15, 4  ;;  %s130_s7 = sshll.u32 %s2276_s18, 4  ;;  %s118_s17 = int_to_ptr.vmem [resolvable:$true] %s117_s17  ;;  %s131_s7 = int_to_ptr.vmem [resolvable:$true] %s130_s7 }
  0x8d   :  { %s2183_s14 = scalar_lea.hbm %s2728_s8, 256 }
  0x8e   :  { %p2184_p8 = scmp.ne.s32.totalorder %s2728_s8, %s2183_s14  ;;  %p2187_p9 = scmp.lt.u32.totalorder %s2183_s14, %s2728_s8 }
  0x90   :  { %p2189_p10 = pnand %p2187_p9, %p2184_p8 }
  0x92   :  { %2192 = shalt.err (!%p2189_p10)
}
  0x93   :  { %s2193_s6 = scalar_lea.vmem %s118_s17, 256  ;;  %p2198_p12 = scmp.lt.s32.totalorder %s118_s17, %s118_s17 }
  0x94   :  { %p2194_p11 = scmp.ne.s32.totalorder %s118_s17, %s2193_s6  ;;  %p2199_p13 = scmp.lt.s32.totalorder %s2193_s6, %s2193_s6 }
  0x96   :  { %p2200_p0 = por %p2199_p13, %p2198_p12 }
  0x98   :  { %p2201_p1 = pnand %p2200_p0, %p2194_p11 }
  0x9a   :  { %2204 = shalt.err (!%p2201_p1)
}
  0x9b   :  { %123 = dma.hbm_to_vmem [thread:$0]  %s2728_s8, 256, %s118_s17, [#allocation15], %s2265_s25, %s2265_s25, %s2266_s26  }
  0x9c   :  { %s2205_s28 = scalar_lea.hbm %s2729_s9, 16 }
  0x9d   :  { %p2206_p2 = scmp.ne.s32.totalorder %s2729_s9, %s2205_s28  ;;  %p2209_p3 = scmp.lt.u32.totalorder %s2205_s28, %s2729_s9 }
  0x9f   :  { %p2211_p4 = pnand %p2209_p3, %p2206_p2 }
  0xa1   :  { %2214 = shalt.err (!%p2211_p4)
}
  0xa2   :  { %s2215_s12 = scalar_lea.vmem %s131_s7, 16  ;;  %s2219_s4 = scalar_lea.vmem %s131_s7, 32 }
  0xa3   :  { %p2216_p5 = scmp.ne.s32.totalorder %s131_s7, %s2215_s12  ;;  %p2220_p6 = scmp.lt.s32.totalorder %s131_s7, %s131_s7 }
  0xa4   :  { %p2221_p7 = scmp.lt.s32.totalorder %s2219_s4, %s2215_s12 }
  0xa6   :  { %p2222_p8 = por %p2221_p7, %p2220_p6 }
  0xa8   :  { %p2223_p9 = pnand %p2222_p8, %p2216_p5 }
  0xaa   :  { %2226 = shalt.err (!%p2223_p9)
}
  0xab   :  { %133 = dma.hbm_to_vmem [thread:$0]  %s2729_s9, 16, %s131_s7, [#allocation18]  }
  0xac   :  { %2249 = dma.done.wait [#allocation3], 256  }
  0xad   :  { %2250 = vsyncadd [#allocation3], 4294967040 }
  0xae   :  { %2251 = dma.done.wait [#allocation6], 512  }
  0xaf   :  { %2252 = vsyncadd [#allocation6], 4294966784 }
  0xb0   :  { %2253 = dma.done.wait [#allocation9], 272  }
  0xb1   :  { %2254 = vsyncadd [#allocation9], 4294967024 }
  0xb2   :  { %2255 = dma.done.wait [#allocation12], 32  }
  0xb3   :  { %2256 = vsyncadd [#allocation12], 4294967264 }
  0xb4   :  { %2257 = dma.done.wait [#allocation15], 1280  }
  0xb5   :  { %2258 = vsyncadd [#allocation15], 4294966016 }
  0xb6   :  { %2259 = dma.done.wait [#allocation18], 16  }
  0xb7   :  { %2260 = vsyncadd [#allocation18], 4294967280  ;;  %v1935_v0 = vld [vmem:[#allocation5] sm:$0xff]   ;;  %v1936_v1 = vld [vmem:[#allocation7] sm:$0xff]   ;;  %vm202_vm0 = vcmask 261120   ;;  %vm416_vm1 = vcmask 1043456  }
  0xb8   :  { %1767 = vmatprep.subr.bf16.mxu0 %v1935_v0  ;;  %v1937_v2 = vld [vmem:[#allocation5 + $0x8] sm:$0xff]   ;;  %1775 = vmatprep.subr.bf16.mxu1 %v1936_v1  ;;  %v1938_v3 = vld [vmem:[#allocation7 + $0x8] sm:$0xff]   ;;  %v1939_v4 = vld [vmem:[#allocation2] sm:$0xff]   ;;  %v2277_v10 = vmov 0.0   ;;  %vm2278_vm2 = vmmov 0   ;;  %vm409_vm3 = vcmask 64512  }
  0xb9   :  { %1768 = vmatpush3.bf16.msra.mxu0 %v1935_v0  ;;  %1776 = vmatpush3.bf16.msra.mxu1 %v1936_v1  ;;  %v1940_v5 = vld [vmem:[#allocation2 + $0x8] sm:$0xff]   ;;  %v1941_v6 = vld [vmem:[#allocation8] sm:$0xff]   ;;  %v1942_v7 = vld [vmem:[#allocation8 + $0x8] sm:$0xff]   ;;  %vm567_vm4 = vcmask 130048   ;;  %s2279_s9 = smov 120   ;;  %s2280_s26 = smov 112  }
  0xba   :  { %1769 = vmatprep.subr.bf16.mxu0 %v1937_v2  ;;  %1777 = vmatprep.subr.bf16.mxu1 %v1938_v3  ;;  %v408_v8 = vld [vmem:[#allocation16] sm:$0xf]  ;;  %v1669_v11 = vld [vmem:[#allocation10] ss:$0 sm:$0xff]  ;;  %v1676_v14 = vld [vmem:[#allocation11] ss:$0 sm:$0xff] }
  0xbb   :  { %1771 = vmatprep.mubr.msk.bf16.mxu0 %vm202_vm0, %v1939_v4  ;;  %1779 = vmatprep.mubr.msk.bf16.mxu1 %vm202_vm0, %v1939_v4  ;;  %v418_v9 = vsel %vm416_vm1, %v408_v8, 0  ;;  %v1681_v32 = vld [vmem:[#allocation13] ss:$0 sm:$0xff]  ;;  %v471_v46 = vld [vmem:[#allocation14] sm:$0xff]  ;;  %v472_v48 = vld [vmem:[#allocation14 + $0x8] sm:$0xff]  ;;  %s2281_s16 = smov 104  }
  0xbc   :  { %s2282_s15 = smov [#allocation19]  }
  0xbd   :  { %1770 = vmatpush3.bf16.msra.mxu0 %v1937_v2  ;;  %1778 = vmatpush3.bf16.msra.mxu1 %v1938_v3  ;;  %s1652_s17 = sshll.u32 %s2282_s15, 4  ;;  %s1653_s17 = int_to_ptr.vmem [resolvable:$true] %s1652_s17 }
  0xbe   :  { %1783 = vmatprep.subr.bf16.mxu0 %v1941_v6  ;;  %1911 = vmatprep.subr.msk.bf16.mxu1 %vm416_vm1, %v408_v8  ;;  %s2227_s18 = scalar_lea.vmem %s1653_s17, 512  ;;  %p2232_p11 = scmp.lt.s32.totalorder %s1653_s17, %s1653_s17 }
  0xbf   :  { %p2228_p10 = scmp.ne.s32.totalorder %s1653_s17, %s2227_s18  ;;  %p2233_p12 = scmp.lt.s32.totalorder %s2227_s18, %s2227_s18 }
  0xc0   :  { %1772 = vmatmul.mubr.msk.bf16.vlgmr.msra.gmra.mrb[0].mxu0 %vm202_vm0, %v1940_v5  ;;  %1780 = vmatmul.mubr.msk.bf16.vlgmr.msra.gmra.mrb[0].mxu1 %vm202_vm0, %v1940_v5 }
  0xc1   :  { %1784 = vmatpush3.bf16.msra.mxu0 %v1941_v6  ;;  %1787 = vmatprep.mubr.msk.bf16.mxu0 %vm202_vm0, %v1939_v4  ;;  %p2234_p13 = por %p2233_p12, %p2232_p11 }
  0xc2   :  { %1785 = vmatprep.subr.bf16.mxu0 %v1942_v7  ;;  %1792 = vmatpush3.bf16.msra.mxu1 %v418_v9 }
  0xc3   :  { %1803 = vmatprep.subr.bf16.mxu1 %v2277_v10  ;;  %p2235_p0 = pnand %p2234_p13, %p2228_p10 }
  0xc5   :  { %1786 = vmatpush3.bf16.msra.mxu0 %v1942_v7 }
  0xc6   :  { %1797 = vmatprep.subr.bf16.mxu0 %v2277_v10 }
  0xc8   :  { %1788 = vmatmul.mubr.msk.bf16.vlgmr.msra.gmra.mrb[4].mxu0 %vm202_vm0, %v1940_v5 }
  0xc9   :  { %1799 = vmatprep.mubr.msk.bf16.mxu0 %vm2278_vm2, %v2277_v10 }
 0x193   :  { %v1773_v12 = vpop.f32.mrb[0].mxu0  ;;  %v1781_v13 = vpop.f32.mrb[0].mxu1 }
 0x194   :  { %v252_v15 = vadd.f32 %v1773_v12, %v1669_v11  ;;  %v243_v16 = vpop.f32.mrb[1].mxu0  ;;  %v315_v17 = vpop.f32.mrb[1].mxu1  ;;  %v324_v23 = vadd.f32 %v1781_v13, %v1676_v14 }
 0x195   :  { %v244_v18 = vadd.f32 %v1669_v11, %v243_v16  ;;  %v1774_v19 = vpop.f32.mrb[2].mxu0  ;;  %v1782_v20 = vpop.f32.mrb[2].mxu1  ;;  %v316_v27 = vadd.f32 %v1676_v14, %v315_v17 }
 0x196   :  { %v255_v21 = vadd.f32 %v1774_v19, %v1669_v11  ;;  %v246_v22 = vpop.f32.mrb[3].mxu0  ;;  %v327_v24 = vadd.f32 %v1782_v20, %v1676_v14  ;;  %v318_v25 = vpop.f32.mrb[3].mxu1 }
 0x197   :  { %v247_v26 = vadd.f32 %v1669_v11, %v246_v22  ;;  %v319_v28 = vadd.f32 %v1676_v14, %v318_v25  ;;  %v702_v22 = vld [vmem:[#allocation16 + $0x4] sm:$0xf] }
 0x198   :  { %v2509_v29 = vpack.c.bf16 %v255_v21, %v252_v15  ;;  %v2511_v30 = vpack.c.bf16 %v327_v24, %v324_v23 }
 0x199   :  { %v2513_v31 = vpack.c.bf16 %v247_v26, %v244_v18  ;;  %v2515_v33 = vpack.c.bf16 %v319_v28, %v316_v27 }
 0x19a   :  { %v524_v45 = vsel %vm409_vm3, %v2511_v30, 0 }
 0x19b   :  { %v1789_v34 = vpop.f32.mrb[4].mxu0  ;;  %v477_v37 = vsel %vm409_vm3, %v2515_v33, 0 }
 0x19c   :  { %v396_v35 = vadd.f32 %v1789_v34, %v1681_v32  ;;  %v387_v36 = vpop.f32.mrb[5].mxu0  ;;  %1798 = vmatpush3.bf16.xpose.msra.mxu0 %v477_v37 }
 0x19d   :  { %v388_v38 = vadd.f32 %v1681_v32, %v387_v36  ;;  %v1790_v39 = vpop.f32.mrb[6].mxu0  ;;  %1809 = vmatprep.subr.bf16.mxu0 %v2277_v10 }
 0x19e   :  { %v399_v40 = vadd.f32 %v1790_v39, %v1681_v32  ;;  %v390_v41 = vpop.f32.mrb[7].mxu0 }
 0x19f   :  { %v391_v42 = vadd.f32 %v1681_v32, %v390_v41 }
 0x1a0   :  { %v2520_v43 = vpack.c.bf16 %v399_v40, %v396_v35  ;;  %v716_v40 = vsel %vm416_vm1, %v702_v22, 0 }
 0x1a1   :  { %v2522_v44 = vpack.c.bf16 %v391_v42, %v388_v38 }
 0x1a3   :  { %1793 = vmatprep.mubr.msk.bf16.mxu1 %vm409_vm3, %v2522_v44  ;;  %1800 = vmatmul.mubr.msk.bf16.vlgmr.msra.gmra.mrb[8].mxu0 %vm409_vm3, %v2513_v31 }
 0x1a4   :  { %1794 = vmatmul.mubr.msk.bf16.vlgmr.msra.gmra.mrb[4].mxu1 %vm409_vm3, %v2520_v43  ;;  %1811 = vmatprep.mubr.msk.bf16.mxu0 %vm2278_vm2, %v2277_v10 }
 0x1a5   :  { %1804 = vmatpush3.bf16.xpose.msra.mxu1 %v524_v45  ;;  %1805 = vmatprep.mubr.msk.bf16.mxu1 %vm2278_vm2, %v2277_v10 }
 0x1a6   :  { %1815 = vmatprep.subr.bf16.mxu1 %v2277_v10 }
 0x1ac   :  { %1806 = vmatmul.mubr.msk.bf16.vlgmr.msra.gmra.mrb[8].mxu1 %vm409_vm3, %v2509_v29 }
 0x1ad   :  { %1817 = vmatprep.mubr.msk.bf16.mxu1 %vm2278_vm2, %v2277_v10 }
 0x276   :  { %v513_v47 = vpop.f32.mrb[8].mxu0 }
 0x277   :  { %v1795_v49 = vpop.f32.mrb[4].mxu1  ;;  %v514_v50 = vadd.f32 %v513_v47, %v471_v46  ;;  %v1801_v51 = vpop.f32.mrb[9].mxu0 }
 0x278   :  { %v454_v52 = vpop.f32.mrb[5].mxu1  ;;  %v516_v53 = vpop.f32.mrb[10].mxu0 }
 0x279   :  { %v1796_v54 = vpop.f32.mrb[6].mxu1  ;;  %v517_v55 = vadd.f32 %v516_v53, %v472_v48  ;;  %v1802_v56 = vpop.f32.mrb[11].mxu0  ;;  %v568_v57 = vsel %vm567_vm4, %v514_v50, -inf }
 0x27a   :  { %v470_v58 = vpack.c.bf16 %v1796_v54, %v1795_v49  ;;  %v457_v59 = vpop.f32.mrb[7].mxu1  ;;  %569 = vmax.xlane.f32.xlu0 %v568_v57 }
 0x27b   :  { %v469_v60 = vpack.c.bf16 %v457_v59, %v454_v52  ;;  %v571_v61 = vsel %vm567_vm4, %v517_v55, -inf }
 0x27c   :  { %1816 = vmatpush3.bf16.msra.mxu1 %v470_v58 }
 0x27d   :  { %1810 = vmatpush3.bf16.msra.mxu0 %v469_v60  ;;  %1827 = vmatprep.subr.bf16.mxu1 %v2277_v10 }
 0x27e   :  { %572 = vmax.xlane.f32.xlu0 %v571_v61  ;;  %1912 = vmatprep.subr.msk.bf16.mxu0 %vm416_vm1, %v702_v22 }
 0x27f   :  { %v560_v62 = vpop.f32.mrb[8].mxu1 }
 0x280   :  { %v561_v63 = vadd.f32 %v560_v62, %v471_v46  ;;  %v1807_v0 = vpop.f32.mrb[9].mxu1 }
 0x281   :  { %v563_v1 = vpop.f32.mrb[10].mxu1 }
 0x282   :  { %v564_v2 = vadd.f32 %v563_v1, %v472_v48  ;;  %v1808_v3 = vpop.f32.mrb[11].mxu1  ;;  %v574_v4 = vsel %vm567_vm4, %v561_v63, -inf }
 0x283   :  { %575 = vmax.xlane.f32.xlu1 %v574_v4 }
 0x284   :  { %v577_v5 = vsel %vm567_vm4, %v564_v2, -inf }
 0x287   :  { %578 = vmax.xlane.f32.xlu1 %v577_v5 }
 0x307   :  { %v570_v6 = vpop.xlane.xlu0 %569 }
 0x308   :  { %v580_v7 = vsub.f32 %v514_v50, %v570_v6 }
 0x30a   :  { %v584_v8 = vmul.f32 1.442695, %v580_v7 }
 0x30b   :  { %v573_v9 = vpop.xlane.xlu0 %572 }
 0x30c   :  { %1943 = vpow2.f32 %v584_v8  ;;  %v581_v11 = vsub.f32 %v517_v55, %v573_v9 }
 0x30e   :  { %v586_v12 = vmul.f32 1.442695, %v581_v11 }
 0x310   :  { %v576_v13 = vpop.xlane.xlu1 %575  ;;  %1945 = vpow2.f32 %v586_v12  ;;  %v770_v12 = vld [vmem:[#allocation14 + $0x10] sm:$0xff] }
 0x311   :  { %v582_v14 = vsub.f32 %v561_v63, %v576_v13 }
 0x313   :  { %v588_v15 = vmul.f32 1.442695, %v582_v14 }
 0x314   :  { %v579_v23 = vpop.xlane.xlu1 %578 }
 0x315   :  { %1947 = vpow2.f32 %v588_v15  ;;  %v583_v24 = vsub.f32 %v564_v2, %v579_v23 }
 0x316   :  { %v1944_v16 = vpop.eup %1943 }
 0x317   :  { %v592_v17 = vsel %vm567_vm4, %v1944_v16, 0.0  ;;  %v590_v25 = vmul.f32 1.442695, %v583_v24 }
 0x318   :  { %593 = vadd.xlane.f32.xlu0 %v592_v17 }
 0x319   :  { %1949 = vpow2.f32 %v590_v25 }
 0x31a   :  { %v1946_v18 = vpop.eup %1945 }
 0x31b   :  { %v595_v19 = vsel %vm567_vm4, %v1946_v18, 0.0 }
 0x31c   :  { %596 = vadd.xlane.f32.xlu1 %v595_v19 }
 0x31f   :  { %v1948_v20 = vpop.eup %1947 }
 0x320   :  { %v598_v21 = vsel %vm567_vm4, %v1948_v20, 0.0 }
 0x321   :  { %599 = vadd.xlane.f32.xlu0 %v598_v21 }
 0x323   :  { %v1950_v26 = vpop.eup %1949 }
 0x324   :  { %v601_v27 = vsel %vm567_vm4, %v1950_v26, 0.0 }
 0x32d   :  { %707 = vrot.lane.b32.xlu1 %v2520_v43, %s2279_s9 }
 0x331   :  { %776 = vrot.lane.b32.xlu1 %v2515_v33, %s2279_s9 }
 0x337   :  { %705 = vrot.lane.b32.xlu0 %v2522_v44, %s2279_s9 }
 0x33b   :  { %773 = vrot.lane.b32.xlu0 %v2513_v31, %s2279_s9 }
 0x355   :  { %602 = vadd.xlane.f32.xlu1 %v601_v27 }
 0x366   :  { %829 = vrot.lane.b32.xlu1 %v2511_v30, %s2279_s9 }
 0x36a   :  { %826 = vrot.lane.b32.xlu1 %v2509_v29, %s2279_s9 }
 0x3a5   :  { %v594_v28 = vpop.xlane.xlu0 %593 }
 0x3a6   :  { %1951 = vrcp.f32 %v594_v28 }
 0x3a9   :  { %v597_v32 = vpop.xlane.xlu1 %596 }
 0x3aa   :  { %1953 = vrcp.f32 %v597_v32 }
 0x3ad   :  { %v708_v42 = vpop.permute.xlu1 %707 }
 0x3ae   :  { %v600_v35 = vpop.xlane.xlu0 %599 }
 0x3af   :  { %1955 = vrcp.f32 %v600_v35 }
 0x3b0   :  { %v1952_v34 = vpop.eup %1951 }
 0x3b1   :  { %v608_v37 = vmul.f32 %v1952_v34, %v1944_v16  ;;  %v777_v45 = vpop.permute.xlu1 %776  ;;  %v771_v16 = vld [vmem:[#allocation14 + $0x18] sm:$0xff] }
 0x3b2   :  { %v706_v41 = vpop.permute.xlu0 %705  ;;  %v782_v55 = vsel %vm409_vm3, %v777_v45, 0 }
 0x3b4   :  { %v1954_v36 = vpop.eup %1953 }
 0x3b5   :  { %v609_v38 = vmul.f32 %v1954_v36, %v1946_v18 }
 0x3b6   :  { %v774_v56 = vpop.permute.xlu0 %773 }
 0x3b7   :  { %v612_v39 = vpack.c.bf16 %v609_v38, %v608_v37 }
 0x3b9   :  { %1812 = vmatmul.mubr.msk.bf16.vlgmr.msra.gmra.mrb[12].mxu0 %vm567_vm4, %v612_v39  ;;  %v1956_v49 = vpop.eup %1955 }
 0x3ba   :  { %1823 = vmatprep.mubr.msk.bf16.mxu0 %vm409_vm3, %v706_v41  ;;  %1822 = vmatpush3.bf16.msra.mxu0 %v716_v40  ;;  %v610_v51 = vmul.f32 %v1956_v49, %v1948_v20 }
 0x3bb   :  { %1833 = vmatprep.subr.bf16.mxu0 %v2277_v10 }
 0x3c1   :  { %1824 = vmatmul.mubr.msk.bf16.vlgmr.msra.gmra.mrb[16].mxu0 %vm409_vm3, %v708_v42 }
 0x3c2   :  { %1835 = vmatprep.mubr.msk.bf16.mxu0 %vm2278_vm2, %v2277_v10 }
 0x3e2   :  { %v603_v46 = vpop.xlane.xlu1 %602 }
 0x3e3   :  { %1957 = vrcp.f32 %v603_v46 }
 0x3e6   :  { %v830_v47 = vpop.permute.xlu1 %829 }
 0x3e7   :  { %v835_v48 = vsel %vm409_vm3, %v830_v47, 0 }
 0x3e8   :  { %1834 = vmatpush3.bf16.xpose.msra.mxu0 %v835_v48 }
 0x3e9   :  { %1845 = vmatprep.subr.bf16.mxu0 %v2277_v10 }
 0x3ea   :  { %v827_v53 = vpop.permute.xlu1 %826 }
 0x3ed   :  { %v1958_v50 = vpop.eup %1957 }
 0x3ee   :  { %v611_v52 = vmul.f32 %v1958_v50, %v1950_v26 }
 0x3ef   :  { %1836 = vmatmul.mubr.msk.bf16.vlgmr.msra.gmra.mrb[20].mxu0 %vm409_vm3, %v827_v53 }
 0x3f0   :  { %v613_v54 = vpack.c.bf16 %v611_v52, %v610_v51  ;;  %1847 = vmatprep.mubr.msk.bf16.mxu0 %vm2278_vm2, %v2277_v10  ;;  %v1016_v52 = vld [vmem:[#allocation16 + $0x8] sm:$0xf] }
 0x3f2   :  { %1818 = vmatmul.mubr.msk.bf16.vlgmr.msra.gmra.mrb[12].mxu1 %vm567_vm4, %v613_v54 }
 0x3f3   :  { %1828 = vmatpush3.bf16.xpose.msra.mxu1 %v782_v55  ;;  %1829 = vmatprep.mubr.msk.bf16.mxu1 %vm2278_vm2, %v2277_v10 }
 0x3f4   :  { %1839 = vmatprep.subr.bf16.mxu1 %v2277_v10 }
 0x3fa   :  { %1830 = vmatmul.mubr.msk.bf16.vlgmr.msra.gmra.mrb[16].mxu1 %vm409_vm3, %v774_v56 }
 0x3fb   :  { %1841 = vmatprep.mubr.msk.bf16.mxu1 %vm2278_vm2, %v2277_v10 }
 0x48c   :  { %v2577_v57 = vpop.f32.mrb[12].mxu0 }
 0x48d   :  { %v1813_v58 = vpop.f32.mrb[13].mxu0 }
 0x48e   :  { %v2579_v59 = vpop.f32.mrb[14].mxu0 }
 0x48f   :  { %v1814_v60 = vpop.f32.mrb[15].mxu0 }
 0x494   :  { %v1825_v61 = vpop.f32.mrb[16].mxu0 }
 0x495   :  { %v752_v62 = vpop.f32.mrb[17].mxu0 }
 0x496   :  { %v1826_v63 = vpop.f32.mrb[18].mxu0 }
 0x497   :  { %v768_v0 = vpack.c.bf16 %v1826_v63, %v1825_v61  ;;  %v755_v1 = vpop.f32.mrb[19].mxu0 }
 0x498   :  { %v767_v2 = vpack.c.bf16 %v755_v1, %v752_v62 }
 0x499   :  { %1846 = vmatpush3.bf16.msra.mxu0 %v768_v0 }
 0x49a   :  { %1840 = vmatpush3.bf16.msra.mxu1 %v767_v2  ;;  %1857 = vmatprep.subr.bf16.mxu0 %v2277_v10 }
 0x49b   :  { %1913 = vmatprep.subr.msk.bf16.mxu1 %vm416_vm1, %v1016_v52 }
 0x4c2   :  { %v871_v3 = vpop.f32.mrb[20].mxu0 }
 0x4c3   :  { %v1837_v4 = vpop.f32.mrb[21].mxu0  ;;  %v872_v18 = vadd.f32 %v871_v3, %v770_v12 }
 0x4c4   :  { %v874_v5 = vpop.f32.mrb[22].mxu0 }
 0x4c5   :  { %v2582_v6 = vpop.f32.mrb[12].mxu1  ;;  %v1838_v7 = vpop.f32.mrb[23].mxu0  ;;  %v875_v23 = vadd.f32 %v874_v5, %v771_v16  ;;  %v884_v24 = vsel %vm567_vm4, %v872_v18, -inf }
 0x4c6   :  { %v1819_v8 = vpop.f32.mrb[13].mxu1 }
 0x4c7   :  { %v2584_v9 = vpop.f32.mrb[14].mxu1  ;;  %v887_v25 = vsel %vm567_vm4, %v875_v23, -inf }
 0x4c8   :  { %v1820_v11 = vpop.f32.mrb[15].mxu1 }
 0x4cd   :  { %v818_v13 = vpop.f32.mrb[16].mxu1 }
 0x4ce   :  { %v819_v14 = vadd.f32 %v818_v13, %v770_v12  ;;  %v1831_v15 = vpop.f32.mrb[17].mxu1  ;;  %v1028_v12 = vsel %vm416_vm1, %v1016_v52, 0 }
 0x4cf   :  { %v821_v17 = vpop.f32.mrb[18].mxu1 }
 0x4d0   :  { %v822_v19 = vadd.f32 %v821_v17, %v771_v16  ;;  %v1832_v20 = vpop.f32.mrb[19].mxu1  ;;  %v878_v21 = vsel %vm567_vm4, %v819_v14, -inf }
 0x4d1   :  { %879 = vmax.xlane.f32.xlu0 %v878_v21 }
 0x4d2   :  { %v881_v22 = vsel %vm567_vm4, %v822_v19, -inf }
 0x4d3   :  { %882 = vmax.xlane.f32.xlu1 %v881_v22 }
 0x4d5   :  { %885 = vmax.xlane.f32.xlu0 %v884_v24 }
 0x4d9   :  { %888 = vmax.xlane.f32.xlu0 %v887_v25 }
 0x4e4   :  { %1017 = vrot.lane.b32.xlu1 %v2522_v44, %s2280_s26 }
 0x55e   :  { %v880_v26 = vpop.xlane.xlu0 %879 }
 0x55f   :  { %v890_v27 = vsub.f32 %v819_v14, %v880_v26 }
 0x560   :  { %v883_v28 = vpop.xlane.xlu1 %882 }
 0x561   :  { %v894_v35 = vmul.f32 1.442695, %v890_v27  ;;  %v891_v36 = vsub.f32 %v822_v19, %v883_v28  ;;  %v1082_v27 = vld [vmem:[#allocation14 + $0x20] sm:$0xff] }
 0x562   :  { %v886_v32 = vpop.xlane.xlu0 %885 }
 0x563   :  { %v892_v34 = vsub.f32 %v872_v18, %v886_v32  ;;  %v896_v40 = vmul.f32 1.442695, %v891_v36 }
 0x564   :  { %v1018_v53 = vpop.permute.xlu1 %1017 }
 0x565   :  { %v898_v37 = vmul.f32 1.442695, %v892_v34 }
 0x566   :  { %v889_v38 = vpop.xlane.xlu0 %888 }
 0x567   :  { %1959 = vpow2.f32 %v898_v37  ;;  %v893_v39 = vsub.f32 %v875_v23, %v889_v38 }
 0x568   :  { %1961 = vpow2.f32 %v894_v35 }
 0x569   :  { %v900_v41 = vmul.f32 1.442695, %v893_v39 }
 0x56b   :  { %1963 = vpow2.f32 %v900_v41 }
 0x56c   :  { %1965 = vpow2.f32 %v896_v40 }
 0x571   :  { %v1960_v42 = vpop.eup %1959 }
 0x572   :  { %v908_v45 = vsel %vm567_vm4, %v1960_v42, 0.0  ;;  %v1962_v46 = vpop.eup %1961 }
 0x573   :  { %909 = vadd.xlane.f32.xlu0 %v908_v45  ;;  %v902_v48 = vsel %vm567_vm4, %v1962_v46, 0.0 }
 0x575   :  { %v1964_v47 = vpop.eup %1963 }
 0x576   :  { %v911_v49 = vsel %vm567_vm4, %v1964_v47, 0.0  ;;  %v1966_v50 = vpop.eup %1965 }
 0x577   :  { %903 = vadd.xlane.f32.xlu0 %v902_v48  ;;  %912 = vadd.xlane.f32.xlu1 %v911_v49  ;;  %v905_v51 = vsel %vm567_vm4, %v1966_v50, 0.0 }
 0x57b   :  { %906 = vadd.xlane.f32.xlu1 %v905_v51 }
 0x58c   :  { %1019 = vrot.lane.b32.xlu1 %v2520_v43, %s2280_s26 }
 0x58d   :  { %1086 = vrot.lane.b32.xlu0 %v2515_v33, %s2280_s26 }
 0x590   :  { %1084 = vrot.lane.b32.xlu1 %v2513_v31, %s2280_s26 }
 0x591   :  { %1137 = vrot.lane.b32.xlu0 %v2511_v30, %s2280_s26 }
 0x594   :  { %1135 = vrot.lane.b32.xlu1 %v2509_v29, %s2280_s26 }
 0x600   :  { %v910_v54 = vpop.xlane.xlu0 %909 }
 0x601   :  { %1967 = vrcp.f32 %v910_v54 }
 0x604   :  { %v913_v55 = vpop.xlane.xlu1 %912  ;;  %v904_v56 = vpop.xlane.xlu0 %903 }
 0x605   :  { %1969 = vrcp.f32 %v913_v55 }
 0x606   :  { %1971 = vrcp.f32 %v904_v56 }
 0x608   :  { %v907_v58 = vpop.xlane.xlu1 %906  ;;  %v1087_v1 = vpop.permute.xlu0 %1086 }
 0x609   :  { %1973 = vrcp.f32 %v907_v58  ;;  %v1092_v7 = vsel %vm409_vm3, %v1087_v1, 0 }
 0x60b   :  { %v1968_v60 = vpop.eup %1967 }
 0x60c   :  { %v920_v62 = vmul.f32 %v1968_v60, %v1960_v42  ;;  %v1020_v8 = vpop.permute.xlu1 %1019  ;;  %v1138_v14 = vpop.permute.xlu0 %1137 }
 0x60d   :  { %v1143_v15 = vsel %vm409_vm3, %v1138_v14, 0 }
 0x60f   :  { %v1970_v61 = vpop.eup %1969 }
 0x610   :  { %v921_v63 = vmul.f32 %v1970_v61, %v1964_v47  ;;  %v1972_v0 = vpop.eup %1971  ;;  %v1085_v13 = vpop.permute.xlu1 %1084 }
 0x611   :  { %v918_v4 = vmul.f32 %v1972_v0, %v1962_v46 }
 0x612   :  { %v923_v2 = vpack.c.bf16 %v921_v63, %v920_v62 }
 0x613   :  { %v1974_v3 = vpop.eup %1973 }
 0x614   :  { %v919_v5 = vmul.f32 %v1974_v3, %v1966_v50  ;;  %1848 = vmatmul.mubr.msk.bf16.vlgmr.msra.gmra.mrb[24].mxu0 %vm567_vm4, %v923_v2  ;;  %v1136_v16 = vpop.permute.xlu1 %1135 }
 0x615   :  { %1858 = vmatpush3.bf16.xpose.msra.mxu0 %v1092_v7  ;;  %1859 = vmatprep.mubr.msk.bf16.mxu0 %vm2278_vm2, %v2277_v10 }
 0x616   :  { %v922_v11 = vpack.c.bf16 %v919_v5, %v918_v4  ;;  %1869 = vmatprep.subr.bf16.mxu0 %v2277_v10 }
 0x618   :  { %1842 = vmatmul.mubr.msk.bf16.vlgmr.msra.gmra.mrb[20].mxu1 %vm567_vm4, %v922_v11 }
 0x619   :  { %1852 = vmatpush3.bf16.msra.mxu1 %v1028_v12  ;;  %1853 = vmatprep.mubr.msk.bf16.mxu1 %vm409_vm3, %v1018_v53  ;;  %v1324_v12 = vld [vmem:[#allocation16 + $0xc] sm:$0xf] }
 0x61a   :  { %1863 = vmatprep.subr.bf16.mxu1 %v2277_v10 }
 0x61c   :  { %1860 = vmatmul.mubr.msk.bf16.vlgmr.msra.gmra.mrb[28].mxu0 %vm409_vm3, %v1085_v13 }
 0x61d   :  { %1871 = vmatprep.mubr.msk.bf16.mxu0 %vm2278_vm2, %v2277_v10 }
 0x620   :  { %1854 = vmatmul.mubr.msk.bf16.vlgmr.msra.gmra.mrb[24].mxu1 %vm409_vm3, %v1020_v8 }
 0x621   :  { %1865 = vmatprep.mubr.msk.bf16.mxu1 %vm2278_vm2, %v2277_v10 }
 0x622   :  { %1864 = vmatpush3.bf16.xpose.msra.mxu1 %v1143_v15 }
 0x623   :  { %1875 = vmatprep.subr.bf16.mxu1 %v2277_v10 }
 0x629   :  { %1866 = vmatmul.mubr.msk.bf16.vlgmr.msra.gmra.mrb[28].mxu1 %vm409_vm3, %v1136_v16 }
 0x62a   :  { %1877 = vmatprep.mubr.msk.bf16.mxu1 %vm2278_vm2, %v2277_v10 }
 0x6e7   :  { %v1005_v17 = vpop.f32.mrb[24].mxu0 }
 0x6e8   :  { %v2628_v18 = vadd.f32 %v1005_v17, %v2582_v6  ;;  %v1849_v19 = vpop.f32.mrb[25].mxu0  ;;  %v1083_v6 = vld [vmem:[#allocation14 + $0x28] sm:$0xff] }
 0x6e9   :  { %v1008_v20 = vpop.f32.mrb[26].mxu0 }
 0x6ea   :  { %v2631_v21 = vadd.f32 %v1008_v20, %v2584_v9  ;;  %v1850_v22 = vpop.f32.mrb[27].mxu0 }
 0x6eb   :  { %v961_v23 = vpop.f32.mrb[20].mxu1 }
 0x6ec   :  { %v2634_v24 = vadd.f32 %v961_v23, %v2577_v57  ;;  %v1843_v25 = vpop.f32.mrb[21].mxu1  ;;  %v1336_v23 = vsel %vm416_vm1, %v1324_v12, 0 }
 0x6ed   :  { %v964_v26 = vpop.f32.mrb[22].mxu1 }
 0x6ee   :  { %v2637_v28 = vadd.f32 %v964_v26, %v2579_v59  ;;  %v1844_v32 = vpop.f32.mrb[23].mxu1 }
 0x6ef   :  { %v1128_v34 = vpop.f32.mrb[28].mxu0 }
 0x6f0   :  { %v1129_v35 = vadd.f32 %v1128_v34, %v1082_v27  ;;  %v1861_v36 = vpop.f32.mrb[29].mxu0 }
 0x6f1   :  { %v1131_v37 = vpop.f32.mrb[30].mxu0 }
 0x6f2   :  { %v1132_v38 = vadd.f32 %v1131_v37, %v1083_v6  ;;  %v1862_v9 = vpop.f32.mrb[31].mxu0  ;;  %v1186_v39 = vsel %vm567_vm4, %v1129_v35, -inf }
 0x6f3   :  { %1187 = vmax.xlane.f32.xlu0 %v1186_v39  ;;  %v1855_v40 = vpop.f32.mrb[24].mxu1 }
 0x6f4   :  { %v1064_v57 = vpop.f32.mrb[25].mxu1  ;;  %v1189_v41 = vsel %vm567_vm4, %v1132_v38, -inf }
 0x6f5   :  { %1190 = vmax.xlane.f32.xlu1 %v1189_v41  ;;  %v1856_v42 = vpop.f32.mrb[26].mxu1 }
 0x6f6   :  { %v1080_v45 = vpack.c.bf16 %v1856_v42, %v1855_v40  ;;  %v1067_v59 = vpop.f32.mrb[27].mxu1 }
 0x6f7   :  { %v1079_v46 = vpack.c.bf16 %v1067_v59, %v1064_v57 }
 0x6f8   :  { %1876 = vmatpush3.bf16.msra.mxu1 %v1080_v45 }
 0x6f9   :  { %1870 = vmatpush3.bf16.msra.mxu0 %v1079_v46  ;;  %1887 = vmatprep.subr.bf16.mxu1 %v2277_v10 }
 0x6fa   :  { %1914 = vmatprep.subr.msk.bf16.mxu0 %vm416_vm1, %v1324_v12 }
 0x6fc   :  { %v1179_v47 = vpop.f32.mrb[28].mxu1 }
 0x6fd   :  { %v1180_v48 = vadd.f32 %v1179_v47, %v1082_v27  ;;  %v1867_v49 = vpop.f32.mrb[29].mxu1 }
 0x6fe   :  { %v1182_v50 = vpop.f32.mrb[30].mxu1 }
 0x6ff   :  { %v1183_v51 = vadd.f32 %v1182_v50, %v1083_v6  ;;  %v1868_v52 = vpop.f32.mrb[31].mxu1  ;;  %v1192_v53 = vsel %vm567_vm4, %v1180_v48, -inf }
 0x700   :  { %1193 = vmax.xlane.f32.xlu0 %v1192_v53 }
 0x701   :  { %v1195_v54 = vsel %vm567_vm4, %v1183_v51, -inf }
 0x704   :  { %1196 = vmax.xlane.f32.xlu0 %v1195_v54 }
 0x780   :  { %v1188_v55 = vpop.xlane.xlu0 %1187 }
 0x781   :  { %v1198_v56 = vsub.f32 %v1129_v35, %v1188_v55 }
 0x782   :  { %v1191_v58 = vpop.xlane.xlu1 %1190 }
 0x783   :  { %v1202_v60 = vmul.f32 1.442695, %v1198_v56  ;;  %v1199_v61 = vsub.f32 %v1132_v38, %v1191_v58 }
 0x785   :  { %1975 = vpow2.f32 %v1202_v60  ;;  %v1204_v62 = vmul.f32 1.442695, %v1199_v61  ;;  %v1390_v61 = vld [vmem:[#allocation14 + $0x30] sm:$0xff] }
 0x787   :  { %1977 = vpow2.f32 %v1204_v62 }
 0x78d   :  { %v1194_v63 = vpop.xlane.xlu0 %1193 }
 0x78e   :  { %v1200_v0 = vsub.f32 %v1180_v48, %v1194_v63 }
 0x78f   :  { %v1976_v1 = vpop.eup %1975 }
 0x790   :  { %v1206_v2 = vmul.f32 1.442695, %v1200_v0  ;;  %v1210_v3 = vsel %vm567_vm4, %v1976_v1, 0.0 }
 0x791   :  { %v1978_v4 = vpop.eup %1977  ;;  %1211 = vadd.xlane.f32.xlu0 %v1210_v3  ;;  %v1197_v11 = vpop.xlane.xlu0 %1196 }
 0x792   :  { %1979 = vpow2.f32 %v1206_v2  ;;  %v1213_v5 = vsel %vm567_vm4, %v1978_v4, 0.0  ;;  %v1201_v13 = vsub.f32 %v1183_v51, %v1197_v11 }
 0x793   :  { %1214 = vadd.xlane.f32.xlu1 %v1213_v5 }
 0x794   :  { %v1208_v14 = vmul.f32 1.442695, %v1201_v13 }
 0x796   :  { %1981 = vpow2.f32 %v1208_v14 }
 0x79c   :  { %v1980_v7 = vpop.eup %1979 }
 0x79d   :  { %v1216_v8 = vsel %vm567_vm4, %v1980_v7, 0.0 }
 0x79e   :  { %1217 = vadd.xlane.f32.xlu0 %v1216_v8 }
 0x7a0   :  { %v1982_v15 = vpop.eup %1981 }
 0x7a1   :  { %v1219_v16 = vsel %vm567_vm4, %v1982_v15, 0.0 }
 0x7a4   :  { %1327 = vrot.lane.b32.xlu1 %v2520_v43, %s2281_s16 }
 0x7a8   :  { %1394 = vrot.lane.b32.xlu1 %v2515_v33, %s2281_s16 }
 0x7b4   :  { %1325 = vrot.lane.b32.xlu0 %v2522_v44, %s2281_s16 }
 0x7b8   :  { %1392 = vrot.lane.b32.xlu0 %v2513_v31, %s2281_s16 }
 0x7cc   :  { %1220 = vadd.xlane.f32.xlu1 %v1219_v16 }
 0x7dd   :  { %1445 = vrot.lane.b32.xlu1 %v2511_v30, %s2281_s16 }
 0x7e1   :  { %1443 = vrot.lane.b32.xlu1 %v2509_v29, %s2281_s16 }
 0x81e   :  { %v1212_v33 = vpop.xlane.xlu0 %1211 }
 0x81f   :  { %1983 = vrcp.f32 %v1212_v33 }
 0x820   :  { %v1215_v43 = vpop.xlane.xlu1 %1214 }
 0x821   :  { %1985 = vrcp.f32 %v1215_v43 }
 0x824   :  { %v1328_v29 = vpop.permute.xlu1 %1327 }
 0x828   :  { %v1395_v30 = vpop.permute.xlu1 %1394 }
 0x829   :  { %v1984_v44 = vpop.eup %1983  ;;  %v1400_v9 = vsel %vm409_vm3, %v1395_v30, 0 }
 0x82a   :  { %v1226_v20 = vmul.f32 %v1984_v44, %v1976_v1  ;;  %v1391_v1 = vld [vmem:[#allocation14 + $0x38] sm:$0xff] }
 0x82b   :  { %v1986_v17 = vpop.eup %1985  ;;  %v1218_v19 = vpop.xlane.xlu0 %1217 }
 0x82c   :  { %v1227_v22 = vmul.f32 %v1986_v17, %v1978_v4  ;;  %1987 = vrcp.f32 %v1218_v19 }
 0x82e   :  { %v1230_v31 = vpack.c.bf16 %v1227_v22, %v1226_v20 }
 0x82f   :  { %v1326_v25 = vpop.permute.xlu0 %1325 }
 0x830   :  { %1872 = vmatmul.mubr.msk.bf16.vlgmr.msra.gmra.mrb[32].mxu0 %vm567_vm4, %v1230_v31 }
 0x831   :  { %1883 = vmatprep.mubr.msk.bf16.mxu0 %vm409_vm3, %v1326_v25  ;;  %1882 = vmatpush3.bf16.msra.mxu0 %v1336_v23 }
 0x832   :  { %1893 = vmatprep.subr.bf16.mxu0 %v2277_v10 }
 0x833   :  { %v1393_v39 = vpop.permute.xlu0 %1392 }
 0x836   :  { %v1988_v34 = vpop.eup %1987 }
 0x837   :  { %v1228_v35 = vmul.f32 %v1988_v34, %v1980_v7 }
 0x838   :  { %1884 = vmatmul.mubr.msk.bf16.vlgmr.msra.gmra.mrb[36].mxu0 %vm409_vm3, %v1328_v29 }
 0x839   :  { %1895 = vmatprep.mubr.msk.bf16.mxu0 %vm2278_vm2, %v2277_v10 }
 0x859   :  { %v1221_v26 = vpop.xlane.xlu1 %1220 }
 0x85a   :  { %1989 = vrcp.f32 %v1221_v26 }
 0x85d   :  { %v1446_v27 = vpop.permute.xlu1 %1445 }
 0x85e   :  { %v1451_v32 = vsel %vm409_vm3, %v1446_v27, 0 }
 0x85f   :  { %1894 = vmatpush3.bf16.xpose.msra.mxu0 %v1451_v32 }
 0x860   :  { %1905 = vmatprep.subr.bf16.mxu0 %v2277_v10 }
 0x861   :  { %v1444_v37 = vpop.permute.xlu1 %1443 }
 0x864   :  { %v1990_v6 = vpop.eup %1989 }
 0x865   :  { %v1229_v36 = vmul.f32 %v1990_v6, %v1982_v15 }
 0x866   :  { %1896 = vmatmul.mubr.msk.bf16.vlgmr.msra.gmra.mrb[40].mxu0 %vm409_vm3, %v1444_v37 }
 0x867   :  { %v1231_v38 = vpack.c.bf16 %v1229_v36, %v1228_v35  ;;  %1907 = vmatprep.mubr.msk.bf16.mxu0 %vm2278_vm2, %v2277_v10 }
 0x869   :  { %1878 = vmatmul.mubr.msk.bf16.vlgmr.msra.gmra.mrb[32].mxu1 %vm567_vm4, %v1231_v38 }
 0x86a   :  { %1888 = vmatpush3.bf16.xpose.msra.mxu1 %v1400_v9  ;;  %1889 = vmatprep.mubr.msk.bf16.mxu1 %vm2278_vm2, %v2277_v10 }
 0x86b   :  { %1899 = vmatprep.subr.bf16.mxu1 %v2277_v10 }
 0x871   :  { %1890 = vmatmul.mubr.msk.bf16.vlgmr.msra.gmra.mrb[36].mxu1 %vm409_vm3, %v1393_v39 }
 0x872   :  { %1901 = vmatprep.mubr.msk.bf16.mxu1 %vm2278_vm2, %v2277_v10 }
 0x903   :  { %v1269_v40 = vpop.f32.mrb[32].mxu0 }
 0x904   :  { %v2676_v57 = vadd.f32 %v1269_v40, %v2634_v24  ;;  %v1873_v41 = vpop.f32.mrb[33].mxu0 }
 0x905   :  { %v1272_v42 = vpop.f32.mrb[34].mxu0 }
 0x906   :  { %v2679_v45 = vadd.f32 %v1272_v42, %v2637_v28  ;;  %v1874_v59 = vpop.f32.mrb[35].mxu0 }
 0x90b   :  { %v1885_v46 = vpop.f32.mrb[36].mxu0 }
 0x90c   :  { %v1372_v47 = vpop.f32.mrb[37].mxu0 }
 0x90d   :  { %v1886_v48 = vpop.f32.mrb[38].mxu0 }
 0x90e   :  { %v1388_v49 = vpack.c.bf16 %v1886_v48, %v1885_v46  ;;  %v1375_v50 = vpop.f32.mrb[39].mxu0 }
 0x90f   :  { %v1387_v51 = vpack.c.bf16 %v1375_v50, %v1372_v47 }
 0x910   :  { %1906 = vmatpush3.bf16.msra.mxu0 %v1388_v49  ;;  %v1710_v49 = vld [vmem:[#allocation17] ss:$0 sm:$0xff] }
 0x911   :  { %1900 = vmatpush3.bf16.msra.mxu1 %v1387_v51 }
 0x939   :  { %v1487_v52 = vpop.f32.mrb[40].mxu0 }
 0x93a   :  { %v1897_v10 = vpop.f32.mrb[41].mxu0  ;;  %v1488_v3 = vadd.f32 %v1487_v52, %v1390_v61 }
 0x93b   :  { %v1490_v53 = vpop.f32.mrb[42].mxu0 }
 0x93c   :  { %v1313_v54 = vpop.f32.mrb[32].mxu1  ;;  %v1898_v24 = vpop.f32.mrb[43].mxu0  ;;  %v1491_v8 = vadd.f32 %v1490_v53, %v1391_v1 }
 0x93d   :  { %v2682_v55 = vadd.f32 %v1313_v54, %v2628_v18  ;;  %v1879_v56 = vpop.f32.mrb[33].mxu1 }
 0x93e   :  { %v1316_v28 = vpop.f32.mrb[34].mxu1  ;;  %v1503_v11 = vsel %vm567_vm4, %v1491_v8, -inf }
 0x93f   :  { %v2685_v58 = vadd.f32 %v1316_v28, %v2631_v21  ;;  %v1880_v60 = vpop.f32.mrb[35].mxu1  ;;  %v1500_v21 = vsel %vm567_vm4, %v1488_v3, -inf }
 0x944   :  { %v1436_v62 = vpop.f32.mrb[36].mxu1 }
 0x945   :  { %v1437_v63 = vadd.f32 %v1436_v62, %v1390_v61  ;;  %v1891_v0 = vpop.f32.mrb[37].mxu1 }
 0x946   :  { %v1439_v2 = vpop.f32.mrb[38].mxu1 }
 0x947   :  { %v1440_v4 = vadd.f32 %v1439_v2, %v1391_v1  ;;  %v1892_v5 = vpop.f32.mrb[39].mxu1  ;;  %v1494_v7 = vsel %vm567_vm4, %v1437_v63, -inf }
 0x948   :  { %1495 = vmax.xlane.f32.xlu0 %v1494_v7 }
 0x949   :  { %v1497_v18 = vsel %vm567_vm4, %v1440_v4, -inf }
 0x94a   :  { %1498 = vmax.xlane.f32.xlu1 %v1497_v18 }
 0x94c   :  { %1501 = vmax.xlane.f32.xlu0 %v1500_v21 }
 0x950   :  { %1504 = vmax.xlane.f32.xlu0 %v1503_v11 }
 0x9d5   :  { %v1496_v12 = vpop.xlane.xlu0 %1495 }
 0x9d6   :  { %v1506_v13 = vsub.f32 %v1437_v63, %v1496_v12 }
 0x9d7   :  { %v1499_v14 = vpop.xlane.xlu1 %1498 }
 0x9d8   :  { %v1510_v15 = vmul.f32 1.442695, %v1506_v13  ;;  %v1507_v16 = vsub.f32 %v1440_v4, %v1499_v14 }
 0x9d9   :  { %v1502_v33 = vpop.xlane.xlu0 %1501 }
 0x9da   :  { %1991 = vpow2.f32 %v1510_v15  ;;  %v1512_v43 = vmul.f32 1.442695, %v1507_v16  ;;  %v1508_v44 = vsub.f32 %v1488_v3, %v1502_v33 }
 0x9dc   :  { %1993 = vpow2.f32 %v1512_v43  ;;  %v1514_v17 = vmul.f32 1.442695, %v1508_v44 }
 0x9dd   :  { %v1505_v19 = vpop.xlane.xlu0 %1504 }
 0x9de   :  { %1995 = vpow2.f32 %v1514_v17  ;;  %v1509_v20 = vsub.f32 %v1491_v8, %v1505_v19 }
 0x9e0   :  { %v1516_v22 = vmul.f32 1.442695, %v1509_v20 }
 0x9e2   :  { %1997 = vpow2.f32 %v1516_v22 }
 0x9e4   :  { %v1992_v31 = vpop.eup %1991 }
 0x9e5   :  { %v1518_v23 = vsel %vm567_vm4, %v1992_v31, 0.0 }
 0x9e6   :  { %v1994_v25 = vpop.eup %1993  ;;  %1519 = vadd.xlane.f32.xlu0 %v1518_v23 }
 0x9e7   :  { %v1521_v29 = vsel %vm567_vm4, %v1994_v25, 0.0 }
 0x9e8   :  { %v1996_v30 = vpop.eup %1995  ;;  %1522 = vadd.xlane.f32.xlu1 %v1521_v29 }
 0x9e9   :  { %v1524_v26 = vsel %vm567_vm4, %v1996_v30, 0.0 }
 0x9ea   :  { %1525 = vadd.xlane.f32.xlu0 %v1524_v26 }
 0x9ec   :  { %v1998_v27 = vpop.eup %1997 }
 0x9ed   :  { %v1527_v32 = vsel %vm567_vm4, %v1998_v27, 0.0 }
 0x9ee   :  { %1528 = vadd.xlane.f32.xlu1 %v1527_v32 }
 0xa73   :  { %v1520_v34 = vpop.xlane.xlu0 %1519 }
 0xa74   :  { %1999 = vrcp.f32 %v1520_v34 }
 0xa75   :  { %v1523_v6 = vpop.xlane.xlu1 %1522 }
 0xa76   :  { %2001 = vrcp.f32 %v1523_v6 }
 0xa77   :  { %v1526_v35 = vpop.xlane.xlu0 %1525 }
 0xa78   :  { %2003 = vrcp.f32 %v1526_v35 }
 0xa7b   :  { %v1529_v36 = vpop.xlane.xlu1 %1528 }
 0xa7c   :  { %2005 = vrcp.f32 %v1529_v36 }
 0xa7e   :  { %v2000_v37 = vpop.eup %1999 }
 0xa7f   :  { %v1534_v9 = vmul.f32 %v2000_v37, %v1992_v31 }
 0xa80   :  { %v2002_v38 = vpop.eup %2001 }
 0xa81   :  { %v1535_v39 = vmul.f32 %v2002_v38, %v1994_v25 }
 0xa82   :  { %v2004_v41 = vpop.eup %2003 }
 0xa83   :  { %v1538_v40 = vpack.c.bf16 %v1535_v39, %v1534_v9  ;;  %v1536_v59 = vmul.f32 %v2004_v41, %v1996_v30 }
 0xa85   :  { %1902 = vmatmul.mubr.msk.bf16.vlgmr.msra.gmra.mrb[40].mxu1 %vm567_vm4, %v1538_v40 }
 0xa86   :  { %v2006_v42 = vpop.eup %2005 }
 0xa87   :  { %v1537_v46 = vmul.f32 %v2006_v42, %v1998_v27 }
 0xa89   :  { %v1539_v47 = vpack.c.bf16 %v1537_v46, %v1536_v59 }
 0xa8b   :  { %1908 = vmatmul.mubr.msk.bf16.vlgmr.msra.gmra.mrb[44].mxu0 %vm567_vm4, %v1539_v47 }
 0xb58   :  { %v1577_v48 = vpop.f32.mrb[40].mxu1 }
 0xb59   :  { %v1628_v50 = vadd.f32 %v1577_v48, %v2676_v57  ;;  %v1903_v51 = vpop.f32.mrb[41].mxu1 }
 0xb5a   :  { %v1580_v52 = vpop.f32.mrb[42].mxu1 }
 0xb5b   :  { %v1639_v10 = vadd.f32 %v1710_v49, %v1628_v50  ;;  %v1629_v53 = vadd.f32 %v1580_v52, %v2679_v45  ;;  %v1904_v54 = vpop.f32.mrb[43].mxu1 }
 0xb5d   :  { %1643 = vst.msk [vmem:[#allocation19] sm:$0xff] %vm202_vm0, %v1639_v10  ;;  %v1640_v24 = vadd.f32 %v1710_v49, %v1629_v53 }
 0xb5e   :  { %v1621_v56 = vpop.f32.mrb[44].mxu0 }
 0xb5f   :  { %1644 = vst.msk [vmem:[#allocation19 + $0x8] sm:$0xff] %vm202_vm0, %v1640_v24  ;;  %v1630_v28 = vadd.f32 %v1621_v56, %v2682_v55  ;;  %v1909_v60 = vpop.f32.mrb[45].mxu0 }
 0xb60   :  { %v1624_v61 = vpop.f32.mrb[46].mxu0 }
 0xb61   :  { %v1641_v62 = vadd.f32 %v1710_v49, %v1630_v28  ;;  %v1631_v57 = vadd.f32 %v1624_v61, %v2685_v58  ;;  %v1910_v63 = vpop.f32.mrb[47].mxu0 }
 0xb63   :  { %1645 = vst.msk [vmem:[#allocation19 + $0x10] sm:$0xff] %vm202_vm0, %v1641_v62  ;;  %v1642_v45 = vadd.f32 %v1710_v49, %v1631_v57 }
 0xb65   :  { %1646 = vst.msk [vmem:[#allocation19 + $0x18] sm:$0xff] %vm202_vm0, %v1642_v45 }
 0xb66   :  { %2238 = shalt.err (!%p2235_p0)
}
 0xb67   :  { %s2239_s1 = scalar_lea.hbm %s2730_s10, 512 }
 0xb68   :  { %p2240_p1 = scmp.ne.s32.totalorder %s2730_s10, %s2239_s1  ;;  %p2243_p2 = scmp.lt.u32.totalorder %s2239_s1, %s2730_s10 }
 0xb6a   :  { %p2245_p3 = pnand %p2243_p2, %p2240_p1 }
 0xb6c   :  { %2248 = shalt.err (!%p2245_p3)
}
 0xb6d   :  { %1658 = dma.vmem_to_hbm [thread:$0]  %s1653_s17, 512, %s2730_s10, [#allocation4], %s2269_s5, %s2269_s5, %s2270_s20  }
 0xb6e   :  { %2261 = dma.done.wait [#allocation4], 512  }
 0xb6f   :  { %2262 = vsyncadd [#allocation4], 4294966784 }
 0xb70   :  { %1662 = vsyncpa [#allocation3], 1 }
 0xb71   :  { %1663 = vsyncpa [#allocation6], 1 }
 0xb72   :  { %1664 = vsyncpa [#allocation9], 1 }
 0xb73   :  { %1665 = vsyncpa [#allocation12], 1 }
 0xb74   :  { %1666 = vsyncpa [#allocation15], 1 }
 0xb75   :  { %1667 = vsyncpa [#allocation18], 1 }
 0xb76   :  { %1668 = vsyncpa [#allocation4], 1 }

</bundles_post_ra>
